<compile_context>
chip_gen: v7x
topology: tpu7x:2x2x1
jax: 0.10.0
libtpu: 0.0.40
codegen_flags: <defaults>
</compile_context>

<pallas_src>
import functools

import jax
import jax.numpy as jnp
from jax.experimental import pallas as pl
from jax.experimental.pallas import tpu as pltpu


def _relu_sin_tanh_rows(h, hidden_size):
    """torch relu_sin_tanh on a (3*hidden, n) feature-major tile (static chunks).

    Chunks are sublane-aligned (and the concat free) when hidden_size % 8 == 0
    (default 8); other values remain numerically correct, just less tidy.
    """
    a = jnp.maximum(h[:hidden_size, :], 0.0)
    b = jnp.sin(h[hidden_size:2 * hidden_size, :])
    c = jnp.tanh(h[2 * hidden_size:, :])
    return jnp.concatenate([a, b, c], axis=0)


def _cppn_kernel(noise_ref, coords_ref, w1z_ref, w1c_ref, b14_ref,
                 wmid_ref, w5_ref, b5_ref, o_ref, *, hidden_size, bblk):
    hd3 = 3 * hidden_size
    tile_m = coords_ref.shape[-1]
    prec = jax.lax.Precision.DEFAULT

    # ---- batch-invariant work, hoisted out of the per-image loop ----------
    # fc1 coordinate contribution + b1 (fc1 is linear; the z part is per image).
    hc = jnp.dot(w1c_ref[...], coords_ref[...],
                 preferred_element_type=jnp.float32, precision=prec)
    hc = hc + jnp.broadcast_to(b14_ref[0], (hd3, tile_m))
    w1z = w1z_ref[...]                                   # (hd3, latent), z folded in
    # Resident mid/out weights read once; biases lane-broadcast once per step
    # (JAX does not CSE broadcast_in_dim, so hoist them explicitly).
    wmids = [wmid_ref[j] for j in range(3)]              # 3 x (hd3, hd3)
    bmids = [jnp.broadcast_to(b14_ref[j + 1], (hd3, tile_m)) for j in range(3)]
    w5 = w5_ref[...]                                      # (3, hd3)
    b5 = jnp.broadcast_to(b5_ref[...], (3, tile_m))

    # ---- per-image loop (bblk is a small static constant -> fully unrolled) --
    for i in range(bblk):
        # fc1 z contribution for image i: (hd3, latent) @ (latent, 1).
        hz = jnp.dot(w1z, noise_ref[i],
                     preferred_element_type=jnp.float32, precision=prec)
        h = _relu_sin_tanh_rows(hc + hz, hidden_size)
        for w, b in zip(wmids, bmids):
            h = jnp.dot(w, h, preferred_element_type=jnp.float32,
                        precision=prec) + b
            h = _relu_sin_tanh_rows(h, hidden_size)
        h = jnp.dot(w5, h, preferred_element_type=jnp.float32,
                    precision=prec) + b5
        o_ref[i] = jax.nn.sigmoid(h)          # (3, tile_m), lane-dense full store


def _coord_grid(height, width):
    # torch.meshgrid(linspace(-3,3,W), linspace(-3,3,H), indexing='ij') with
    # H == W: channel 0 varies along the first spatial axis, channel 1 along
    # the second.  (The torch module's buffer only supports H == W.)
    lin = -3.0 + (6.0 / (height - 1)) * jnp.arange(height, dtype=jnp.float32)
    c0 = jnp.broadcast_to(lin[:, None], (height, width))
    c1 = jnp.broadcast_to(lin[None, :], (height, width))
    return jnp.stack([c0, c1], axis=0)        # (2, H, W)


def init_params(key, latent_size=10, hidden_size=8):
    """Deterministic params with nn.Linear-style init (weights stored (in, out))."""
    hd = 3 * hidden_size
    dims = [(latent_size + 2, hd), (hd, hd), (hd, hd), (hd, hd), (hd, 3)]
    keys = jax.random.split(key, 2 * len(dims) + 1)
    params = {"z": jax.random.normal(keys[0], (latent_size,), jnp.float32)}
    for i, (fin, fout) in enumerate(dims):
        bound = 1.0 / float(fin) ** 0.5
        params[f"w{i + 1}"] = jax.random.uniform(
            keys[1 + 2 * i], (fin, fout), jnp.float32, -bound, bound)
        params[f"b{i + 1}"] = jax.random.uniform(
            keys[2 + 2 * i], (1, fout), jnp.float32, -bound, bound)
    return params


def cppn_forward(params, noise, *, height=16, width=16,
                 latent_size=10, hidden_size=8, tile_m=4096, batch_block=8):
    assert height == width, "CPPNGenerator coordinate buffer requires H == W"
    batch = noise.shape[0]
    hd3 = 3 * hidden_size
    hw = height * width
    tile_m = min(tile_m, hw)
    assert hw % tile_m == 0 and (tile_m % 128 == 0 or tile_m == hw)

    # Batch blocking: amortize per-grid-step overhead, but keep >= 2 grid steps
    # along the parallel batch axis when possible (v7x megacore), and require an
    # even split of the batch.
    bblk = max(1, min(batch_block, batch // 2 if batch >= 2 else 1))
    while batch % bblk:
        bblk -= 1

    # fc1(x) = W1z @ (z*noise_b) + W1c @ coords + b1.  Fold z into the latent
    # weight columns so the kernel consumes raw noise (no per-call wrapper math).
    w1 = params["w1"].T                                          # (hd3, latent+2)
    w1z = w1[:, :latent_size] * params["z"][None, :]             # (hd3, latent)
    w1c = w1[:, latent_size:]                                    # (hd3, 2)
    b14 = jnp.stack([params[f"b{i}"].reshape(hd3, 1)
                     for i in range(1, 5)])                      # (4, hd3, 1)
    wmid = jnp.stack([params[f"w{i}"].T for i in range(2, 5)])   # (3, hd3, hd3)
    w5 = params["w5"].T                                          # (3, hd3)
    b5 = params["b5"].reshape(3, 1)                              # (3, 1)
    coords = _coord_grid(height, width).reshape(2, hw)           # (2, H*W)
    noise3 = noise.reshape(batch, latent_size, 1)                # (B, latent, 1)

    def resident(a):
        nd = a.ndim
        return pl.BlockSpec(a.shape, lambda b, t, _nd=nd: (0,) * _nd)

    in_specs = [
        pl.BlockSpec((bblk, latent_size, 1), lambda b, t: (b, 0, 0)),  # noise
        pl.BlockSpec((2, tile_m), lambda b, t: (0, t)),                # coords
        resident(w1z), resident(w1c), resident(b14),
        resident(wmid), resident(w5), resident(b5),
    ]

    kernel = functools.partial(_cppn_kernel, hidden_size=hidden_size, bblk=bblk)

    out = pl.pallas_call(
        kernel,
        out_shape=jax.ShapeDtypeStruct((batch, 3, hw), jnp.float32),
        grid_spec=pltpu.PrefetchScalarGridSpec(
            num_scalar_prefetch=0,
            grid=(batch // bblk, hw // tile_m),
            in_specs=in_specs,
            out_specs=pl.BlockSpec((bblk, 3, tile_m), lambda b, t: (b, 0, t)),
        ),
        compiler_params=pltpu.CompilerParams(
            dimension_semantics=("parallel", "parallel")),
    )(noise3, coords, w1z, w1c, b14, wmid, w5, b5)

    # (B, 3, H*W) -> NCHW with a pure reshape (no transpose needed).
    return out.reshape(batch, 3, height, width)


def cppn_forward_ref(params, noise, *, height=16, width=16,
                     latent_size=10, hidden_size=8):
    """Pure-JAX reference (feature-minor, mirrors the torch module)."""
    assert height == width
    batch = noise.shape[0]
    zb = params["z"][None, :] * noise
    z_map = jnp.broadcast_to(zb[:, None, None, :],
                             (batch, height, width, latent_size))
    coords = jnp.broadcast_to(
        _coord_grid(height, width).transpose(1, 2, 0)[None],
        (batch, height, width, 2))
    h = jnp.concatenate([z_map, coords], axis=-1).reshape(-1, latent_size + 2)
    for i in range(1, 5):
        h = h @ params[f"w{i}"] + params[f"b{i}"]
        h = jnp.concatenate(
            [jnp.maximum(h[:, :hidden_size], 0.0),
             jnp.sin(h[:, hidden_size:2 * hidden_size]),
             jnp.tanh(h[:, 2 * hidden_size:])], axis=-1)
    h = jax.nn.sigmoid(h @ params["w5"] + params["b5"])
    return h.reshape(batch, height, width, 3).transpose(0, 3, 1, 2)


if __name__ == "__main__":
    LATENT, HIDDEN = 10, 8
    BATCH, H, W = 4, 16, 16   # small shapes (module default is B=64, 64x64)

    key = jax.random.PRNGKey(0)
    k_params, k_noise = jax.random.split(key)
    params = init_params(k_params, LATENT, HIDDEN)
    noise = jax.random.normal(k_noise, (BATCH, LATENT), jnp.float32)

    out = cppn_forward(params, noise, height=H, width=W,
                       latent_size=LATENT, hidden_size=HIDDEN)
    out = jax.block_until_ready(out)

    ref = cppn_forward_ref(params, noise, height=H, width=W,
                           latent_size=LATENT, hidden_size=HIDDEN)
    assert out.shape == (BATCH, 3, H, W), out.shape
    # Kernel dots are pinned to DEFAULT matmul precision (single bf16 MXU pass),
    # so compare against the f32-ish reference with a tolerance that still
    # catches layout / semantics bugs (outputs are post-sigmoid in [0, 1]).
    err = float(jnp.max(jnp.abs(out - ref)))
    assert err < 5e-3, err
    print("KERNEL_OK")
</pallas_src>

<mosaic_0001>
module attributes {stable_mosaic.version = 11 : i64} {
  func.func @_cppn_kernel(%arg0: i32, %arg1: i32, %arg2: memref<2x10x1xf32, #tpu.memory_space<vmem>>, %arg3: memref<2x256xf32, #tpu.memory_space<vmem>>, %arg4: memref<24x10xf32, #tpu.memory_space<vmem>>, %arg5: memref<24x2xf32, #tpu.memory_space<vmem>>, %arg6: memref<4x24x1xf32, #tpu.memory_space<vmem>>, %arg7: memref<3x24x24xf32, #tpu.memory_space<vmem>>, %arg8: memref<3x24xf32, #tpu.memory_space<vmem>>, %arg9: memref<3x1xf32, #tpu.memory_space<vmem>>, %arg10: memref<2x3x256xf32, #tpu.memory_space<vmem>>) attributes {dimension_semantics = [#tpu.dimension_semantics<parallel>, #tpu.dimension_semantics<parallel>], iteration_bounds = array<i64: 2, 1>, scalar_prefetch = 0 : i64, scratch_operands = 0 : i64, tpu.core_type = #tpu.core_type<tc>, window_params = [{transform_indices = @transform_0, window_bounds = array<i64: 2, 10, 1>}, {transform_indices = @transform_1, window_bounds = array<i64: 2, 256>}, {pipeline_mode = #tpu.pipeline_mode<synchronous>, transform_indices = @transform_2, window_bounds = array<i64: 24, 10>}, {pipeline_mode = #tpu.pipeline_mode<synchronous>, transform_indices = @transform_3, window_bounds = array<i64: 24, 2>}, {pipeline_mode = #tpu.pipeline_mode<synchronous>, transform_indices = @transform_4, window_bounds = array<i64: 4, 24, 1>}, {pipeline_mode = #tpu.pipeline_mode<synchronous>, transform_indices = @transform_5, window_bounds = array<i64: 3, 24, 24>}, {pipeline_mode = #tpu.pipeline_mode<synchronous>, transform_indices = @transform_6, window_bounds = array<i64: 3, 24>}, {pipeline_mode = #tpu.pipeline_mode<synchronous>, transform_indices = @transform_7, window_bounds = array<i64: 3, 1>}, {transform_indices = @transform_8, window_bounds = array<i64: 2, 3, 256>}]} {
    %c0 = arith.constant 0 : index
    %c0_0 = arith.constant 0 : index
    %0 = vector.load %arg5[%c0, %c0_0] : memref<24x2xf32, #tpu.memory_space<vmem>>, vector<24x2xf32>
    %c0_1 = arith.constant 0 : index
    %c0_2 = arith.constant 0 : index
    %1 = vector.load %arg3[%c0_1, %c0_2] : memref<2x256xf32, #tpu.memory_space<vmem>>, vector<2x256xf32>
    %cst = arith.constant dense<0.000000e+00> : vector<24x256xf32>
    %2 = tpu.matmul %0, %1, %cst {dimension_numbers = #tpu.dot_dimension_numbers<[1], [0], [0], [1], [0, 0, 1, 1], [], []>} : vector<24x2xf32>, vector<2x256xf32>, vector<24x256xf32> -> vector<24x256xf32>
    %c0_3 = arith.constant 0 : index
    %c0_4 = arith.constant 0 : index
    %c0_5 = arith.constant 0 : index
    %3 = vector.load %arg6[%c0_3, %c0_4, %c0_5] : memref<4x24x1xf32, #tpu.memory_space<vmem>>, vector<1x24x1xf32>
    %4 = vector.shape_cast %3 : vector<1x24x1xf32> to vector<24x1xf32>
    %5 = vector.shape_cast %4 : vector<24x1xf32> to vector<24x1xf32>
    %6 = vector.broadcast %5 : vector<24x1xf32> to vector<24x256xf32>
    %7 = arith.addf %2, %6 : vector<24x256xf32>
    %c0_6 = arith.constant 0 : index
    %c0_7 = arith.constant 0 : index
    %8 = vector.load %arg4[%c0_6, %c0_7] : memref<24x10xf32, #tpu.memory_space<vmem>>, vector<24x10xf32>
    %c0_8 = arith.constant 0 : index
    %c0_9 = arith.constant 0 : index
    %c0_10 = arith.constant 0 : index
    %9 = vector.load %arg7[%c0_8, %c0_9, %c0_10] : memref<3x24x24xf32, #tpu.memory_space<vmem>>, vector<1x24x24xf32>
    %10 = vector.shape_cast %9 : vector<1x24x24xf32> to vector<24x24xf32>
    %c1 = arith.constant 1 : index
    %c0_11 = arith.constant 0 : index
    %c0_12 = arith.constant 0 : index
    %11 = vector.load %arg7[%c1, %c0_11, %c0_12] : memref<3x24x24xf32, #tpu.memory_space<vmem>>, vector<1x24x24xf32>
    %12 = vector.shape_cast %11 : vector<1x24x24xf32> to vector<24x24xf32>
    %c2 = arith.constant 2 : index
    %c0_13 = arith.constant 0 : index
    %c0_14 = arith.constant 0 : index
    %13 = vector.load %arg7[%c2, %c0_13, %c0_14] : memref<3x24x24xf32, #tpu.memory_space<vmem>>, vector<1x24x24xf32>
    %14 = vector.shape_cast %13 : vector<1x24x24xf32> to vector<24x24xf32>
    %c1_15 = arith.constant 1 : index
    %c0_16 = arith.constant 0 : index
    %c0_17 = arith.constant 0 : index
    %15 = vector.load %arg6[%c1_15, %c0_16, %c0_17] : memref<4x24x1xf32, #tpu.memory_space<vmem>>, vector<1x24x1xf32>
    %16 = vector.shape_cast %15 : vector<1x24x1xf32> to vector<24x1xf32>
    %17 = vector.shape_cast %16 : vector<24x1xf32> to vector<24x1xf32>
    %18 = vector.broadcast %17 : vector<24x1xf32> to vector<24x256xf32>
    %c2_18 = arith.constant 2 : index
    %c0_19 = arith.constant 0 : index
    %c0_20 = arith.constant 0 : index
    %19 = vector.load %arg6[%c2_18, %c0_19, %c0_20] : memref<4x24x1xf32, #tpu.memory_space<vmem>>, vector<1x24x1xf32>
    %20 = vector.shape_cast %19 : vector<1x24x1xf32> to vector<24x1xf32>
    %21 = vector.shape_cast %20 : vector<24x1xf32> to vector<24x1xf32>
    %22 = vector.broadcast %21 : vector<24x1xf32> to vector<24x256xf32>
    %c3 = arith.constant 3 : index
    %c0_21 = arith.constant 0 : index
    %c0_22 = arith.constant 0 : index
    %23 = vector.load %arg6[%c3, %c0_21, %c0_22] : memref<4x24x1xf32, #tpu.memory_space<vmem>>, vector<1x24x1xf32>
    %24 = vector.shape_cast %23 : vector<1x24x1xf32> to vector<24x1xf32>
    %25 = vector.shape_cast %24 : vector<24x1xf32> to vector<24x1xf32>
    %26 = vector.broadcast %25 : vector<24x1xf32> to vector<24x256xf32>
    %c0_23 = arith.constant 0 : index
    %c0_24 = arith.constant 0 : index
    %27 = vector.load %arg8[%c0_23, %c0_24] : memref<3x24xf32, #tpu.memory_space<vmem>>, vector<3x24xf32>
    %c0_25 = arith.constant 0 : index
    %c0_26 = arith.constant 0 : index
    %28 = vector.load %arg9[%c0_25, %c0_26] : memref<3x1xf32, #tpu.memory_space<vmem>>, vector<3x1xf32>
    %29 = vector.shape_cast %28 : vector<3x1xf32> to vector<3x1xf32>
    %30 = vector.broadcast %29 : vector<3x1xf32> to vector<3x256xf32>
    %c0_27 = arith.constant 0 : index
    %c0_28 = arith.constant 0 : index
    %c0_29 = arith.constant 0 : index
    %31 = vector.load %arg2[%c0_27, %c0_28, %c0_29] : memref<2x10x1xf32, #tpu.memory_space<vmem>>, vector<1x10x1xf32>
    %32 = vector.shape_cast %31 : vector<1x10x1xf32> to vector<10x1xf32>
    %cst_30 = arith.constant dense<0.000000e+00> : vector<24x1xf32>
    %33 = tpu.matmul %8, %32, %cst_30 {dimension_numbers = #tpu.dot_dimension_numbers<[1], [0], [0], [1], [0, 0, 1, 1], [], []>} : vector<24x10xf32>, vector<10x1xf32>, vector<24x1xf32> -> vector<24x1xf32>
    %34 = vector.broadcast %33 : vector<24x1xf32> to vector<24x256xf32>
    %35 = arith.addf %7, %34 : vector<24x256xf32>
    %36 = vector.extract_strided_slice %35 {offsets = [0, 0], sizes = [8, 256], strides = [1, 1]} : vector<24x256xf32> to vector<8x256xf32>
    %cst_31 = arith.constant 0.000000e+00 : f32
    %37 = vector.broadcast %cst_31 : f32 to vector<8x256xf32>
    %38 = arith.maximumf %36, %37 : vector<8x256xf32>
    %39 = vector.extract_strided_slice %35 {offsets = [8, 0], sizes = [8, 256], strides = [1, 1]} : vector<24x256xf32> to vector<8x256xf32>
    %40 = math.sin %39 : vector<8x256xf32>
    %41 = vector.extract_strided_slice %35 {offsets = [16, 0], sizes = [8, 256], strides = [1, 1]} : vector<24x256xf32> to vector<8x256xf32>
    %42 = math.tanh %41 : vector<8x256xf32>
    %43 = tpu.concatenate %38, %40, %42 in 0 : vector<8x256xf32>, vector<8x256xf32>, vector<8x256xf32> -> vector<24x256xf32>
    %cst_32 = arith.constant dense<0.000000e+00> : vector<24x256xf32>
    %44 = tpu.matmul %10, %43, %cst_32 {dimension_numbers = #tpu.dot_dimension_numbers<[1], [0], [0], [1], [0, 0, 1, 1], [], []>} : vector<24x24xf32>, vector<24x256xf32>, vector<24x256xf32> -> vector<24x256xf32>
    %45 = arith.addf %44, %18 : vector<24x256xf32>
    %46 = vector.extract_strided_slice %45 {offsets = [0, 0], sizes = [8, 256], strides = [1, 1]} : vector<24x256xf32> to vector<8x256xf32>
    %cst_33 = arith.constant 0.000000e+00 : f32
    %47 = vector.broadcast %cst_33 : f32 to vector<8x256xf32>
    %48 = arith.maximumf %46, %47 : vector<8x256xf32>
    %49 = vector.extract_strided_slice %45 {offsets = [8, 0], sizes = [8, 256], strides = [1, 1]} : vector<24x256xf32> to vector<8x256xf32>
    %50 = math.sin %49 : vector<8x256xf32>
    %51 = vector.extract_strided_slice %45 {offsets = [16, 0], sizes = [8, 256], strides = [1, 1]} : vector<24x256xf32> to vector<8x256xf32>
    %52 = math.tanh %51 : vector<8x256xf32>
    %53 = tpu.concatenate %48, %50, %52 in 0 : vector<8x256xf32>, vector<8x256xf32>, vector<8x256xf32> -> vector<24x256xf32>
    %cst_34 = arith.constant dense<0.000000e+00> : vector<24x256xf32>
    %54 = tpu.matmul %12, %53, %cst_34 {dimension_numbers = #tpu.dot_dimension_numbers<[1], [0], [0], [1], [0, 0, 1, 1], [], []>} : vector<24x24xf32>, vector<24x256xf32>, vector<24x256xf32> -> vector<24x256xf32>
    %55 = arith.addf %54, %22 : vector<24x256xf32>
    %56 = vector.extract_strided_slice %55 {offsets = [0, 0], sizes = [8, 256], strides = [1, 1]} : vector<24x256xf32> to vector<8x256xf32>
    %cst_35 = arith.constant 0.000000e+00 : f32
    %57 = vector.broadcast %cst_35 : f32 to vector<8x256xf32>
    %58 = arith.maximumf %56, %57 : vector<8x256xf32>
    %59 = vector.extract_strided_slice %55 {offsets = [8, 0], sizes = [8, 256], strides = [1, 1]} : vector<24x256xf32> to vector<8x256xf32>
    %60 = math.sin %59 : vector<8x256xf32>
    %61 = vector.extract_strided_slice %55 {offsets = [16, 0], sizes = [8, 256], strides = [1, 1]} : vector<24x256xf32> to vector<8x256xf32>
    %62 = math.tanh %61 : vector<8x256xf32>
    %63 = tpu.concatenate %58, %60, %62 in 0 : vector<8x256xf32>, vector<8x256xf32>, vector<8x256xf32> -> vector<24x256xf32>
    %cst_36 = arith.constant dense<0.000000e+00> : vector<24x256xf32>
    %64 = tpu.matmul %14, %63, %cst_36 {dimension_numbers = #tpu.dot_dimension_numbers<[1], [0], [0], [1], [0, 0, 1, 1], [], []>} : vector<24x24xf32>, vector<24x256xf32>, vector<24x256xf32> -> vector<24x256xf32>
    %65 = arith.addf %64, %26 : vector<24x256xf32>
    %66 = vector.extract_strided_slice %65 {offsets = [0, 0], sizes = [8, 256], strides = [1, 1]} : vector<24x256xf32> to vector<8x256xf32>
    %cst_37 = arith.constant 0.000000e+00 : f32
    %67 = vector.broadcast %cst_37 : f32 to vector<8x256xf32>
    %68 = arith.maximumf %66, %67 : vector<8x256xf32>
    %69 = vector.extract_strided_slice %65 {offsets = [8, 0], sizes = [8, 256], strides = [1, 1]} : vector<24x256xf32> to vector<8x256xf32>
    %70 = math.sin %69 : vector<8x256xf32>
    %71 = vector.extract_strided_slice %65 {offsets = [16, 0], sizes = [8, 256], strides = [1, 1]} : vector<24x256xf32> to vector<8x256xf32>
    %72 = math.tanh %71 : vector<8x256xf32>
    %73 = tpu.concatenate %68, %70, %72 in 0 : vector<8x256xf32>, vector<8x256xf32>, vector<8x256xf32> -> vector<24x256xf32>
    %cst_38 = arith.constant dense<0.000000e+00> : vector<3x256xf32>
    %74 = tpu.matmul %27, %73, %cst_38 {dimension_numbers = #tpu.dot_dimension_numbers<[1], [0], [0], [1], [0, 0, 1, 1], [], []>} : vector<3x24xf32>, vector<24x256xf32>, vector<3x256xf32> -> vector<3x256xf32>
    %75 = arith.addf %74, %30 : vector<3x256xf32>
    %76 = arith.negf %75 : vector<3x256xf32>
    %77 = math.exp %76 : vector<3x256xf32>
    %cst_39 = arith.constant 1.000000e+00 : f32
    %78 = vector.broadcast %cst_39 : f32 to vector<3x256xf32>
    %79 = arith.addf %78, %77 : vector<3x256xf32>
    %80 = arith.divf %78, %79 : vector<3x256xf32>
    %c0_40 = arith.constant 0 : index
    %c0_41 = arith.constant 0 : index
    %c0_42 = arith.constant 0 : index
    %81 = vector.load %arg10[%c0_40, %c0_41, %c0_42] : memref<2x3x256xf32, #tpu.memory_space<vmem>>, vector<1x3x256xf32>
    %82 = vector.shape_cast %81 : vector<1x3x256xf32> to vector<3x256xf32>
    %83 = vector.shape_cast %80 : vector<3x256xf32> to vector<1x3x256xf32>
    tpu.vector_store %arg10[%c0_40, %c0_41, %c0_42], %83 {strides = array<i32>} : memref<2x3x256xf32, #tpu.memory_space<vmem>>, vector<1x3x256xf32>,
    %c1_43 = arith.constant 1 : index
    %c0_44 = arith.constant 0 : index
    %c0_45 = arith.constant 0 : index
    %84 = vector.load %arg2[%c1_43, %c0_44, %c0_45] : memref<2x10x1xf32, #tpu.memory_space<vmem>>, vector<1x10x1xf32>
    %85 = vector.shape_cast %84 : vector<1x10x1xf32> to vector<10x1xf32>
    %cst_46 = arith.constant dense<0.000000e+00> : vector<24x1xf32>
    %86 = tpu.matmul %8, %85, %cst_46 {dimension_numbers = #tpu.dot_dimension_numbers<[1], [0], [0], [1], [0, 0, 1, 1], [], []>} : vector<24x10xf32>, vector<10x1xf32>, vector<24x1xf32> -> vector<24x1xf32>
    %87 = vector.broadcast %86 : vector<24x1xf32> to vector<24x256xf32>
    %88 = arith.addf %7, %87 : vector<24x256xf32>
    %89 = vector.extract_strided_slice %88 {offsets = [0, 0], sizes = [8, 256], strides = [1, 1]} : vector<24x256xf32> to vector<8x256xf32>
    %cst_47 = arith.constant 0.000000e+00 : f32
    %90 = vector.broadcast %cst_47 : f32 to vector<8x256xf32>
    %91 = arith.maximumf %89, %90 : vector<8x256xf32>
    %92 = vector.extract_strided_slice %88 {offsets = [8, 0], sizes = [8, 256], strides = [1, 1]} : vector<24x256xf32> to vector<8x256xf32>
    %93 = math.sin %92 : vector<8x256xf32>
    %94 = vector.extract_strided_slice %88 {offsets = [16, 0], sizes = [8, 256], strides = [1, 1]} : vector<24x256xf32> to vector<8x256xf32>
    %95 = math.tanh %94 : vector<8x256xf32>
    %96 = tpu.concatenate %91, %93, %95 in 0 : vector<8x256xf32>, vector<8x256xf32>, vector<8x256xf32> -> vector<24x256xf32>
    %cst_48 = arith.constant dense<0.000000e+00> : vector<24x256xf32>
    %97 = tpu.matmul %10, %96, %cst_48 {dimension_numbers = #tpu.dot_dimension_numbers<[1], [0], [0], [1], [0, 0, 1, 1], [], []>} : vector<24x24xf32>, vector<24x256xf32>, vector<24x256xf32> -> vector<24x256xf32>
    %98 = arith.addf %97, %18 : vector<24x256xf32>
    %99 = vector.extract_strided_slice %98 {offsets = [0, 0], sizes = [8, 256], strides = [1, 1]} : vector<24x256xf32> to vector<8x256xf32>
    %cst_49 = arith.constant 0.000000e+00 : f32
    %100 = vector.broadcast %cst_49 : f32 to vector<8x256xf32>
    %101 = arith.maximumf %99, %100 : vector<8x256xf32>
    %102 = vector.extract_strided_slice %98 {offsets = [8, 0], sizes = [8, 256], strides = [1, 1]} : vector<24x256xf32> to vector<8x256xf32>
    %103 = math.sin %102 : vector<8x256xf32>
    %104 = vector.extract_strided_slice %98 {offsets = [16, 0], sizes = [8, 256], strides = [1, 1]} : vector<24x256xf32> to vector<8x256xf32>
    %105 = math.tanh %104 : vector<8x256xf32>
    %106 = tpu.concatenate %101, %103, %105 in 0 : vector<8x256xf32>, vector<8x256xf32>, vector<8x256xf32> -> vector<24x256xf32>
    %cst_50 = arith.constant dense<0.000000e+00> : vector<24x256xf32>
    %107 = tpu.matmul %12, %106, %cst_50 {dimension_numbers = #tpu.dot_dimension_numbers<[1], [0], [0], [1], [0, 0, 1, 1], [], []>} : vector<24x24xf32>, vector<24x256xf32>, vector<24x256xf32> -> vector<24x256xf32>
    %108 = arith.addf %107, %22 : vector<24x256xf32>
    %109 = vector.extract_strided_slice %108 {offsets = [0, 0], sizes = [8, 256], strides = [1, 1]} : vector<24x256xf32> to vector<8x256xf32>
    %cst_51 = arith.constant 0.000000e+00 : f32
    %110 = vector.broadcast %cst_51 : f32 to vector<8x256xf32>
    %111 = arith.maximumf %109, %110 : vector<8x256xf32>
    %112 = vector.extract_strided_slice %108 {offsets = [8, 0], sizes = [8, 256], strides = [1, 1]} : vector<24x256xf32> to vector<8x256xf32>
    %113 = math.sin %112 : vector<8x256xf32>
    %114 = vector.extract_strided_slice %108 {offsets = [16, 0], sizes = [8, 256], strides = [1, 1]} : vector<24x256xf32> to vector<8x256xf32>
    %115 = math.tanh %114 : vector<8x256xf32>
    %116 = tpu.concatenate %111, %113, %115 in 0 : vector<8x256xf32>, vector<8x256xf32>, vector<8x256xf32> -> vector<24x256xf32>
    %cst_52 = arith.constant dense<0.000000e+00> : vector<24x256xf32>
    %117 = tpu.matmul %14, %116, %cst_52 {dimension_numbers = #tpu.dot_dimension_numbers<[1], [0], [0], [1], [0, 0, 1, 1], [], []>} : vector<24x24xf32>, vector<24x256xf32>, vector<24x256xf32> -> vector<24x256xf32>
    %118 = arith.addf %117, %26 : vector<24x256xf32>
    %119 = vector.extract_strided_slice %118 {offsets = [0, 0], sizes = [8, 256], strides = [1, 1]} : vector<24x256xf32> to vector<8x256xf32>
    %cst_53 = arith.constant 0.000000e+00 : f32
    %120 = vector.broadcast %cst_53 : f32 to vector<8x256xf32>
    %121 = arith.maximumf %119, %120 : vector<8x256xf32>
    %122 = vector.extract_strided_slice %118 {offsets = [8, 0], sizes = [8, 256], strides = [1, 1]} : vector<24x256xf32> to vector<8x256xf32>
    %123 = math.sin %122 : vector<8x256xf32>
    %124 = vector.extract_strided_slice %118 {offsets = [16, 0], sizes = [8, 256], strides = [1, 1]} : vector<24x256xf32> to vector<8x256xf32>
    %125 = math.tanh %124 : vector<8x256xf32>
    %126 = tpu.concatenate %121, %123, %125 in 0 : vector<8x256xf32>, vector<8x256xf32>, vector<8x256xf32> -> vector<24x256xf32>
    %cst_54 = arith.constant dense<0.000000e+00> : vector<3x256xf32>
    %127 = tpu.matmul %27, %126, %cst_54 {dimension_numbers = #tpu.dot_dimension_numbers<[1], [0], [0], [1], [0, 0, 1, 1], [], []>} : vector<3x24xf32>, vector<24x256xf32>, vector<3x256xf32> -> vector<3x256xf32>
    %128 = arith.addf %127, %30 : vector<3x256xf32>
    %129 = arith.negf %128 : vector<3x256xf32>
    %130 = math.exp %129 : vector<3x256xf32>
    %cst_55 = arith.constant 1.000000e+00 : f32
    %131 = vector.broadcast %cst_55 : f32 to vector<3x256xf32>
    %132 = arith.addf %131, %130 : vector<3x256xf32>
    %133 = arith.divf %131, %132 : vector<3x256xf32>
    %c1_56 = arith.constant 1 : index
    %c0_57 = arith.constant 0 : index
    %c0_58 = arith.constant 0 : index
    %134 = vector.load %arg10[%c1_56, %c0_57, %c0_58] : memref<2x3x256xf32, #tpu.memory_space<vmem>>, vector<1x3x256xf32>
    %135 = vector.shape_cast %134 : vector<1x3x256xf32> to vector<3x256xf32>
    %136 = vector.shape_cast %133 : vector<3x256xf32> to vector<1x3x256xf32>
    tpu.vector_store %arg10[%c1_56, %c0_57, %c0_58], %136 {strides = array<i32>} : memref<2x3x256xf32, #tpu.memory_space<vmem>>, vector<1x3x256xf32>,
    return
  }
  func.func @transform_0(%arg0: i32, %arg1: i32) -> (i32, i32, i32) {
    %c0_i32 = arith.constant 0 : i32
    %c0_i32_0 = arith.constant 0 : i32
    %c0_i32_1 = arith.constant 0 : i32
    return %arg0, %c0_i32, %c0_i32_0 : i32, i32, i32
  }
  func.func @transform_1(%arg0: i32, %arg1: i32) -> (i32, i32) {
    %c0_i32 = arith.constant 0 : i32
    %c0_i32_0 = arith.constant 0 : i32
    return %c0_i32, %arg1 : i32, i32
  }
  func.func @transform_2(%arg0: i32, %arg1: i32) -> (i32, i32) {
    %c0_i32 = arith.constant 0 : i32
    %c0_i32_0 = arith.constant 0 : i32
    %c0_i32_1 = arith.constant 0 : i32
    return %c0_i32, %c0_i32_0 : i32, i32
  }
  func.func @transform_3(%arg0: i32, %arg1: i32) -> (i32, i32) {
    %c0_i32 = arith.constant 0 : i32
    %c0_i32_0 = arith.constant 0 : i32
    %c0_i32_1 = arith.constant 0 : i32
    return %c0_i32, %c0_i32_0 : i32, i32
  }
  func.func @transform_4(%arg0: i32, %arg1: i32) -> (i32, i32, i32) {
    %c0_i32 = arith.constant 0 : i32
    %c0_i32_0 = arith.constant 0 : i32
    %c0_i32_1 = arith.constant 0 : i32
    %c0_i32_2 = arith.constant 0 : i32
    return %c0_i32, %c0_i32_0, %c0_i32_1 : i32, i32, i32
  }
  func.func @transform_5(%arg0: i32, %arg1: i32) -> (i32, i32, i32) {
    %c0_i32 = arith.constant 0 : i32
    %c0_i32_0 = arith.constant 0 : i32
    %c0_i32_1 = arith.constant 0 : i32
    %c0_i32_2 = arith.constant 0 : i32
    return %c0_i32, %c0_i32_0, %c0_i32_1 : i32, i32, i32
  }
  func.func @transform_6(%arg0: i32, %arg1: i32) -> (i32, i32) {
    %c0_i32 = arith.constant 0 : i32
    %c0_i32_0 = arith.constant 0 : i32
    %c0_i32_1 = arith.constant 0 : i32
    return %c0_i32, %c0_i32_0 : i32, i32
  }
  func.func @transform_7(%arg0: i32, %arg1: i32) -> (i32, i32) {
    %c0_i32 = arith.constant 0 : i32
    %c0_i32_0 = arith.constant 0 : i32
    %c0_i32_1 = arith.constant 0 : i32
    return %c0_i32, %c0_i32_0 : i32, i32
  }
  func.func @transform_8(%arg0: i32, %arg1: i32) -> (i32, i32, i32) {
    %c0_i32 = arith.constant 0 : i32
    %c0_i32_0 = arith.constant 0 : i32
    return %arg0, %c0_i32, %arg1 : i32, i32, i32
  }
}

</mosaic_0001>

<bundles_post_ra>
// kernel: tpu_custom_call.1
= control target key start
LH: loop header
LB: loop body
LE: loop exit
PB: predicated region body
PF: predicated region fallthrough
CT: control target
= control target key end

     0   :  { %s3808_s27 = smov 0   ;;  %s3810_s28 = smov 0   ;;  %s4908_s0 = inlined_call_operand.vmem [shape: f32[4,10,1], index: 0, kind: input, shape index: {}]   ;;  %s4909_s1 = inlined_call_operand.vmem [shape: f32[2,256], index: 1, kind: input, shape index: {}]   ;;  %s4910_s2 = inlined_call_operand.vmem [shape: f32[24,10], index: 2, kind: input, shape index: {}]   ;;  %s4911_s3 = inlined_call_operand.vmem [shape: f32[24,2], index: 3, kind: input, shape index: {}]   ;;  %s4912_s4 = inlined_call_operand.vmem [shape: f32[4,24,1], index: 4, kind: input, shape index: {}]   ;;  %s4913_s5 = inlined_call_operand.vmem [shape: f32[3,24,24], index: 5, kind: input, shape index: {}]   ;;  %s4914_s6 = inlined_call_operand.vmem [shape: f32[3,24], index: 6, kind: input, shape index: {}]   ;;  %s4915_s7 = inlined_call_operand.vmem [shape: f32[3,1], index: 7, kind: input, shape index: {}]   ;;  %s4916_s8 = inlined_call_operand.vmem [shape: f32[4,3,256], index: 8, kind: output, shape index: {}]  }
   0x1   :  { %s3812_s29 = smov 0  }
   0x2 LB: > { %s30_s30 = sadd.s32 1, %s3746_s28  ;;  %p3295_p0 = scmp.ge.s32.totalorder %s3750_s29, 1  ;;  %s3750_s29 = sphi %s3812_s29, %s18_s29   ;;  %s3746_s28 = sphi %s3810_s28, %s4922_s28   ;;  %s3742_s27 = sphi %s3808_s27, %s4921_s27  }
   0x3   : > { %p32_p1 = scmp.ge.s32.totalorder %s30_s30, 2  ;;  %p289_p2 = scmp.lt.s32.totalorder %s3750_s29, 3 }
   0x5   : > { %s4924_s30 = smov (%p32_p1, %s30_s30), 0  ;;  %p290_p3 = pnand %p3295_p0, %p289_p2 }
   0x6   : > { %s3296_s9 = sshll.u32 (!%p290_p3), %s3742_s27, 1  ;;  %v3752_v0 = vmov (!%p290_p3), 0.0|0.0   ;;  %v3753_v1 = vmov (!%p290_p3), 0.0   ;;  %vm3754_vm0 = vmmov (!%p290_p3), 0   ;;  %vm400_vm1 = vcmask (!%p290_p3), 1041408   ;;  %v359_v4 = vld [vmem:[%s4911_s3] sm:$0xff] (!%p290_p3) }
   0x7   : > { %293 = sbr.rel (%p290_p3) target bundleno = 3047 (0xbe7), region = 52  ;;  %3462 = vmatprep.subr.bf16.mxu1 (!%p290_p3), %v3752_v0  ;;  %p335_p4 = scmp.lt.s32.totalorder (!%p290_p3), %s3296_s9, 3  ;;  %469 = vmatprep.mubr.f32.mxu0 (!%p290_p3), %v3753_v1  ;;  %v3302_v2 = vld.sshfl [vmem:[%s4909_s1] sm:$0x33 pattern:$0x76325410] (!%p290_p3) }
   0x8   : > { %3440 = vmatprep.mubr.msk.f32.mxu1 (!%p290_p3), %vm3754_vm0, %v3753_v1  ;;  %v389_v3 = vcombine.high (!%p290_p3), %v3302_v2, %v3302_v2  ;;  %vm390_vm2 = vcmask (!%p290_p3), 15360   ;;  %v3755_v5 = vmov (!%p290_p3), 0   ;;  %vm3756_vm3 = vmmov (!%p290_p3), 1   ;;  %v360_v10 = vld [vmem:[%s4911_s3 + $0x8] sm:$0xff] (!%p290_p3)  ;;  %v488_v11 = vld [vmem:[%s4910_s2] sm:$0xff] (!%p290_p3)  ;;  %v361_v12 = vld [vmem:[%s4911_s3 + $0x10] sm:$0xff] (!%p290_p3) }
   0x9   : > { %3601 = vset.pattern.permute.xlu0 (!%p290_p3), %v3755_v5  ;;  %3602 = vset.pattern.permute.xlu1 (!%p290_p3), %v3755_v5  ;;  %vm3846_vm4 = vmpackc.low (!%p290_p3), %vm400_vm1, %vm3756_vm3  ;;  %vm568_vm5 = vcmask (!%p290_p3), 80896   ;;  %v489_v13 = vld [vmem:[%s4910_s2 + $0x8] sm:$0xff] (!%p290_p3)  ;;  %v490_v14 = vld [vmem:[%s4910_s2 + $0x10] sm:$0xff] (!%p290_p3) }
   0xa   : > { %3303 = vmatprep.subr.msk.mxu0 (!%p290_p3), %vm400_vm1, %v389_v3  ;;  %v364_v15 = vld [vmem:[%s4912_s4 + $0x8] sm:$0xff] (!%p290_p3)  ;;  %v365_v16 = vld [vmem:[%s4912_s4 + $0x10] sm:$0xff] (!%p290_p3)  ;;  %v363_v25 = vld [vmem:[%s4912_s4] sm:$0xff] (!%p290_p3)  ;;  %v3757_v3 = vmov (!%p290_p3), 683565275  }
   0xb   : > { %3304 = vmatpush1.msk.msra.mxu0 (!%p290_p3), %vm400_vm1, %v3302_v2  ;;  %373 = vperm.xlu0 (!%p290_p3), %3601, %v364_v15   ;;  %v3315_v28 = vld [vmem:[%s4912_s4 + $0x20] sm:$0xff] (!%p290_p3)  ;;  %v3314_v29 = vld [vmem:[%s4912_s4 + $0x18] sm:$0xff] (!%p290_p3)  ;;  %v3316_v30 = vld [vmem:[%s4912_s4 + $0x28] sm:$0xff] (!%p290_p3) }
   0xc   : > { %3305 = vmatmul.mubr.msk.f32.vlgmr.msra.gmra.mrb[0].mxu0 (!%p290_p3), %vm390_vm2, %v359_v4  ;;  %378 = vperm.xlu1 (!%p290_p3), %3602, %v365_v16   ;;  %v3319_v31 = vld [vmem:[%s4912_s4 + $0x40] sm:$0xff] (!%p290_p3)  ;;  %v3318_v32 = vld [vmem:[%s4912_s4 + $0x38] sm:$0xff] (!%p290_p3)  ;;  %v3321_v33 = vld [vmem:[%s4912_s4 + $0x50] sm:$0xff] (!%p290_p3) }
   0xd   : > { %475 = vmatprep.mubr.f32.mxu0 (!%p290_p3), %v3753_v1  ;;  %v3317_v34 = vld [vmem:[%s4912_s4 + $0x30] sm:$0xff] (!%p290_p3)  ;;  %v3320_v35 = vld [vmem:[%s4912_s4 + $0x48] sm:$0xff] (!%p290_p3)  ;;  %v3322_v36 = vld [vmem:[%s4912_s4 + $0x58] sm:$0xff] (!%p290_p3) }
   0xe   : > { %s4926_s9 = smov (!%p335_p4, %s3296_s9), 3 }
   0xf   : > { %s3424_s14 = sshll.u32 %s4926_s9, 4  ;;  %s3425_s10 = sshll.u32 %s4926_s9, 3 }
  0x10   : > { %s3842_s17 = scalar_lea.vmem %s4908_s0, %s3424_s14  ;;  %3306 = vmatmul.mubr.msk.f32.gmra.mrb[2].mxu0 %vm390_vm2, %v360_v10  ;;  %v3759_v10 = vmov 2131351028   ;;  %s4527_s13 = scalar_lea.vmem %s4916_s8, %s3425_s10 }
  0x11   : > { %v566_v6 = vld [vmem:[%s3842_s17] sm:$0xff]  ;;  %v567_v7 = vld [vmem:[%s3842_s17 + $0x8] sm:$0x3]  ;;  %481 = vmatprep.mubr.f32.mxu0 %v3753_v1 }
  0x12   : > { %v3463_v9 = vpack.c.bf16 %v567_v7, %v566_v6  ;;  %v3758_v7 = vmov 2475754826  }
  0x14   : > { %3465 = vmatpush3.bf16.msk.msra.mxu1 %vm3846_vm4, %v3463_v9  ;;  %3307 = vmatmul.mubr.msk.f32.gmra.mrb[4].mxu0 %vm390_vm2, %v361_v12  ;;  %v3760_v12 = vmov 2102212464  }
  0x15   : > { %968 = vmatprep.mubr.f32.mxu0 %v3753_v1 }
  0x17   : > { %3441 = vmatmul.mubr.msk.f32.vlgmr.msra.gmra.mrb[0].mxu1 %vm568_vm5, %v488_v11 }
  0x18   : > { %3443 = vmatprep.mubr.msk.f32.mxu1 %vm3754_vm0, %v3753_v1 }
  0x1b   : > { %3444 = vmatmul.mubr.msk.f32.gmra.mrb[2].mxu1 %vm568_vm5, %v489_v13 }
  0x1c   : > { %3446 = vmatprep.mubr.msk.f32.mxu1 %vm3754_vm0, %v3753_v1 }
  0x1f   : > { %3447 = vmatmul.mubr.msk.f32.gmra.mrb[4].mxu1 %vm568_vm5, %v490_v14  ;;  %v3761_v14 = vmov 920167782  }
  0x20   : > { %1272 = vmatprep.mubr.f32.mxu1 %v3753_v1 }
  0x8a   : > { %v374_v39 = vpop.permute.xlu0 %373 }
  0xdf   : > { %v3887_v17 = vpop.f32.mrb[0].mxu0 }
  0xe0   : > { %v3889_v18 = vpop.f32.mrb[1].mxu0 }
  0xe3   : > { %v477_v19 = vpop.f32.mrb[2].mxu0 }
  0xe4   : > { %v479_v20 = vpop.f32.mrb[3].mxu0  ;;  %v3925_v40 = vadd.f32 %v477_v19, %v374_v39 }
  0xe5   : > { %v3927_v41 = vadd.f32 %v479_v20, %v374_v39 }
  0xe7   : > { %v3921_v37 = vpop.f32.mrb[4].mxu0 }
  0xe8   : > { %v3923_v38 = vpop.f32.mrb[5].mxu0 }
  0xea   : > { %v647_v21 = vpop.f32.mrb[0].mxu1 }
  0xeb   : > { %v3442_v22 = vpop.f32.mrb[1].mxu1 }
  0xee   : > { %v652_v23 = vpop.f32.mrb[2].mxu1 }
  0xef   : > { %668 = vperm.xlu0 %3601, %v652_v23   ;;  %v3445_v24 = vpop.f32.mrb[3].mxu1  ;;  %v3762_v23 = vmov 1326507024  }
  0xf2   : > { %v657_v26 = vpop.f32.mrb[4].mxu1 }
  0xf3   : > { %368 = vperm.xlu0 %3601, %v363_v25   ;;  %673 = vperm.xlu1 %3602, %v657_v26   ;;  %v3448_v27 = vpop.f32.mrb[5].mxu1 }
  0xf7   : > { %513 = vperm.xlu0 %3601, %v3315_v28   ;;  %663 = vperm.xlu1 %3602, %v647_v21  }
  0xfb   : > { %508 = vperm.xlu0 %3601, %v3314_v29   ;;  %518 = vperm.xlu1 %3602, %v3316_v30  }
  0xff   : > { %537 = vperm.xlu0 %3601, %v3319_v31   ;;  %532 = vperm.xlu1 %3602, %v3318_v32  }
 0x103   : > { %551 = vperm.xlu0 %3601, %v3321_v33   ;;  %527 = vperm.xlu1 %3602, %v3317_v34  }
 0x107   : > { %546 = vperm.xlu0 %3601, %v3320_v35   ;;  %556 = vperm.xlu1 %3602, %v3322_v36  }
 0x16e   : > { %v669_v42 = vpop.permute.xlu0 %668 }
 0x16f   : > { %v3930_v43 = vadd.f32 %v669_v42, %v3925_v40  ;;  %v3933_v44 = vadd.f32 %v669_v42, %v3927_v41 }
 0x171   : > { %v684_v45 = vand.u32 2147483647, %v3930_v43  ;;  %v687_v46 = vand.u32 2139095040, %v3930_v43  ;;  %v791_v47 = vand.u32 2139095040, %v3933_v44  ;;  %v788_v50 = vand.u32 2147483647, %v3933_v44 }
 0x173   : > { %v688_v48 = vshrl.u32 %v687_v46, 23  ;;  %v691_v49 = vand.u32 8388607, %v684_v45  ;;  %v792_v51 = vshrl.u32 %v791_v47, 23  ;;  %v3943_v56 = vand.u32 8388607, %v788_v50 }
 0x175   : > { %v3327_v52 = vadd.s32 4294967169, %v688_v48  ;;  %v3331_v53 = vadd.s32 4294967169, %v792_v51  ;;  %v692_v55 = vor.u32 8388608, %v691_v49  ;;  %v796_v63 = vor.u32 8388608, %v3943_v56 }
 0x177   : > { %v694_v54 = vadd.s32 1, %v3327_v52  ;;  %v798_v57 = vadd.s32 1, %v3331_v53  ;;  %v3945_v62 = vshll.u32 %v692_v55, 8 }
 0x179   : > { %vm695_vm6 = vcmp.gt.s32.totalorder %v694_v54, 0  ;;  %vm799_vm7 = vcmp.gt.s32.totalorder %v798_v57, 0 }
 0x17a   : > { %v696_v58 = vsel %vm695_vm6, %v694_v54, 0  ;;  %v800_v61 = vsel %vm799_vm7, %v798_v57, 0  ;;  %vm686_vm7 = vcmp.lt.s32.totalorder %v3930_v43, 0 }
 0x17b   : > { %v697_v59 = vshrl.u32 %v696_v58, 5  ;;  %v698_v60 = vand.u32 31, %v696_v58  ;;  %v3949_v5 = vshrl.u32 %v800_v61, 5  ;;  %v802_v6 = vand.u32 31, %v800_v61 }
 0x17d   : > { %v699_v2 = vsub.s32 32, %v698_v60  ;;  %v701_v4 = vshll.u32 %v3757_v3, %v698_v60  ;;  %v704_v9 = vshll.u32 %v3758_v7, %v698_v60  ;;  %v707_v11 = vshll.u32 %v3759_v10, %v698_v60 }
 0x17e   : > { %v710_v13 = vshll.u32 %v3760_v12, %v698_v60  ;;  %v713_v15 = vshll.u32 %v3761_v14, %v698_v60  ;;  %vm716_vm8 = vcmp.lt.s32.totalorder %v697_v59, 1  ;;  %vm717_vm9 = vcmp.lt.s32.totalorder %v697_v59, 2 }
 0x17f   : > { %v702_v16 = vshrl.u32 %v3758_v7, %v699_v2  ;;  %v705_v19 = vshrl.u32 %v3759_v10, %v699_v2  ;;  %v708_v20 = vshrl.u32 %v3760_v12, %v699_v2  ;;  %v700_v21 = vshrl.u32 %v3757_v3, %v699_v2 }
 0x180   : > { %v711_v22 = vshrl.u32 %v3761_v14, %v699_v2  ;;  %v714_v24 = vshrl.u32 %v3762_v23, %v699_v2  ;;  %v803_v28 = vsub.s32 32, %v802_v6  ;;  %vm718_vm10 = vcmp.lt.s32.totalorder %v697_v59, 3 }
 0x181   : > { %v703_v25 = vor.u32 %v702_v16, %v701_v4  ;;  %v706_v26 = vor.u32 %v705_v19, %v704_v9  ;;  %v709_v27 = vor.u32 %v708_v20, %v707_v11  ;;  %vm719_vm11 = vcmp.lt.s32.totalorder %v697_v59, 4 }
 0x182   : > { %v712_v29 = vor.u32 %v711_v22, %v710_v13  ;;  %v715_v30 = vor.u32 %v714_v24, %v713_v15  ;;  %v805_v42 = vshll.u32 %v3757_v3, %v802_v6  ;;  %v806_v48 = vshrl.u32 %v3758_v7, %v803_v28 }
 0x183   : > { %v720_v31 = vsel %vm716_vm8, %v700_v21, %v703_v25  ;;  %v721_v32 = vsel %vm719_vm11, %v709_v27, 2102212464  ;;  %v724_v33 = vsel %vm716_vm8, %v703_v25, %v706_v26  ;;  %v728_v34 = vsel %vm716_vm8, %v706_v26, %v709_v27 }
 0x184   : > { %v722_v35 = vsel %vm718_vm10, %v706_v26, %v721_v32  ;;  %v725_v36 = vsel %vm719_vm11, %v712_v29, 920167782  ;;  %v729_v39 = vsel %vm719_vm11, %v715_v30, 1326507024  ;;  %v808_v49 = vshll.u32 %v3758_v7, %v802_v6 }
 0x185   : > { %v726_v46 = vsel %vm718_vm10, %v709_v27, %v725_v36  ;;  %v730_v47 = vsel %vm718_vm10, %v712_v29, %v729_v39  ;;  %v723_v51 = vsel %vm717_vm9, %v720_v31, %v722_v35  ;;  %v809_v54 = vshrl.u32 %v3759_v10, %v803_v28 }
 0x186   : > { %v727_v52 = vsel %vm717_vm9, %v724_v33, %v726_v46  ;;  %v731_v53 = vsel %vm717_vm9, %v728_v34, %v730_v47  ;;  %v807_v60 = vor.u32 %v806_v48, %v805_v42  ;;  %v811_v2 = vshll.u32 %v3759_v10, %v802_v6 }
 0x187   : > { %v3972_v55 = vmul.u32.u64.low %v3945_v62, %v731_v53  ;;  %v3973_v56 = vmul.u32.u64.high %v3945_v62, %v731_v53, %v3972_v55  ;;  %v3976_v57 = vmul.u32.u64.low %v3945_v62, %v727_v52  ;;  %v3977_v58 = vmul.u32.u64.high %v3945_v62, %v727_v52, %v3976_v57 }
 0x188   : > { %v810_v61 = vor.u32 %v809_v54, %v808_v49  ;;  %v812_v4 = vshrl.u32 %v3760_v12, %v803_v28  ;;  %v814_v9 = vshll.u32 %v3760_v12, %v802_v6  ;;  %v815_v59 = vshrl.u32 %v3761_v14, %v803_v28 }
 0x189   : > { %v818_v11 = vshrl.u32 %v3762_v23, %v803_v28  ;;  %v836_v13 = vshll.u32 %v796_v63, 8  ;;  %v739_v15 = vmul.u32 %v3945_v62, %v723_v51  ;;  %v804_v16 = vshrl.u32 %v3757_v3, %v803_v28 }
 0x18a   : > { %v813_v19 = vor.u32 %v812_v4, %v811_v2  ;;  %v817_v20 = vshll.u32 %v3761_v14, %v802_v6  ;;  %vm741_vm12 = vc.u32 %v3973_v56, %v3976_v57  ;;  %v742_v21 = vadd.s32 1, %v3977_v58 }
 0x18b   : > { %v816_v22 = vor.u32 %v815_v59, %v814_v9  ;;  %vm820_vm13 = vcmp.lt.s32.totalorder %v3949_v5, 1  ;;  %vm822_vm14 = vcmp.lt.s32.totalorder %v3949_v5, 3  ;;  %vm823_vm15 = vcmp.lt.s32.totalorder %v3949_v5, 4 }
 0x18c   : > { %v819_v24 = vor.u32 %v818_v11, %v817_v20  ;;  %v828_v63 = vsel %vm820_vm13, %v807_v60, %v810_v61  ;;  %v743_v62 = vsel %vm741_vm12, %v742_v21, %v3977_v58  ;;  %v825_v25 = vsel %vm823_vm15, %v813_v19, 2102212464 }
 0x18d   : > { %v829_v26 = vsel %vm823_vm15, %v816_v22, 920167782  ;;  %v832_v27 = vsel %vm820_vm13, %v810_v61, %v813_v19  ;;  %v744_v28 = vadd.s32 %v743_v62, %v739_v15  ;;  %vm821_vm1 = vcmp.lt.s32.totalorder %v3949_v5, 2 }
 0x18e   : > { %v830_v6 = vsel %vm822_vm14, %v813_v19, %v829_v26  ;;  %v833_v29 = vsel %vm823_vm15, %v819_v24, 1326507024  ;;  %v824_v30 = vsel %vm820_vm13, %v804_v16, %v807_v60  ;;  %v826_v31 = vsel %vm822_vm14, %v810_v61, %v825_v25 }
 0x18f   : > { %v831_v32 = vsel %vm821_vm1, %v828_v63, %v830_v6  ;;  %v834_v33 = vsel %vm822_vm14, %v816_v22, %v833_v29  ;;  %v745_v34 = vadd.s32 536870912, %v744_v28  ;;  %v827_v48 = vsel %vm821_vm1, %v824_v30, %v826_v31 }
 0x190   : > { %v835_v35 = vsel %vm821_vm1, %v832_v27, %v834_v33  ;;  %v3994_v36 = vmul.u32.u64.low %v836_v13, %v831_v32  ;;  %v3995_v39 = vmul.u32.u64.high %v836_v13, %v831_v32, %v3994_v36  ;;  %v843_v5 = vmul.u32 %v836_v13, %v827_v48 }
 0x191   : > { %v3997_v42 = vmul.u32.u64.low %v836_v13, %v835_v35  ;;  %v3998_v46 = vmul.u32.u64.high %v836_v13, %v835_v35, %v3997_v42  ;;  %v746_v47 = vshrl.u32 %v745_v34, 30  ;;  %v740_v16 = vadd.s32 %v3976_v57, %v3973_v56 }
 0x192   : > { %v846_v51 = vadd.s32 1, %v3995_v39  ;;  %vm4008_vm8 = vcmp.le.f32.partialorder %v684_v45, 0.7853982  ;;  %vm790_vm9 = vcmp.lt.s32.totalorder %v3933_v44, 0  ;;  %vm789_vm10 = vcmp.le.f32.partialorder %v788_v50, 0.7853982 }
 0x193   : > { %v747_v49 = vshll.u32 %v746_v47, 30  ;;  %vm845_vm2 = vc.u32 %v3998_v46, %v3994_v36  ;;  %v844_v30 = vadd.s32 %v3994_v36, %v3998_v46  ;;  %v770_v48 = vsub.s32 4, %v746_v47 }
 0x194   : > { %v847_v53 = vsel %vm845_vm2, %v846_v51, %v3995_v39  ;;  %vm776_vm14 = vweird.f32 %v3930_v43 }
 0x195   : > { %v748_v52 = vsub.s32 %v744_v28, %v747_v49  ;;  %v848_v54 = vadd.s32 %v847_v53, %v843_v5  ;;  %v771_v53 = vsel %vm686_vm7, %v770_v48, %v746_v47 }
 0x196   : > { %v773_v45 = vsel %vm4008_vm8, 0, %v771_v53 }
 0x197   : > { %v750_v55 = vsub.s32 0, %v748_v52  ;;  %v849_v58 = vadd.s32 536870912, %v848_v54 }
 0x199   : > { %v3328_v60 = vmin.u32 %v750_v55, %v748_v52  ;;  %v850_v61 = vshrl.u32 %v849_v58, 30  ;;  %v379_v58 = vpop.permute.xlu1 %378 }
 0x19a   : > { %v4025_v50 = vadd.f32 %v3921_v37, %v379_v58 }
 0x19b   : > { %v752_v2 = vclz %v3328_v60  ;;  %v851_v4 = vshll.u32 %v850_v61, 30  ;;  %v874_v55 = vsub.s32 4, %v850_v61 }
 0x19d   : > { %v3329_v9 = vadd.s32 4294967294, %v752_v2  ;;  %v852_v59 = vsub.s32 %v848_v54, %v851_v4  ;;  %v777_v4 = vadd.s32 3, %v773_v45  ;;  %v674_v47 = vpop.permute.xlu1 %673 }
 0x19f   : > { %vm3330_vm3 = vcmp.lt.s32.totalorder %v3329_v9, 0  ;;  %v854_v15 = vsub.s32 0, %v852_v59 }
 0x1a0   : > { %v755_v11 = vsel %vm3330_vm3, 0, %v3329_v9  ;;  %v875_v9 = vsel %vm790_vm9, %v874_v55, %v850_v61  ;;  %vm880_vm3 = vweird.f32 %v3933_v44 }
 0x1a1   : > { %v756_v13 = vsub.s32 32, %v755_v11  ;;  %v760_v19 = vsub.s32 4294967266, %v755_v11  ;;  %v3332_v20 = vmin.u32 %v854_v15, %v852_v59  ;;  %v757_v21 = vshll.u32 %v748_v52, %v755_v11 }
 0x1a2   : > { %v877_v15 = vsel %vm789_vm10, 0, %v875_v9 }
 0x1a3   : > { %v758_v22 = vshrl.u32 %v740_v16, %v756_v13  ;;  %v761_v24 = vadd.s32 127, %v760_v19  ;;  %v856_v63 = vclz %v3332_v20  ;;  %v778_v13 = vand.u32 3, %v777_v4 }
 0x1a4   : > { %v4022_v19 = vadd.f32 %v3923_v38, %v379_v58 }
 0x1a5   : > { %v759_v62 = vor.u32 %v758_v22, %v757_v21  ;;  %v762_v25 = vshll.u32 %v761_v24, 23  ;;  %v3333_v26 = vadd.s32 4294967294, %v856_v63  ;;  %v881_v22 = vadd.s32 3, %v877_v15  ;;  %v369_v24 = vpop.permute.xlu0 %368 }
 0x1a6   : > { %vm780_vm11 = vcmp.eq.s32.totalorder %v778_v13, 0  ;;  %vm783_vm12 = vcmp.eq.s32.totalorder %v778_v13, 2  ;;  %v681_v61 = vadd.f32 %v674_v47, %v4022_v19  ;;  %v4032_v38 = vadd.f32 %v3889_v18, %v369_v24 }
 0x1a7   : > { %v763_v27 = vor.u32 4788187, %v762_v25  ;;  %vm3334_vm6 = vcmp.lt.s32.totalorder %v3333_v26, 0  ;;  %v766_v6 = vcvt.s32.f32 %v759_v62  ;;  %v664_v25 = vpop.permute.xlu1 %663  ;;  %vm779_vm13 = vcmp.lt.s32.totalorder %v778_v13, 2 }
 0x1a8   : > { %v859_v29 = vsel %vm3334_vm6, 0, %v3333_v26  ;;  %v4029_v26 = vadd.f32 %v3887_v17, %v369_v24  ;;  %vm894_vm6 = vcmask 195584  }
 0x1a9   : > { %v764_v28 = vand.u32 2147483647, %v763_v27  ;;  %v860_v31 = vsub.s32 32, %v859_v29  ;;  %v864_v32 = vsub.s32 4294967266, %v859_v29  ;;  %v861_v57 = vshll.u32 %v852_v59, %v859_v29 }
 0x1aa   : > { %v882_v27 = vand.u32 3, %v881_v22  ;;  %v676_v29 = vadd.f32 %v664_v25, %v4029_v26 }
 0x1ab   : > { %v767_v56 = vmul.f32 %v766_v6, %v764_v28  ;;  %v862_v33 = vshrl.u32 %v844_v30, %v860_v31  ;;  %v865_v34 = vadd.s32 127, %v864_v32  ;;  %v680_v28 = vadd.f32 %v674_v47, %v4025_v50 }
 0x1ac   : > { %v677_v31 = vadd.f32 %v664_v25, %v4032_v38  ;;  %vm887_vm15 = vcmp.eq.s32.totalorder %v882_v27, 2  ;;  %vm884_vm1 = vcmp.eq.s32.totalorder %v882_v27, 0  ;;  %vm883_vm2 = vcmp.lt.s32.totalorder %v882_v27, 2 }
 0x1ad   : > { %v768_v35 = vxor.u32 2147483648, %v767_v56  ;;  %v863_v39 = vor.u32 %v862_v33, %v861_v57  ;;  %v866_v42 = vshll.u32 %v865_v34, 23  ;;  %v682_v57 = vmax.f32 %v676_v29, 0.0 }
 0x1ae   : > { %v683_v34 = vmax.f32 %v677_v31, 0.0 }
 0x1af   : > { %v769_v51 = vsel %vm686_vm7, %v768_v35, %v767_v56  ;;  %v867_v46 = vor.u32 4788187, %v866_v42  ;;  %v870_v52 = vcvt.s32.f32 %v863_v39 }
 0x1b0   : > { %v772_v36 = vsel %vm4008_vm8, %v3930_v43, %v769_v51  ;;  %v491_v43 = vld [vmem:[%s4913_s5] sm:$0xff] }
 0x1b1   : > { %3603 = vcosq.f32 %v772_v36  ;;  %v868_v5 = vand.u32 2147483647, %v867_v46 }
 0x1b2   : > { %3605 = vsinq.f32 %v772_v36  ;;  %v493_v36 = vld [vmem:[%s4913_s5 + $0x10] sm:$0xff] }
 0x1b3   : > { %v871_v54 = vmul.f32 %v870_v52, %v868_v5  ;;  %v4058_v52 = vpop.permute.xlu0 %513 }
 0x1b5   : > { %v872_v60 = vxor.u32 2147483648, %v871_v54 }
 0x1b7   : > { %v873_v2 = vsel %vm790_vm9, %v872_v60, %v871_v54 }
 0x1b8   : > { %v876_v59 = vsel %vm789_vm10, %v3933_v44, %v873_v2  ;;  %v492_v44 = vld [vmem:[%s4913_s5 + $0x8] sm:$0xff] }
 0x1b9   : > { %3607 = vcosq.f32 %v876_v59 }
 0x1ba   : > { %3609 = vsinq.f32 %v876_v59 }
 0x1bb   : > { %v3604_v11 = vpop.eup %3603  ;;  %3611 = vtanh.f32 %v681_v61 }
 0x1bc   : > { %v3606_v16 = vpop.eup %3605  ;;  %v784_v21 = vxor.u32 2147483648, %v3604_v11  ;;  %3613 = vtanh.f32 %v680_v28 }
 0x1bd   : > { %v781_v20 = vxor.u32 2147483648, %v3606_v16 }
 0x1be   : > { %v785_v62 = vsel %vm783_vm12, %v784_v21, %v3606_v16 }
 0x1bf   : > { %v782_v63 = vsel %vm780_vm11, %v3604_v11, %v781_v20 }
 0x1c0   : > { %v786_v37 = vsel %vm779_vm13, %v782_v63, %v785_v62 }
 0x1c1   : > { %v787_v56 = vsel %vm776_vm14, nan, %v786_v37 }
 0x1c2   : > { %v3468_v39 = vpack.c.bf16 %v787_v56, %v682_v57 }
 0x1c3   : > { %v3608_v6 = vpop.eup %3607 }
 0x1c4   : > { %v3610_v30 = vpop.eup %3609  ;;  %v888_v32 = vxor.u32 2147483648, %v3608_v6 }
 0x1c5   : > { %v885_v17 = vxor.u32 2147483648, %v3610_v30  ;;  %v3612_v49 = vpop.eup %3611 }
 0x1c6   : > { %v889_v18 = vsel %vm887_vm15, %v888_v32, %v3610_v30  ;;  %v3614_v51 = vpop.eup %3613 }
 0x1c7   : > { %v886_v33 = vsel %vm884_vm1, %v3608_v6, %v885_v17 }
 0x1c8   : > { %v890_v35 = vsel %vm883_vm2, %v886_v33, %v889_v18 }
 0x1c9   : > { %v891_v42 = vsel %vm880_vm3, nan, %v890_v35 }
 0x1ca   : > { %v3466_v48 = vpack.c.bf16 %v891_v42, %v683_v34 }
 0x1cc   : > { %3467 = vmatprep.subr.bf16.mxu0 %v3466_v48 }
 0x1cd   : > { %3469 = vmatpush1.bf16.msra.mxu0 %v3468_v39 }
 0x1ce   : > { %908 = vmatprep.subr.mxu0 %v3612_v49 }
 0x1d1   : > { %909 = vmatpush1.msra.mxu0 %v3614_v51 }
 0x1d2   : > { %3335 = vmatmul.mubr.msk.f32.vlgmr.msra.gmra.mrb[6].mxu0 %vm894_vm6, %v491_v43 }
 0x1d3   : > { %974 = vmatprep.mubr.f32.mxu0 %v3753_v1 }
 0x1d6   : > { %3336 = vmatmul.mubr.msk.f32.gmra.mrb[8].mxu0 %vm894_vm6, %v492_v44 }
 0x1d7   : > { %980 = vmatprep.mubr.f32.mxu0 %v3753_v1 }
 0x1da   : > { %3337 = vmatmul.mubr.msk.f32.gmra.mrb[10].mxu0 %vm894_vm6, %v493_v36 }
 0x1db   : > { %1576 = vmatprep.mubr.f32.mxu0 %v3753_v1 }
 0x2a5   : > { %v4054_v46 = vpop.f32.mrb[6].mxu0 }
 0x2a6   : > { %v4056_v5 = vpop.f32.mrb[7].mxu0 }
 0x2a9   : > { %v976_v53 = vpop.f32.mrb[8].mxu0 }
 0x2aa   : > { %v4061_v54 = vadd.f32 %v976_v53, %v4058_v52  ;;  %v978_v55 = vpop.f32.mrb[9].mxu0 }
 0x2ab   : > { %v4064_v58 = vadd.f32 %v978_v55, %v4058_v52 }
 0x2ac   : > { %v989_v45 = vand.u32 2147483647, %v4061_v54  ;;  %v992_v60 = vand.u32 2139095040, %v4061_v54 }
 0x2ad   : > { %v1096_v2 = vand.u32 2139095040, %v4064_v58  ;;  %v4069_v4 = vpop.f32.mrb[10].mxu0  ;;  %v1093_v47 = vand.u32 2147483647, %v4064_v58 }
 0x2ae   : > { %v993_v9 = vshrl.u32 %v992_v60, 23  ;;  %v4071_v59 = vpop.f32.mrb[11].mxu0  ;;  %v996_v11 = vand.u32 8388607, %v989_v45 }
 0x2af   : > { %v1097_v15 = vshrl.u32 %v1096_v2, 23  ;;  %v1100_v22 = vand.u32 8388607, %v1093_v47 }
 0x2b0   : > { %v3338_v16 = vadd.s32 4294967169, %v993_v9  ;;  %v997_v21 = vor.u32 8388608, %v996_v11 }
 0x2b1   : > { %v3342_v13 = vadd.s32 4294967169, %v1097_v15  ;;  %v1101_v28 = vor.u32 8388608, %v1100_v22 }
 0x2b2   : > { %v999_v20 = vadd.s32 1, %v3338_v16  ;;  %v4078_v27 = vshll.u32 %v997_v21, 8 }
 0x2b3   : > { %v1103_v24 = vadd.s32 1, %v3342_v13 }
 0x2b4   : > { %vm1000_vm7 = vcmp.gt.s32.totalorder %v999_v20, 0 }
 0x2b5   : > { %v1001_v61 = vsel %vm1000_vm7, %v999_v20, 0  ;;  %vm1104_vm8 = vcmp.gt.s32.totalorder %v1103_v24, 0 }
 0x2b6   : > { %v1002_v63 = vshrl.u32 %v1001_v61, 5  ;;  %v1003_v62 = vand.u32 31, %v1001_v61  ;;  %v1105_v25 = vsel %vm1104_vm8, %v1103_v24, 0 }
 0x2b7   : > { %v4081_v29 = vshrl.u32 %v1105_v25, 5  ;;  %v1107_v30 = vand.u32 31, %v1105_v25 }
 0x2b8   : > { %v1004_v6 = vsub.s32 32, %v1003_v62  ;;  %v1006_v37 = vshll.u32 %v3757_v3, %v1003_v62  ;;  %v1009_v31 = vshll.u32 %v3758_v7, %v1003_v62  ;;  %v1012_v32 = vshll.u32 %v3759_v10, %v1003_v62 }
 0x2b9   : > { %v1015_v17 = vshll.u32 %v3760_v12, %v1003_v62  ;;  %v1018_v56 = vshll.u32 %v3761_v14, %v1003_v62  ;;  %vm1021_vm9 = vcmp.lt.s32.totalorder %v1002_v63, 1  ;;  %vm1022_vm10 = vcmp.lt.s32.totalorder %v1002_v63, 2 }
 0x2ba   : > { %v1007_v18 = vshrl.u32 %v3758_v7, %v1004_v6  ;;  %v1010_v57 = vshrl.u32 %v3759_v10, %v1004_v6  ;;  %v1013_v33 = vshrl.u32 %v3760_v12, %v1004_v6  ;;  %v1005_v34 = vshrl.u32 %v3757_v3, %v1004_v6 }
 0x2bb   : > { %v1016_v35 = vshrl.u32 %v3761_v14, %v1004_v6  ;;  %v1019_v39 = vshrl.u32 %v3762_v23, %v1004_v6  ;;  %v1108_v43 = vsub.s32 32, %v1107_v30  ;;  %vm1023_vm11 = vcmp.lt.s32.totalorder %v1002_v63, 3 }
 0x2bc   : > { %v1008_v42 = vor.u32 %v1007_v18, %v1006_v37  ;;  %v1011_v48 = vor.u32 %v1010_v57, %v1009_v31  ;;  %v1014_v49 = vor.u32 %v1013_v33, %v1012_v32  ;;  %vm1024_vm12 = vcmp.lt.s32.totalorder %v1002_v63, 4 }
 0x2bd   : > { %v1017_v51 = vor.u32 %v1016_v35, %v1015_v17  ;;  %v1020_v44 = vor.u32 %v1019_v39, %v1018_v56  ;;  %v1110_v15 = vshll.u32 %v3757_v3, %v1107_v30  ;;  %v1111_v20 = vshrl.u32 %v3758_v7, %v1108_v43 }
 0x2be   : > { %v1025_v36 = vsel %vm1021_vm9, %v1005_v34, %v1008_v42  ;;  %v1026_v53 = vsel %vm1024_vm12, %v1014_v49, 2102212464  ;;  %v1029_v55 = vsel %vm1021_vm9, %v1008_v42, %v1011_v48  ;;  %v1033_v60 = vsel %vm1021_vm9, %v1011_v48, %v1014_v49 }
 0x2bf   : > { %v1027_v2 = vsel %vm1023_vm11, %v1011_v48, %v1026_v53  ;;  %v1030_v9 = vsel %vm1024_vm12, %v1017_v51, 920167782  ;;  %v1034_v11 = vsel %vm1024_vm12, %v1020_v44, 1326507024  ;;  %v1113_v21 = vshll.u32 %v3758_v7, %v1107_v30 }
 0x2c0   : > { %v1031_v16 = vsel %vm1023_vm11, %v1014_v49, %v1030_v9  ;;  %v1035_v13 = vsel %vm1023_vm11, %v1017_v51, %v1034_v11  ;;  %v1028_v22 = vsel %vm1022_vm10, %v1025_v36, %v1027_v2  ;;  %v1114_v62 = vshrl.u32 %v3759_v10, %v1108_v43 }
 0x2c1   : > { %v1032_v24 = vsel %vm1022_vm10, %v1029_v55, %v1031_v16  ;;  %v1036_v61 = vsel %vm1022_vm10, %v1033_v60, %v1035_v13  ;;  %v1112_v32 = vor.u32 %v1111_v20, %v1110_v15  ;;  %v1116_v56 = vshll.u32 %v3759_v10, %v1107_v30 }
 0x2c2   : > { %v4104_v25 = vmul.u32.u64.low %v4078_v27, %v1036_v61  ;;  %v4105_v6 = vmul.u32.u64.high %v4078_v27, %v1036_v61, %v4104_v25  ;;  %v4108_v37 = vmul.u32.u64.low %v4078_v27, %v1032_v24  ;;  %v4109_v31 = vmul.u32.u64.high %v4078_v27, %v1032_v24, %v4108_v37 }
 0x2c3   : > { %v1115_v17 = vor.u32 %v1114_v62, %v1113_v21  ;;  %v1117_v18 = vshrl.u32 %v3760_v12, %v1108_v43  ;;  %v1119_v57 = vshll.u32 %v3760_v12, %v1107_v30  ;;  %v1120_v63 = vshrl.u32 %v3761_v14, %v1108_v43 }
 0x2c4   : > { %v1123_v33 = vshrl.u32 %v3762_v23, %v1108_v43  ;;  %v1141_v34 = vshll.u32 %v1101_v28, 8  ;;  %v1044_v35 = vmul.u32 %v4078_v27, %v1028_v22  ;;  %v1109_v39 = vshrl.u32 %v3757_v3, %v1108_v43 }
 0x2c5   : > { %v1118_v42 = vor.u32 %v1117_v18, %v1116_v56  ;;  %v1122_v48 = vshll.u32 %v3761_v14, %v1107_v30  ;;  %vm1046_vm13 = vc.u32 %v4105_v6, %v4108_v37  ;;  %v1047_v49 = vadd.s32 1, %v4109_v31 }
 0x2c6   : > { %v1121_v51 = vor.u32 %v1120_v63, %v1119_v57  ;;  %vm1125_vm14 = vcmp.lt.s32.totalorder %v4081_v29, 1  ;;  %vm1127_vm15 = vcmp.lt.s32.totalorder %v4081_v29, 3  ;;  %vm1128_vm1 = vcmp.lt.s32.totalorder %v4081_v29, 4 }
 0x2c7   : > { %v1124_v44 = vor.u32 %v1123_v33, %v1122_v48  ;;  %v1133_v28 = vsel %vm1125_vm14, %v1112_v32, %v1115_v17  ;;  %v1048_v27 = vsel %vm1046_vm13, %v1047_v49, %v4109_v31  ;;  %v1130_v36 = vsel %vm1128_vm1, %v1118_v42, 2102212464 }
 0x2c8   : > { %v1134_v43 = vsel %vm1128_vm1, %v1121_v51, 920167782  ;;  %v1137_v53 = vsel %vm1125_vm14, %v1115_v17, %v1118_v42  ;;  %v1049_v55 = vadd.s32 %v1048_v27, %v1044_v35  ;;  %vm1126_vm2 = vcmp.lt.s32.totalorder %v4081_v29, 2 }
 0x2c9   : > { %v1135_v30 = vsel %vm1127_vm15, %v1118_v42, %v1134_v43  ;;  %v1138_v60 = vsel %vm1128_vm1, %v1124_v44, 1326507024  ;;  %v1129_v2 = vsel %vm1125_vm14, %v1109_v39, %v1112_v32  ;;  %v1131_v9 = vsel %vm1127_vm15, %v1115_v17, %v1130_v36 }
 0x2ca   : > { %v1136_v11 = vsel %vm1126_vm2, %v1133_v28, %v1135_v30  ;;  %v1139_v15 = vsel %vm1127_vm15, %v1121_v51, %v1138_v60  ;;  %v1050_v16 = vadd.s32 536870912, %v1049_v55  ;;  %v1132_v62 = vsel %vm1126_vm2, %v1129_v2, %v1131_v9 }
 0x2cb   : > { %v1140_v13 = vsel %vm1126_vm2, %v1137_v53, %v1139_v15  ;;  %v4126_v20 = vmul.u32.u64.low %v1141_v34, %v1136_v11  ;;  %v4127_v21 = vmul.u32.u64.high %v1141_v34, %v1136_v11, %v4126_v20  ;;  %v1148_v29 = vmul.u32 %v1141_v34, %v1132_v62 }
 0x2cc   : > { %v4129_v22 = vmul.u32.u64.low %v1141_v34, %v1140_v13  ;;  %v4130_v24 = vmul.u32.u64.high %v1141_v34, %v1140_v13, %v4129_v22  ;;  %v1051_v61 = vshrl.u32 %v1050_v16, 30  ;;  %v1045_v44 = vadd.s32 %v4108_v37, %v4105_v6 }
 0x2cd   : > { %v1151_v31 = vadd.s32 1, %v4127_v21  ;;  %vm991_vm9 = vcmp.lt.s32.totalorder %v4061_v54, 0  ;;  %vm990_vm10 = vcmp.le.f32.partialorder %v989_v45, 0.7853982  ;;  %vm1095_vm11 = vcmp.lt.s32.totalorder %v4064_v58, 0 }
 0x2ce   : > { %v1052_v25 = vshll.u32 %v1051_v61, 30  ;;  %vm1150_vm3 = vc.u32 %v4130_v24, %v4126_v20  ;;  %v1149_v13 = vadd.s32 %v4126_v20, %v4130_v24  ;;  %v1075_v37 = vsub.s32 4, %v1051_v61 }
 0x2cf   : > { %v1152_v17 = vsel %vm1150_vm3, %v1151_v31, %v4127_v21  ;;  %vm1094_vm12 = vcmp.le.f32.partialorder %v1093_v47, 0.7853982  ;;  %vm1081_vm1 = vweird.f32 %v4061_v54 }
 0x2d0   : > { %v1053_v32 = vsub.s32 %v1049_v55, %v1052_v25  ;;  %v1153_v56 = vadd.s32 %v1152_v17, %v1148_v29 }
 0x2d2   : > { %v1055_v18 = vsub.s32 0, %v1053_v32  ;;  %v1154_v57 = vadd.s32 536870912, %v1153_v56 }
 0x2d4   : > { %v3339_v63 = vmin.u32 %v1055_v18, %v1053_v32  ;;  %v1155_v33 = vshrl.u32 %v1154_v57, 30  ;;  %v1076_v18 = vsel %vm991_vm9, %v1075_v37, %v1051_v61 }
 0x2d5   : > { %v1078_v24 = vsel %vm990_vm10, 0, %v1076_v18 }
 0x2d6   : > { %v1057_v35 = vclz %v3339_v63  ;;  %v1156_v39 = vshll.u32 %v1155_v33, 30 }
 0x2d8   : > { %v3340_v42 = vadd.s32 4294967294, %v1057_v35  ;;  %v1157_v48 = vsub.s32 %v1153_v56, %v1156_v39 }
 0x2da   : > { %vm3341_vm7 = vcmp.lt.s32.totalorder %v3340_v42, 0  ;;  %v1159_v51 = vsub.s32 0, %v1157_v48 }
 0x2db   : > { %v1060_v49 = vsel %vm3341_vm7, 0, %v3340_v42  ;;  %v1179_v42 = vsub.s32 4, %v1155_v33 }
 0x2dc   : > { %v1061_v34 = vsub.s32 32, %v1060_v49  ;;  %v1065_v28 = vsub.s32 4294967266, %v1060_v49  ;;  %v3343_v27 = vmin.u32 %v1159_v51, %v1157_v48  ;;  %v1062_v36 = vshll.u32 %v1053_v32, %v1060_v49 }
 0x2dd   : > { %v1180_v51 = vsel %vm1095_vm11, %v1179_v42, %v1155_v33  ;;  %v4149_v33 = vpop.permute.xlu1 %518 }
 0x2de   : > { %v1063_v43 = vshrl.u32 %v1045_v44, %v1061_v34  ;;  %v1066_v53 = vadd.s32 127, %v1065_v28  ;;  %v1161_v55 = vclz %v3343_v27  ;;  %v4145_v28 = vpop.permute.xlu0 %508  ;;  %v1182_v27 = vsel %vm1094_vm12, 0, %v1180_v51 }
 0x2e0   : > { %v1064_v30 = vor.u32 %v1063_v43, %v1062_v36  ;;  %v1067_v60 = vshll.u32 %v1066_v53, 23  ;;  %v3344_v2 = vadd.s32 4294967294, %v1161_v55  ;;  %v971_v43 = vadd.f32 %v4054_v46, %v4145_v28 }
 0x2e2   : > { %v1068_v9 = vor.u32 4788187, %v1067_v60  ;;  %vm3345_vm8 = vcmp.lt.s32.totalorder %v3344_v2, 0  ;;  %v1071_v15 = vcvt.s32.f32 %v1064_v30  ;;  %v1186_v30 = vadd.s32 3, %v1182_v27 }
 0x2e3   : > { %v1164_v16 = vsel %vm3345_vm8, 0, %v3344_v2  ;;  %v987_v2 = vmax.f32 %v971_v43, 0.0  ;;  %vm1185_vm8 = vweird.f32 %v4064_v58 }
 0x2e4   : > { %v1069_v11 = vand.u32 2147483647, %v1068_v9  ;;  %v1165_v21 = vsub.s32 32, %v1164_v16  ;;  %v1169_v22 = vsub.s32 4294967266, %v1164_v16  ;;  %v1166_v62 = vshll.u32 %v1157_v48, %v1164_v16 }
 0x2e5   : > { %v1082_v48 = vadd.s32 3, %v1078_v24  ;;  %v985_v9 = vadd.f32 %v4071_v59, %v4149_v33  ;;  %v1187_v16 = vand.u32 3, %v1186_v30 }
 0x2e6   : > { %v1072_v6 = vmul.f32 %v1071_v15, %v1069_v11  ;;  %v1167_v25 = vshrl.u32 %v1149_v13, %v1165_v21  ;;  %v1170_v31 = vadd.s32 127, %v1169_v22  ;;  %v983_v13 = vadd.f32 %v4069_v4, %v4149_v33 }
 0x2e7   : > { %v1083_v44 = vand.u32 3, %v1082_v48  ;;  %vm1192_vm2 = vcmp.eq.s32.totalorder %v1187_v16, 2  ;;  %vm1189_vm3 = vcmp.eq.s32.totalorder %v1187_v16, 0  ;;  %vm1188_vm7 = vcmp.lt.s32.totalorder %v1187_v16, 2 }
 0x2e8   : > { %v1073_v29 = vxor.u32 2147483648, %v1072_v6  ;;  %v1168_v32 = vor.u32 %v1167_v25, %v1166_v62  ;;  %v1171_v17 = vshll.u32 %v1170_v31, 23 }
 0x2e9   : > { %vm1088_vm13 = vcmp.eq.s32.totalorder %v1083_v44, 2  ;;  %vm1085_vm14 = vcmp.eq.s32.totalorder %v1083_v44, 0  ;;  %vm1084_vm15 = vcmp.lt.s32.totalorder %v1083_v44, 2 }
 0x2ea   : > { %v1074_v56 = vsel %vm991_vm9, %v1073_v29, %v1072_v6  ;;  %v1172_v20 = vor.u32 4788187, %v1171_v17  ;;  %v1175_v35 = vcvt.s32.f32 %v1168_v32  ;;  %v973_v6 = vadd.f32 %v4056_v5, %v4145_v28  ;;  %v3308_v5 = vld [vmem:[%s4913_s5 + $0x18] sm:$0xff] }
 0x2eb   : > { %v1077_v57 = vsel %vm990_vm10, %v4061_v54, %v1074_v56  ;;  %v3310_v56 = vld [vmem:[%s4913_s5 + $0x28] sm:$0xff] }
 0x2ec   : > { %3615 = vcosq.f32 %v1077_v57  ;;  %v1173_v63 = vand.u32 2147483647, %v1172_v20  ;;  %v988_v25 = vmax.f32 %v973_v6, 0.0  ;;  %v4178_v20 = vpop.permute.xlu1 %532 }
 0x2ed   : > { %3617 = vsinq.f32 %v1077_v57 }
 0x2ee   : > { %v1176_v39 = vmul.f32 %v1175_v35, %v1173_v63 }
 0x2f0   : > { %v1177_v49 = vxor.u32 2147483648, %v1176_v39 }
 0x2f2   : > { %v1178_v45 = vsel %vm1095_vm11, %v1177_v49, %v1176_v39 }
 0x2f3   : > { %v1181_v61 = vsel %vm1094_vm12, %v4064_v58, %v1178_v45  ;;  %v3309_v58 = vld [vmem:[%s4913_s5 + $0x20] sm:$0xff] }
 0x2f4   : > { %3619 = vcosq.f32 %v1181_v61 }
 0x2f5   : > { %3621 = vsinq.f32 %v1181_v61 }
 0x2f6   : > { %v3616_v34 = vpop.eup %3615  ;;  %3623 = vtanh.f32 %v985_v9 }
 0x2f7   : > { %v3618_v36 = vpop.eup %3617  ;;  %v1089_v53 = vxor.u32 2147483648, %v3616_v34  ;;  %3625 = vtanh.f32 %v983_v13 }
 0x2f8   : > { %v1086_v55 = vxor.u32 2147483648, %v3618_v36 }
 0x2f9   : > { %v1090_v47 = vsel %vm1088_vm13, %v1089_v53, %v3618_v36 }
 0x2fa   : > { %v1087_v60 = vsel %vm1085_vm14, %v3616_v34, %v1086_v55 }
 0x2fb   : > { %v1091_v11 = vsel %vm1084_vm15, %v1087_v60, %v1090_v47 }
 0x2fc   : > { %v1092_v15 = vsel %vm1081_vm1, nan, %v1091_v11 }
 0x2fd   : > { %v3472_v46 = vpack.c.bf16 %v1092_v15, %v987_v2 }
 0x2fe   : > { %v3620_v21 = vpop.eup %3619 }
 0x2ff   : > { %v3622_v22 = vpop.eup %3621  ;;  %v1193_v37 = vxor.u32 2147483648, %v3620_v21 }
 0x300   : > { %v1190_v62 = vxor.u32 2147483648, %v3622_v22  ;;  %v3624_v32 = vpop.eup %3623 }
 0x301   : > { %v1194_v59 = vsel %vm1192_vm2, %v1193_v37, %v3622_v22  ;;  %v3626_v17 = vpop.eup %3625 }
 0x302   : > { %v1191_v54 = vsel %vm1189_vm3, %v3620_v21, %v1190_v62 }
 0x303   : > { %v1195_v31 = vsel %vm1188_vm7, %v1191_v54, %v1194_v59 }
 0x304   : > { %v1196_v29 = vsel %vm1185_vm8, nan, %v1195_v31 }
 0x305   : > { %v3470_v4 = vpack.c.bf16 %v1196_v29, %v988_v25 }
 0x307   : > { %3471 = vmatprep.subr.bf16.mxu1 %v3470_v4 }
 0x308   : > { %3473 = vmatpush1.bf16.msra.mxu1 %v3472_v46 }
 0x309   : > { %1212 = vmatprep.subr.mxu1 %v3624_v32 }
 0x30c   : > { %1213 = vmatpush1.msra.mxu1 %v3626_v17 }
 0x30d   : > { %3346 = vmatmul.mubr.msk.f32.vlgmr.msra.gmra.mrb[6].mxu1 %vm894_vm6, %v3308_v5 }
 0x30e   : > { %1278 = vmatprep.mubr.f32.mxu1 %v3753_v1 }
 0x311   : > { %3347 = vmatmul.mubr.msk.f32.gmra.mrb[8].mxu1 %vm894_vm6, %v3309_v58 }
 0x312   : > { %1284 = vmatprep.mubr.f32.mxu1 %v3753_v1 }
 0x315   : > { %3348 = vmatmul.mubr.msk.f32.gmra.mrb[10].mxu1 %vm894_vm6, %v3310_v56 }
 0x316   : > { %1874 = vmatprep.mubr.f32.mxu1 %v3753_v1 }
 0x3e0   : > { %v4174_v18 = vpop.f32.mrb[6].mxu1 }
 0x3e1   : > { %v4176_v57 = vpop.f32.mrb[7].mxu1 }
 0x3e4   : > { %v1280_v24 = vpop.f32.mrb[8].mxu1 }
 0x3e5   : > { %v4181_v63 = vadd.f32 %v1280_v24, %v4178_v20  ;;  %v1282_v35 = vpop.f32.mrb[9].mxu1 }
 0x3e6   : > { %v4184_v39 = vadd.f32 %v1282_v35, %v4178_v20 }
 0x3e7   : > { %v1293_v42 = vand.u32 2147483647, %v4181_v63  ;;  %v1296_v48 = vand.u32 2139095040, %v4181_v63 }
 0x3e8   : > { %v1400_v49 = vand.u32 2139095040, %v4184_v39  ;;  %v4189_v45 = vpop.f32.mrb[10].mxu1  ;;  %v1397_v34 = vand.u32 2147483647, %v4184_v39 }
 0x3e9   : > { %v1297_v51 = vshrl.u32 %v1296_v48, 23  ;;  %v4191_v61 = vpop.f32.mrb[11].mxu1  ;;  %v1300_v44 = vand.u32 8388607, %v1293_v42 }
 0x3ea   : > { %v1401_v27 = vshrl.u32 %v1400_v49, 23  ;;  %v1404_v30 = vand.u32 8388607, %v1397_v34 }
 0x3eb   : > { %v3349_v36 = vadd.s32 4294967169, %v1297_v51  ;;  %v1301_v55 = vor.u32 8388608, %v1300_v44 }
 0x3ec   : > { %v3353_v43 = vadd.s32 4294967169, %v1401_v27  ;;  %v1405_v16 = vor.u32 8388608, %v1404_v30 }
 0x3ed   : > { %v1303_v53 = vadd.s32 1, %v3349_v36  ;;  %v4198_v15 = vshll.u32 %v1301_v55, 8 }
 0x3ee   : > { %v1407_v47 = vadd.s32 1, %v3353_v43 }
 0x3ef   : > { %vm1304_vm9 = vcmp.gt.s32.totalorder %v1303_v53, 0 }
 0x3f0   : > { %v1305_v60 = vsel %vm1304_vm9, %v1303_v53, 0  ;;  %vm1408_vm10 = vcmp.gt.s32.totalorder %v1407_v47, 0 }
 0x3f1   : > { %v1306_v2 = vshrl.u32 %v1305_v60, 5  ;;  %v1307_v9 = vand.u32 31, %v1305_v60  ;;  %v1409_v11 = vsel %vm1408_vm10, %v1407_v47, 0 }
 0x3f2   : > { %v4201_v21 = vshrl.u32 %v1409_v11, 5  ;;  %v1411_v22 = vand.u32 31, %v1409_v11 }
 0x3f3   : > { %v1308_v46 = vsub.s32 32, %v1307_v9  ;;  %v1310_v13 = vshll.u32 %v3757_v3, %v1307_v9  ;;  %v1313_v6 = vshll.u32 %v3758_v7, %v1307_v9  ;;  %v1316_v37 = vshll.u32 %v3759_v10, %v1307_v9 }
 0x3f4   : > { %v1319_v62 = vshll.u32 %v3760_v12, %v1307_v9  ;;  %v1322_v59 = vshll.u32 %v3761_v14, %v1307_v9  ;;  %vm1325_vm11 = vcmp.lt.s32.totalorder %v1306_v2, 1  ;;  %vm1326_vm12 = vcmp.lt.s32.totalorder %v1306_v2, 2 }
 0x3f5   : > { %v1311_v54 = vshrl.u32 %v3758_v7, %v1308_v46  ;;  %v1314_v25 = vshrl.u32 %v3759_v10, %v1308_v46  ;;  %v1317_v31 = vshrl.u32 %v3760_v12, %v1308_v46  ;;  %v1309_v29 = vshrl.u32 %v3757_v3, %v1308_v46 }
 0x3f6   : > { %v1320_v4 = vshrl.u32 %v3761_v14, %v1308_v46  ;;  %v1323_v32 = vshrl.u32 %v3762_v23, %v1308_v46  ;;  %v1412_v56 = vsub.s32 32, %v1411_v22  ;;  %vm1327_vm13 = vcmp.lt.s32.totalorder %v1306_v2, 3 }
 0x3f7   : > { %v1312_v5 = vor.u32 %v1311_v54, %v1310_v13  ;;  %v1315_v17 = vor.u32 %v1314_v25, %v1313_v6  ;;  %v1318_v58 = vor.u32 %v1317_v31, %v1316_v37  ;;  %vm1328_vm14 = vcmp.lt.s32.totalorder %v1306_v2, 4 }
 0x3f8   : > { %v1321_v24 = vor.u32 %v1320_v4, %v1319_v62  ;;  %v1324_v35 = vor.u32 %v1323_v32, %v1322_v59  ;;  %v1414_v53 = vshll.u32 %v3757_v3, %v1411_v22  ;;  %v1415_v47 = vshrl.u32 %v3758_v7, %v1412_v56 }
 0x3f9   : > { %v1329_v48 = vsel %vm1325_vm11, %v1309_v29, %v1312_v5  ;;  %v1330_v49 = vsel %vm1328_vm14, %v1318_v58, 2102212464  ;;  %v1333_v51 = vsel %vm1325_vm11, %v1312_v5, %v1315_v17  ;;  %v1337_v44 = vsel %vm1325_vm11, %v1315_v17, %v1318_v58 }
 0x3fa   : > { %v1331_v27 = vsel %vm1327_vm13, %v1315_v17, %v1330_v49  ;;  %v1334_v36 = vsel %vm1328_vm14, %v1321_v24, 920167782  ;;  %v1338_v43 = vsel %vm1328_vm14, %v1324_v35, 1326507024  ;;  %v1417_v60 = vshll.u32 %v3758_v7, %v1411_v22 }
 0x3fb   : > { %v1335_v55 = vsel %vm1327_vm13, %v1318_v58, %v1334_v36  ;;  %v1339_v30 = vsel %vm1327_vm13, %v1321_v24, %v1338_v43  ;;  %v1332_v9 = vsel %vm1326_vm12, %v1329_v48, %v1331_v27  ;;  %v1418_v13 = vshrl.u32 %v3759_v10, %v1412_v56 }
 0x3fc   : > { %v1336_v11 = vsel %vm1326_vm12, %v1333_v51, %v1335_v55  ;;  %v1340_v46 = vsel %vm1326_vm12, %v1337_v44, %v1339_v30  ;;  %v1416_v54 = vor.u32 %v1415_v47, %v1414_v53  ;;  %v1420_v31 = vshll.u32 %v3759_v10, %v1411_v22 }
 0x3fd   : > { %v4224_v6 = vmul.u32.u64.low %v4198_v15, %v1340_v46  ;;  %v4225_v37 = vmul.u32.u64.high %v4198_v15, %v1340_v46, %v4224_v6  ;;  %v4228_v62 = vmul.u32.u64.low %v4198_v15, %v1336_v11  ;;  %v4229_v59 = vmul.u32.u64.high %v4198_v15, %v1336_v11, %v4228_v62 }
 0x3fe   : > { %v1419_v25 = vor.u32 %v1418_v13, %v1417_v60  ;;  %v1421_v29 = vshrl.u32 %v3760_v12, %v1412_v56  ;;  %v1423_v4 = vshll.u32 %v3760_v12, %v1411_v22  ;;  %v1424_v2 = vshrl.u32 %v3761_v14, %v1412_v56 }
 0x3ff   : > { %v1427_v32 = vshrl.u32 %v3762_v23, %v1412_v56  ;;  %v1445_v5 = vshll.u32 %v1405_v16, 8  ;;  %v1348_v17 = vmul.u32 %v4198_v15, %v1332_v9  ;;  %v1413_v58 = vshrl.u32 %v3757_v3, %v1412_v56 }
 0x400   : > { %v1422_v24 = vor.u32 %v1421_v29, %v1420_v31  ;;  %v1426_v35 = vshll.u32 %v3761_v14, %v1411_v22  ;;  %vm1350_vm15 = vc.u32 %v4225_v37, %v4228_v62  ;;  %v1351_v48 = vadd.s32 1, %v4229_v59 }
 0x401   : > { %v1425_v49 = vor.u32 %v1424_v2, %v1423_v4  ;;  %vm1429_vm1 = vcmp.lt.s32.totalorder %v4201_v21, 1  ;;  %vm1431_vm2 = vcmp.lt.s32.totalorder %v4201_v21, 3  ;;  %vm1432_vm3 = vcmp.lt.s32.totalorder %v4201_v21, 4 }
 0x402   : > { %v1428_v51 = vor.u32 %v1427_v32, %v1426_v35  ;;  %v1437_v16 = vsel %vm1429_vm1, %v1416_v54, %v1419_v25  ;;  %v1352_v15 = vsel %vm1350_vm15, %v1351_v48, %v4229_v59  ;;  %v1434_v44 = vsel %vm1432_vm3, %v1422_v24, 2102212464 }
 0x403   : > { %v1438_v56 = vsel %vm1432_vm3, %v1425_v49, 920167782  ;;  %v1441_v27 = vsel %vm1429_vm1, %v1419_v25, %v1422_v24  ;;  %v1353_v36 = vadd.s32 %v1352_v15, %v1348_v17  ;;  %vm1430_vm7 = vcmp.lt.s32.totalorder %v4201_v21, 2 }
 0x404   : > { %v1439_v22 = vsel %vm1431_vm2, %v1422_v24, %v1438_v56  ;;  %v1442_v43 = vsel %vm1432_vm3, %v1428_v51, 1326507024  ;;  %v1433_v53 = vsel %vm1429_vm1, %v1413_v58, %v1416_v54  ;;  %v1435_v55 = vsel %vm1431_vm2, %v1419_v25, %v1434_v44 }
 0x405   : > { %v1440_v30 = vsel %vm1430_vm7, %v1437_v16, %v1439_v22  ;;  %v1443_v47 = vsel %vm1431_vm2, %v1425_v49, %v1442_v43  ;;  %v1354_v60 = vadd.s32 536870912, %v1353_v36  ;;  %v1436_v31 = vsel %vm1430_vm7, %v1433_v53, %v1435_v55 }
 0x406   : > { %v1444_v9 = vsel %vm1430_vm7, %v1441_v27, %v1443_v47  ;;  %v4246_v11 = vmul.u32.u64.low %v1445_v5, %v1440_v30  ;;  %v4247_v46 = vmul.u32.u64.high %v1445_v5, %v1440_v30, %v4246_v11  ;;  %v1452_v21 = vmul.u32 %v1445_v5, %v1436_v31 }
 0x407   : > { %v4249_v13 = vmul.u32.u64.low %v1445_v5, %v1444_v9  ;;  %v4250_v6 = vmul.u32.u64.high %v1445_v5, %v1444_v9, %v4249_v13  ;;  %v1355_v59 = vshrl.u32 %v1354_v60, 30  ;;  %v1349_v44 = vadd.s32 %v4228_v62, %v4225_v37 }
 0x408   : > { %v1455_v4 = vadd.s32 1, %v4247_v46  ;;  %vm1295_vm11 = vcmp.lt.s32.totalorder %v4181_v63, 0  ;;  %vm1294_vm12 = vcmp.le.f32.partialorder %v1293_v42, 0.7853982  ;;  %vm1399_vm13 = vcmp.lt.s32.totalorder %v4184_v39, 0 }
 0x409   : > { %v1356_v29 = vshll.u32 %v1355_v59, 30  ;;  %vm1454_vm8 = vc.u32 %v4250_v6, %v4246_v11  ;;  %v1453_v31 = vadd.s32 %v4246_v11, %v4250_v6  ;;  %v1379_v62 = vsub.s32 4, %v1355_v59 }
 0x40a   : > { %v1456_v25 = vsel %vm1454_vm8, %v1455_v4, %v4247_v46  ;;  %vm1398_vm14 = vcmp.le.f32.partialorder %v1397_v34, 0.7853982  ;;  %vm1385_vm3 = vweird.f32 %v4181_v63 }
 0x40b   : > { %v1357_v54 = vsub.s32 %v1353_v36, %v1356_v29  ;;  %v1457_v2 = vadd.s32 %v1456_v25, %v1452_v21 }
 0x40d   : > { %v1359_v32 = vsub.s32 0, %v1357_v54  ;;  %v1458_v17 = vadd.s32 536870912, %v1457_v2 }
 0x40f   : > { %v3350_v58 = vmin.u32 %v1359_v32, %v1357_v54  ;;  %v1459_v24 = vshrl.u32 %v1458_v17, 30 }
 0x411   : > { %v1361_v35 = vclz %v3350_v58  ;;  %v1460_v48 = vshll.u32 %v1459_v24, 30 }
 0x413   : > { %v3351_v49 = vadd.s32 4294967294, %v1361_v35  ;;  %v1461_v51 = vsub.s32 %v1457_v2, %v1460_v48  ;;  %v1380_v35 = vsel %vm1295_vm11, %v1379_v62, %v1355_v59 }
 0x414   : > { %v1382_v6 = vsel %vm1294_vm12, 0, %v1380_v35 }
 0x415   : > { %vm3352_vm9 = vcmp.lt.s32.totalorder %v3351_v49, 0  ;;  %v1463_v15 = vsub.s32 0, %v1461_v51 }
 0x416   : > { %v1364_v16 = vsel %vm3352_vm9, 0, %v3351_v49 }
 0x417   : > { %v1365_v5 = vsub.s32 32, %v1364_v16  ;;  %v1369_v56 = vsub.s32 4294967266, %v1364_v16  ;;  %v3354_v27 = vmin.u32 %v1463_v15, %v1461_v51  ;;  %v1366_v36 = vshll.u32 %v1357_v54, %v1364_v16 }
 0x418   : > { %v1483_v15 = vsub.s32 4, %v1459_v24 }
 0x419   : > { %v1367_v22 = vshrl.u32 %v1349_v44, %v1365_v5  ;;  %v1370_v43 = vadd.s32 127, %v1369_v56  ;;  %v1465_v53 = vclz %v3354_v27  ;;  %v1386_v44 = vadd.s32 3, %v1382_v6 }
 0x41a   : > { %v1484_v56 = vsel %vm1399_vm13, %v1483_v15, %v1459_v24  ;;  %v4269_v24 = vpop.permute.xlu0 %537 }
 0x41b   : > { %v1368_v55 = vor.u32 %v1367_v22, %v1366_v36  ;;  %v1371_v30 = vshll.u32 %v1370_v43, 23  ;;  %v3355_v47 = vadd.s32 4294967294, %v1465_v53  ;;  %v1387_v27 = vand.u32 3, %v1386_v44  ;;  %v4265_v22 = vpop.permute.xlu1 %527 }
 0x41c   : > { %v1486_v43 = vsel %vm1398_vm14, 0, %v1484_v56 }
 0x41d   : > { %v1372_v60 = vor.u32 4788187, %v1371_v30  ;;  %vm3356_vm10 = vcmp.lt.s32.totalorder %v3355_v47, 0  ;;  %v1375_v46 = vcvt.s32.f32 %v1368_v55  ;;  %v1275_v55 = vadd.f32 %v4174_v18, %v4265_v22 }
 0x41e   : > { %v1468_v13 = vsel %vm3356_vm10, 0, %v3355_v47  ;;  %vm1392_vm15 = vcmp.eq.s32.totalorder %v1387_v27, 2  ;;  %vm1389_vm1 = vcmp.eq.s32.totalorder %v1387_v27, 0  ;;  %vm1388_vm2 = vcmp.lt.s32.totalorder %v1387_v27, 2 }
 0x41f   : > { %v1373_v9 = vand.u32 2147483647, %v1372_v60  ;;  %v1469_v29 = vsub.s32 32, %v1468_v13  ;;  %v1473_v4 = vsub.s32 4294967266, %v1468_v13  ;;  %v1470_v21 = vshll.u32 %v1461_v51, %v1468_v13 }
 0x420   : > { %v1490_v60 = vadd.s32 3, %v1486_v43  ;;  %v1289_v13 = vadd.f32 %v4191_v61, %v4269_v24  ;;  %vm1489_vm10 = vweird.f32 %v4184_v39 }
 0x421   : > { %v1376_v37 = vmul.f32 %v1375_v46, %v1373_v9  ;;  %v1471_v25 = vshrl.u32 %v1453_v31, %v1469_v29  ;;  %v1474_v54 = vadd.s32 127, %v1473_v4  ;;  %v1291_v46 = vmax.f32 %v1275_v55, 0.0 }
 0x422   : > { %v1491_v4 = vand.u32 3, %v1490_v60 }
 0x423   : > { %v1377_v2 = vxor.u32 2147483648, %v1376_v37  ;;  %v1472_v32 = vor.u32 %v1471_v25, %v1470_v21  ;;  %v1475_v17 = vshll.u32 %v1474_v54, 23  ;;  %v1277_v25 = vadd.f32 %v4176_v57, %v4265_v22  ;;  %v3311_v57 = vld [vmem:[%s4913_s5 + $0x30] sm:$0xff] }
 0x424   : > { %vm1496_vm7 = vcmp.eq.s32.totalorder %v1491_v4, 2  ;;  %vm1493_vm8 = vcmp.eq.s32.totalorder %v1491_v4, 0  ;;  %vm1492_vm9 = vcmp.lt.s32.totalorder %v1491_v4, 2 }
 0x425   : > { %v1378_v58 = vsel %vm1295_vm11, %v1377_v2, %v1376_v37  ;;  %v1476_v11 = vor.u32 4788187, %v1475_v17  ;;  %v1479_v51 = vcvt.s32.f32 %v1472_v32  ;;  %v1287_v37 = vadd.f32 %v4189_v45, %v4269_v24 }
 0x426   : > { %v1381_v48 = vsel %vm1294_vm12, %v4181_v63, %v1378_v58  ;;  %v1292_v32 = vmax.f32 %v1277_v25, 0.0 }
 0x427   : > { %3627 = vcosq.f32 %v1381_v48  ;;  %v1477_v49 = vand.u32 2147483647, %v1476_v11  ;;  %v3313_v11 = vld [vmem:[%s4913_s5 + $0x40] sm:$0xff] }
 0x428   : > { %3629 = vsinq.f32 %v1381_v48 }
 0x429   : > { %v1480_v16 = vmul.f32 %v1479_v51, %v1477_v49  ;;  %v4298_v51 = vpop.permute.xlu0 %551 }
 0x42b   : > { %v1481_v5 = vxor.u32 2147483648, %v1480_v16 }
 0x42d   : > { %v1482_v42 = vsel %vm1399_vm13, %v1481_v5, %v1480_v16 }
 0x42e   : > { %v1485_v59 = vsel %vm1398_vm14, %v4184_v39, %v1482_v42  ;;  %v3312_v39 = vld [vmem:[%s4913_s5 + $0x38] sm:$0xff] }
 0x42f   : > { %3631 = vcosq.f32 %v1485_v59 }
 0x430   : > { %3633 = vsinq.f32 %v1485_v59 }
 0x431   : > { %v3628_v36 = vpop.eup %3627  ;;  %3635 = vtanh.f32 %v1289_v13 }
 0x432   : > { %v3630_v53 = vpop.eup %3629  ;;  %v1393_v30 = vxor.u32 2147483648, %v3628_v36  ;;  %3637 = vtanh.f32 %v1287_v37 }
 0x433   : > { %v1390_v47 = vxor.u32 2147483648, %v3630_v53 }
 0x434   : > { %v1394_v34 = vsel %vm1392_vm15, %v1393_v30, %v3630_v53 }
 0x435   : > { %v1391_v9 = vsel %vm1389_vm1, %v3628_v36, %v1390_v47 }
 0x436   : > { %v1395_v31 = vsel %vm1388_vm2, %v1391_v9, %v1394_v34 }
 0x437   : > { %v1396_v29 = vsel %vm1385_vm3, nan, %v1395_v31 }
 0x438   : > { %v3476_v18 = vpack.c.bf16 %v1396_v29, %v1291_v46 }
 0x439   : > { %v3632_v62 = vpop.eup %3631 }
 0x43a   : > { %v3634_v21 = vpop.eup %3633  ;;  %v1497_v54 = vxor.u32 2147483648, %v3632_v62 }
 0x43b   : > { %v1494_v2 = vxor.u32 2147483648, %v3634_v21  ;;  %v3636_v35 = vpop.eup %3635 }
 0x43c   : > { %v1498_v61 = vsel %vm1496_vm7, %v1497_v54, %v3634_v21  ;;  %v3638_v48 = vpop.eup %3637 }
 0x43d   : > { %v1495_v63 = vsel %vm1493_vm8, %v3632_v62, %v1494_v2 }
 0x43e   : > { %v1499_v17 = vsel %vm1492_vm9, %v1495_v63, %v1498_v61 }
 0x43f   : > { %v1500_v58 = vsel %vm1489_vm10, nan, %v1499_v17 }
 0x440   : > { %v3474_v45 = vpack.c.bf16 %v1500_v58, %v1292_v32 }
 0x442   : > { %3475 = vmatprep.subr.bf16.mxu0 %v3474_v45 }
 0x443   : > { %3477 = vmatpush1.bf16.msra.mxu0 %v3476_v18 }
 0x444   : > { %1516 = vmatprep.subr.mxu0 %v3636_v35 }
 0x447   : > { %1517 = vmatpush1.msra.mxu0 %v3638_v48 }
 0x448   : > { %3357 = vmatmul.mubr.msk.f32.vlgmr.msra.gmra.mrb[12].mxu0 %vm894_vm6, %v3311_v57 }
 0x449   : > { %1582 = vmatprep.mubr.f32.mxu0 %v3753_v1 }
 0x44c   : > { %3358 = vmatmul.mubr.msk.f32.gmra.mrb[14].mxu0 %vm894_vm6, %v3312_v39 }
 0x44d   : > { %1588 = vmatprep.mubr.f32.mxu0 %v3753_v1 }
 0x450   : > { %3359 = vmatmul.mubr.msk.f32.gmra.mrb[16].mxu0 %vm894_vm6, %v3313_v11 }
 0x451   : > { %2281 = vmatprep.mubr.f32.mxu0 %v3753_v1 }
 0x51b   : > { %v4294_v6 = vpop.f32.mrb[12].mxu0 }
 0x51c   : > { %v4296_v49 = vpop.f32.mrb[13].mxu0 }
 0x51f   : > { %v1584_v16 = vpop.f32.mrb[14].mxu0 }
 0x520   : > { %v4301_v15 = vadd.f32 %v1584_v16, %v4298_v51  ;;  %v1586_v44 = vpop.f32.mrb[15].mxu0 }
 0x521   : > { %v4304_v5 = vadd.f32 %v1586_v44, %v4298_v51 }
 0x522   : > { %v1597_v42 = vand.u32 2147483647, %v4301_v15  ;;  %v1600_v56 = vand.u32 2139095040, %v4301_v15 }
 0x523   : > { %v1704_v59 = vand.u32 2139095040, %v4304_v5  ;;  %v4309_v27 = vpop.f32.mrb[16].mxu0  ;;  %v1701_v55 = vand.u32 2147483647, %v4304_v5 }
 0x524   : > { %v1601_v36 = vshrl.u32 %v1600_v56, 23  ;;  %v4311_v43 = vpop.f32.mrb[17].mxu0  ;;  %v1604_v53 = vand.u32 8388607, %v1597_v42 }
 0x525   : > { %v1705_v30 = vshrl.u32 %v1704_v59, 23  ;;  %v1708_v46 = vand.u32 8388607, %v1701_v55 }
 0x526   : > { %v3360_v47 = vadd.s32 4294967169, %v1601_v36  ;;  %v1605_v9 = vor.u32 8388608, %v1604_v53 }
 0x527   : > { %v3364_v60 = vadd.s32 4294967169, %v1705_v30  ;;  %v1709_v62 = vor.u32 8388608, %v1708_v46 }
 0x528   : > { %v1607_v34 = vadd.s32 1, %v3360_v47  ;;  %v4318_v37 = vshll.u32 %v1605_v9, 8 }
 0x529   : > { %v1711_v13 = vadd.s32 1, %v3364_v60 }
 0x52a   : > { %vm1608_vm11 = vcmp.gt.s32.totalorder %v1607_v34, 0 }
 0x52b   : > { %v1609_v31 = vsel %vm1608_vm11, %v1607_v34, 0  ;;  %vm1712_vm12 = vcmp.gt.s32.totalorder %v1711_v13, 0 }
 0x52c   : > { %v1610_v29 = vshrl.u32 %v1609_v31, 5  ;;  %v1611_v4 = vand.u32 31, %v1609_v31  ;;  %v1713_v18 = vsel %vm1712_vm12, %v1711_v13, 0 }
 0x52d   : > { %v4321_v54 = vshrl.u32 %v1713_v18, 5  ;;  %v1715_v2 = vand.u32 31, %v1713_v18 }
 0x52e   : > { %v1612_v21 = vsub.s32 32, %v1611_v4  ;;  %v1614_v25 = vshll.u32 %v3757_v3, %v1611_v4  ;;  %v1617_v61 = vshll.u32 %v3758_v7, %v1611_v4  ;;  %v1620_v63 = vshll.u32 %v3759_v10, %v1611_v4 }
 0x52f   : > { %v1623_v32 = vshll.u32 %v3760_v12, %v1611_v4  ;;  %v1626_v17 = vshll.u32 %v3761_v14, %v1611_v4  ;;  %vm1629_vm13 = vcmp.lt.s32.totalorder %v1610_v29, 1  ;;  %vm1630_vm14 = vcmp.lt.s32.totalorder %v1610_v29, 2 }
 0x530   : > { %v1615_v58 = vshrl.u32 %v3758_v7, %v1612_v21  ;;  %v1618_v45 = vshrl.u32 %v3759_v10, %v1612_v21  ;;  %v1621_v35 = vshrl.u32 %v3760_v12, %v1612_v21  ;;  %v1613_v57 = vshrl.u32 %v3757_v3, %v1612_v21 }
 0x531   : > { %v1624_v48 = vshrl.u32 %v3761_v14, %v1612_v21  ;;  %v1627_v39 = vshrl.u32 %v3762_v23, %v1612_v21  ;;  %v1716_v56 = vsub.s32 32, %v1715_v2  ;;  %vm1631_vm15 = vcmp.lt.s32.totalorder %v1610_v29, 3 }
 0x532   : > { %v1616_v11 = vor.u32 %v1615_v58, %v1614_v25  ;;  %v1619_v16 = vor.u32 %v1618_v45, %v1617_v61  ;;  %v1622_v44 = vor.u32 %v1621_v35, %v1620_v63  ;;  %vm1632_vm1 = vcmp.lt.s32.totalorder %v1610_v29, 4 }
 0x533   : > { %v1625_v59 = vor.u32 %v1624_v48, %v1623_v32  ;;  %v1628_v36 = vor.u32 %v1627_v39, %v1626_v17  ;;  %v1718_v13 = vshll.u32 %v3757_v3, %v1715_v2  ;;  %v1719_v18 = vshrl.u32 %v3758_v7, %v1716_v56 }
 0x534   : > { %v1633_v53 = vsel %vm1629_vm13, %v1613_v57, %v1616_v11  ;;  %v1634_v30 = vsel %vm1632_vm1, %v1622_v44, 2102212464  ;;  %v1637_v47 = vsel %vm1629_vm13, %v1616_v11, %v1619_v16  ;;  %v1641_v60 = vsel %vm1629_vm13, %v1619_v16, %v1622_v44 }
 0x535   : > { %v1635_v34 = vsel %vm1631_vm15, %v1619_v16, %v1634_v30  ;;  %v1638_v9 = vsel %vm1632_vm1, %v1625_v59, 920167782  ;;  %v1642_v46 = vsel %vm1632_vm1, %v1628_v36, 1326507024  ;;  %v1721_v21 = vshll.u32 %v3758_v7, %v1715_v2 }
 0x536   : > { %v1639_v31 = vsel %vm1631_vm15, %v1622_v44, %v1638_v9  ;;  %v1643_v4 = vsel %vm1631_vm15, %v1625_v59, %v1642_v46  ;;  %v1636_v25 = vsel %vm1630_vm14, %v1633_v53, %v1635_v34  ;;  %v1722_v32 = vshrl.u32 %v3759_v10, %v1716_v56 }
 0x537   : > { %v1640_v61 = vsel %vm1630_vm14, %v1637_v47, %v1639_v31  ;;  %v1644_v63 = vsel %vm1630_vm14, %v1641_v60, %v1643_v4  ;;  %v1720_v57 = vor.u32 %v1719_v18, %v1718_v13  ;;  %v1724_v39 = vshll.u32 %v3759_v10, %v1715_v2 }
 0x538   : > { %v4344_v17 = vmul.u32.u64.low %v4318_v37, %v1644_v63  ;;  %v4345_v58 = vmul.u32.u64.high %v4318_v37, %v1644_v63, %v4344_v17  ;;  %v4348_v45 = vmul.u32.u64.low %v4318_v37, %v1640_v61  ;;  %v4349_v35 = vmul.u32.u64.high %v4318_v37, %v1640_v61, %v4348_v45 }
 0x539   : > { %v1723_v48 = vor.u32 %v1722_v32, %v1721_v21  ;;  %v1725_v11 = vshrl.u32 %v3760_v12, %v1716_v56  ;;  %v1727_v16 = vshll.u32 %v3760_v12, %v1715_v2  ;;  %v1728_v29 = vshrl.u32 %v3761_v14, %v1716_v56 }
 0x53a   : > { %v1731_v44 = vshrl.u32 %v3762_v23, %v1716_v56  ;;  %v1749_v59 = vshll.u32 %v1709_v62, 8  ;;  %v1652_v36 = vmul.u32 %v4318_v37, %v1636_v25  ;;  %v1717_v53 = vshrl.u32 %v3757_v3, %v1716_v56 }
 0x53b   : > { %v1726_v30 = vor.u32 %v1725_v11, %v1724_v39  ;;  %v1730_v47 = vshll.u32 %v3761_v14, %v1715_v2  ;;  %vm1654_vm2 = vc.u32 %v4345_v58, %v4348_v45  ;;  %v1655_v60 = vadd.s32 1, %v4349_v35 }
 0x53c   : > { %v1729_v34 = vor.u32 %v1728_v29, %v1727_v16  ;;  %vm1733_vm3 = vcmp.lt.s32.totalorder %v4321_v54, 1  ;;  %vm1735_vm7 = vcmp.lt.s32.totalorder %v4321_v54, 3  ;;  %vm1736_vm8 = vcmp.lt.s32.totalorder %v4321_v54, 4 }
 0x53d   : > { %v1732_v9 = vor.u32 %v1731_v44, %v1730_v47  ;;  %v1741_v62 = vsel %vm1733_vm3, %v1720_v57, %v1723_v48  ;;  %v1656_v37 = vsel %vm1654_vm2, %v1655_v60, %v4349_v35  ;;  %v1738_v46 = vsel %vm1736_vm8, %v1726_v30, 2102212464 }
 0x53e   : > { %v1742_v56 = vsel %vm1736_vm8, %v1729_v34, 920167782  ;;  %v1745_v13 = vsel %vm1733_vm3, %v1723_v48, %v1726_v30  ;;  %v1657_v31 = vadd.s32 %v1656_v37, %v1652_v36  ;;  %vm1734_vm9 = vcmp.lt.s32.totalorder %v4321_v54, 2 }
 0x53f   : > { %v1743_v2 = vsel %vm1735_vm7, %v1726_v30, %v1742_v56  ;;  %v1746_v4 = vsel %vm1736_vm8, %v1732_v9, 1326507024  ;;  %v1737_v18 = vsel %vm1733_vm3, %v1717_v53, %v1720_v57  ;;  %v1739_v21 = vsel %vm1735_vm7, %v1723_v48, %v1738_v46 }
 0x540   : > { %v1744_v25 = vsel %vm1734_vm9, %v1741_v62, %v1743_v2  ;;  %v1747_v61 = vsel %vm1735_vm7, %v1729_v34, %v1746_v4  ;;  %v1658_v63 = vadd.s32 536870912, %v1657_v31  ;;  %v1740_v29 = vsel %vm1734_vm9, %v1737_v18, %v1739_v21 }
 0x541   : > { %v1748_v32 = vsel %vm1734_vm9, %v1745_v13, %v1747_v61  ;;  %v4366_v17 = vmul.u32.u64.low %v1749_v59, %v1744_v25  ;;  %v4367_v39 = vmul.u32.u64.high %v1749_v59, %v1744_v25, %v4366_v17  ;;  %v1756_v54 = vmul.u32 %v1749_v59, %v1740_v29 }
 0x542   : > { %v4369_v11 = vmul.u32.u64.low %v1749_v59, %v1748_v32  ;;  %v4370_v16 = vmul.u32.u64.high %v1749_v59, %v1748_v32, %v4369_v11  ;;  %v1659_v35 = vshrl.u32 %v1658_v63, 30  ;;  %v1653_v2 = vadd.s32 %v4348_v45, %v4345_v58 }
 0x543   : > { %v1759_v36 = vadd.s32 1, %v4367_v39  ;;  %vm1599_vm13 = vcmp.lt.s32.totalorder %v4301_v15, 0  ;;  %vm1598_vm14 = vcmp.le.f32.partialorder %v1597_v42, 0.7853982  ;;  %vm1703_vm15 = vcmp.lt.s32.totalorder %v4304_v5, 0 }
 0x544   : > { %v1660_v44 = vshll.u32 %v1659_v35, 30  ;;  %vm1758_vm10 = vc.u32 %v4370_v16, %v4366_v17  ;;  %v1683_v45 = vsub.s32 4, %v1659_v35  ;;  %vm1702_vm1 = vcmp.le.f32.partialorder %v1701_v55, 0.7853982 }
 0x545   : > { %v1760_v48 = vsel %vm1758_vm10, %v1759_v36, %v4367_v39  ;;  %vm1689_vm8 = vweird.f32 %v4301_v15 }
 0x546   : > { %v1661_v57 = vsub.s32 %v1657_v31, %v1660_v44  ;;  %v1761_v53 = vadd.s32 %v1760_v48, %v1756_v54  ;;  %v1757_v54 = vadd.s32 %v4366_v17, %v4370_v16 }
 0x548   : > { %v1663_v30 = vsub.s32 0, %v1661_v57  ;;  %v1762_v47 = vadd.s32 536870912, %v1761_v53 }
 0x54a   : > { %v3361_v60 = vmin.u32 %v1663_v30, %v1661_v57  ;;  %v1763_v34 = vshrl.u32 %v1762_v47, 30 }
 0x54c   : > { %v1665_v9 = vclz %v3361_v60  ;;  %v1764_v62 = vshll.u32 %v1763_v34, 30 }
 0x54e   : > { %v3362_v37 = vadd.s32 4294967294, %v1665_v9  ;;  %v1765_v46 = vsub.s32 %v1761_v53, %v1764_v62 }
 0x550   : > { %vm3363_vm11 = vcmp.lt.s32.totalorder %v3362_v37, 0  ;;  %v1767_v13 = vsub.s32 0, %v1765_v46 }
 0x551   : > { %v1668_v56 = vsel %vm3363_vm11, 0, %v3362_v37 }
 0x552   : > { %v1669_v59 = vsub.s32 32, %v1668_v56  ;;  %v1673_v4 = vsub.s32 4294967266, %v1668_v56  ;;  %v3365_v18 = vmin.u32 %v1767_v13, %v1765_v46  ;;  %v1670_v31 = vshll.u32 %v1661_v57, %v1668_v56 }
 0x553   : > { %v1684_v56 = vsel %vm1599_vm13, %v1683_v45, %v1659_v35 }
 0x554   : > { %v1671_v21 = vshrl.u32 %v1653_v2, %v1669_v59  ;;  %v1674_v25 = vadd.s32 127, %v1673_v4  ;;  %v1769_v61 = vclz %v3365_v18  ;;  %v1686_v16 = vsel %vm1598_vm14, 0, %v1684_v56 }
 0x555   : > { %v1787_v4 = vsub.s32 4, %v1763_v34  ;;  %v1690_v18 = vadd.s32 3, %v1686_v16  ;;  %v3371_v16 = vld [vmem:[%s3842_s17 + $0x10] sm:$0xff] }
 0x556   : > { %v1672_v63 = vor.u32 %v1671_v21, %v1670_v31  ;;  %v1675_v32 = vshll.u32 %v1674_v25, 23  ;;  %v3366_v39 = vadd.s32 4294967294, %v1769_v61 }
 0x557   : > { %v1788_v21 = vsel %vm1703_vm15, %v1787_v4, %v1763_v34  ;;  %v1691_v25 = vand.u32 3, %v1690_v18  ;;  %v4389_v34 = vpop.permute.xlu1 %556  ;;  %v3716_v18 = vld [vmem:[%s4910_s2 + $0x8] sm:$0xff] }
 0x558   : > { %v1676_v11 = vor.u32 4788187, %v1675_v32  ;;  %vm3367_vm12 = vcmp.lt.s32.totalorder %v3366_v39, 0  ;;  %v1679_v44 = vcvt.s32.f32 %v1672_v63  ;;  %v4385_v63 = vpop.permute.xlu0 %546  ;;  %v1790_v32 = vsel %vm1702_vm1, 0, %v1788_v21 }
 0x559   : > { %v1772_v36 = vsel %vm3367_vm12, 0, %v3366_v39  ;;  %vm1696_vm2 = vcmp.eq.s32.totalorder %v1691_v25, 2  ;;  %vm1693_vm3 = vcmp.eq.s32.totalorder %v1691_v25, 0  ;;  %vm1692_vm7 = vcmp.lt.s32.totalorder %v1691_v25, 2 }
 0x55a   : > { %v1677_v29 = vand.u32 2147483647, %v1676_v11  ;;  %v1773_v48 = vsub.s32 32, %v1772_v36  ;;  %v1777_v53 = vsub.s32 4294967266, %v1772_v36  ;;  %v1774_v30 = vshll.u32 %v1765_v46, %v1772_v36 }
 0x55b   : > { %v1579_v11 = vadd.f32 %v4294_v6, %v4385_v63  ;;  %v1794_v36 = vadd.s32 3, %v1790_v32  ;;  %vm1793_vm12 = vweird.f32 %v4304_v5 }
 0x55c   : > { %v1680_v58 = vmul.f32 %v1679_v44, %v1677_v29  ;;  %v1775_v47 = vshrl.u32 %v1757_v54, %v1773_v48  ;;  %v1778_v57 = vadd.s32 127, %v1777_v53  ;;  %v1593_v53 = vadd.f32 %v4311_v43, %v4389_v34 }
 0x55d   : > { %v1595_v48 = vmax.f32 %v1579_v11, 0.0 }
 0x55e   : > { %v1681_v60 = vxor.u32 2147483648, %v1680_v58  ;;  %v1776_v9 = vor.u32 %v1775_v47, %v1774_v30  ;;  %v1779_v62 = vshll.u32 %v1778_v57, 23  ;;  %v1795_v30 = vand.u32 3, %v1794_v36 }
 0x55f   : > { %v1591_v47 = vadd.f32 %v4309_v27, %v4389_v34 }
 0x560   : > { %v1682_v37 = vsel %vm1599_vm13, %v1681_v60, %v1680_v58  ;;  %v1780_v17 = vor.u32 4788187, %v1779_v62  ;;  %v1783_v46 = vcvt.s32.f32 %v1776_v9  ;;  %v1581_v9 = vadd.f32 %v4296_v49, %v4385_v63  ;;  %v559_v49 = vld [vmem:[%s4914_s6] sm:$0x7] }
 0x561   : > { %v1685_v13 = vsel %vm1598_vm14, %v4301_v15, %v1682_v37  ;;  %vm1800_vm9 = vcmp.eq.s32.totalorder %v1795_v30, 2  ;;  %vm1797_vm10 = vcmp.eq.s32.totalorder %v1795_v30, 0  ;;  %vm1796_vm11 = vcmp.lt.s32.totalorder %v1795_v30, 2 }
 0x562   : > { %3639 = vcosq.f32 %v1685_v13  ;;  %v1781_v2 = vand.u32 2147483647, %v1780_v17  ;;  %v1596_v56 = vmax.f32 %v1581_v9, 0.0 }
 0x563   : > { %3641 = vsinq.f32 %v1685_v13 }
 0x564   : > { %v1784_v59 = vmul.f32 %v1783_v46, %v1781_v2  ;;  %v3372_v2 = vld [vmem:[%s3842_s17 + $0x18] sm:$0x3] }
 0x566   : > { %v1785_v31 = vxor.u32 2147483648, %v1784_v59 }
 0x568   : > { %v1786_v42 = vsel %vm1703_vm15, %v1785_v31, %v1784_v59  ;;  %v3483_v59 = vpack.c.bf16 %v3372_v2, %v3371_v16 }
 0x569   : > { %v1789_v35 = vsel %vm1702_vm1, %v4304_v5, %v1786_v42  ;;  %v3715_v5 = vld [vmem:[%s4910_s2] sm:$0xff] }
 0x56a   : > { %3643 = vcosq.f32 %v1789_v35 }
 0x56b   : > { %3645 = vsinq.f32 %v1789_v35 }
 0x56c   : > { %v3640_v61 = vpop.eup %3639  ;;  %3647 = vtanh.f32 %v1593_v53 }
 0x56d   : > { %v3642_v39 = vpop.eup %3641  ;;  %v1697_v29 = vxor.u32 2147483648, %v3640_v61  ;;  %3649 = vtanh.f32 %v1591_v47 }
 0x56e   : > { %v1694_v44 = vxor.u32 2147483648, %v3642_v39 }
 0x56f   : > { %v1698_v55 = vsel %vm1696_vm2, %v1697_v29, %v3642_v39  ;;  %v560_v39 = vld [vmem:[%s4915_s7] sm:$0x7] }
 0x570   : > { %v1695_v54 = vsel %vm1693_vm3, %v3640_v61, %v1694_v44 }
 0x571   : > { %v1699_v58 = vsel %vm1692_vm7, %v1695_v54, %v1698_v55 }
 0x572   : > { %v1700_v45 = vsel %vm1689_vm8, nan, %v1699_v58 }
 0x573   : > { %v3480_v6 = vpack.c.bf16 %v1700_v45, %v1595_v48 }
 0x574   : > { %v3644_v57 = vpop.eup %3643 }
 0x575   : > { %v3646_v60 = vpop.eup %3645  ;;  %v1801_v62 = vxor.u32 2147483648, %v3644_v57 }
 0x576   : > { %v1798_v37 = vxor.u32 2147483648, %v3646_v60  ;;  %v3648_v46 = vpop.eup %3647 }
 0x577   : > { %v1802_v15 = vsel %vm1800_vm9, %v1801_v62, %v3646_v60  ;;  %v3650_v4 = vpop.eup %3649 }
 0x578   : > { %v1799_v43 = vsel %vm1797_vm10, %v3644_v57, %v1798_v37 }
 0x579   : > { %v1803_v27 = vsel %vm1796_vm11, %v1799_v43, %v1802_v15 }
 0x57a   : > { %v1804_v13 = vsel %vm1793_vm12, nan, %v1803_v27 }
 0x57b   : > { %v3478_v17 = vpack.c.bf16 %v1804_v13, %v1596_v56 }
 0x57d   : > { %3479 = vmatprep.subr.bf16.mxu1 %v3478_v17 }
 0x57e   : > { %3481 = vmatpush1.bf16.msra.mxu1 %v3480_v6 }
 0x57f   : > { %1814 = vmatprep.subr.mxu1 %v3648_v46 }
 0x582   : > { %1815 = vmatpush1.msra.mxu1 %v3650_v4 }
 0x583   : > { %3368 = vmatmul.mubr.msk.f32.vlgmr.msra.gmra.mrb[12].mxu1 %vm894_vm6, %v559_v49  ;;  %3482 = vmatprep.subr.bf16.mxu1 %v3752_v0  ;;  %v3717_v0 = vld [vmem:[%s4910_s2 + $0x10] sm:$0xff] }
 0x584   : > { %3485 = vmatpush3.bf16.msk.msra.mxu1 %vm3846_vm4, %v3483_v59  ;;  %3453 = vmatprep.mubr.msk.f32.mxu1 %vm3754_vm0, %v3753_v1 }
 0x587   : > { %3454 = vmatmul.mubr.msk.f32.vlgmr.msra.gmra.mrb[14].mxu1 %vm568_vm5, %v3715_v5 }
 0x588   : > { %3456 = vmatprep.mubr.msk.f32.mxu1 %vm3754_vm0, %v3753_v1 }
 0x58b   : > { %3457 = vmatmul.mubr.msk.f32.gmra.mrb[16].mxu1 %vm568_vm5, %v3716_v18 }
 0x58c   : > { %3459 = vmatprep.mubr.msk.f32.mxu1 %vm3754_vm0, %v3753_v1 }
 0x58f   : > { %3460 = vmatmul.mubr.msk.f32.gmra.mrb[18].mxu1 %vm568_vm5, %v3717_v0 }
 0x590   : > { %2576 = vmatprep.mubr.f32.mxu1 %v3753_v1 }
 0x656   : > { %v1876_v8 = vpop.f32.mrb[12].mxu1 }
 0x657   : > { %v1878_v31 = vpop.f32.mrb[13].mxu1 }
 0x65a   : > { %v1970_v42 = vpop.f32.mrb[14].mxu1 }
 0x65b   : > { %v3455_v21 = vpop.f32.mrb[15].mxu1 }
 0x65e   : > { %v1975_v35 = vpop.f32.mrb[16].mxu1 }
 0x65f   : > { %1991 = vperm.xlu1 %3602, %v1975_v35   ;;  %v3458_v25 = vpop.f32.mrb[17].mxu1 }
 0x662   : > { %v1980_v61 = vpop.f32.mrb[18].mxu1 }
 0x663   : > { %1986 = vperm.xlu1 %3602, %v1970_v42   ;;  %1996 = vperm.xlu0 %3601, %v1980_v61   ;;  %v3461_v32 = vpop.f32.mrb[19].mxu1 }
 0x667   : > { %563 = vperm.xlu0 %3601, %v560_v39  }
 0x6de   : > { %v1992_v11 = vpop.permute.xlu1 %1991 }
 0x6df   : > { %v4431_v29 = vadd.f32 %v1992_v11, %v3925_v40  ;;  %v4434_v44 = vadd.f32 %v1992_v11, %v3927_v41 }
 0x6e1   : > { %v2007_v36 = vand.u32 2147483647, %v4431_v29  ;;  %v2010_v55 = vand.u32 2139095040, %v4431_v29  ;;  %v2111_v54 = vand.u32 2147483647, %v4434_v44  ;;  %v2114_v48 = vand.u32 2139095040, %v4434_v44 }
 0x6e2   : > { %v4440_v53 = vpop.permute.xlu0 %1996  ;;  %vm2009_vm12 = vcmp.lt.s32.totalorder %v4431_v29, 0 }
 0x6e3   : > { %v2011_v58 = vshrl.u32 %v2010_v55, 23  ;;  %v2014_v45 = vand.u32 8388607, %v2007_v36  ;;  %v2115_v30 = vshrl.u32 %v2114_v48, 23  ;;  %v2118_v40 = vand.u32 8388607, %v2111_v54 }
 0x6e5   : > { %v3377_v41 = vadd.s32 4294967169, %v2011_v58  ;;  %v3381_v6 = vadd.s32 4294967169, %v2115_v30  ;;  %v2015_v9 = vor.u32 8388608, %v2014_v45  ;;  %v2119_v62 = vor.u32 8388608, %v2118_v40 }
 0x6e6   : > { %v4446_v47 = vpop.permute.xlu0 %563 }
 0x6e7   : > { %v2017_v57 = vadd.s32 1, %v3377_v41  ;;  %v1877_v60 = vadd.f32 %v1876_v8, %v4446_v47  ;;  %v2121_v37 = vadd.s32 1, %v3381_v6  ;;  %v1879_v15 = vadd.f32 %v1878_v31, %v4446_v47 }
 0x6e8   : > { %v4450_v2 = vshll.u32 %v2015_v9, 8  ;;  %v4454_v49 = vshll.u32 %v2119_v62, 8 }
 0x6e9   : > { %vm2018_vm0 = vcmp.gt.s32.totalorder %v2017_v57, 0  ;;  %v3369_v43 = vmul.f32 -1.442695, %v1877_v60  ;;  %vm2122_vm4 = vcmp.gt.s32.totalorder %v2121_v37, 0  ;;  %v3370_v27 = vmul.f32 -1.442695, %v1879_v15 }
 0x6ea   : > { %v2019_v56 = vsel %vm2018_vm0, %v2017_v57, 0  ;;  %v2123_v16 = vsel %vm2122_vm4, %v2121_v37, 0  ;;  %vm2008_vm0 = vcmp.le.f32.partialorder %v2007_v36, 0.7853982  ;;  %vm2113_vm4 = vcmp.lt.s32.totalorder %v4434_v44, 0 }
 0x6eb   : > { %v2020_v13 = vshrl.u32 %v2019_v56, 5  ;;  %v2021_v17 = vand.u32 31, %v2019_v56  ;;  %v4452_v46 = vshrl.u32 %v2123_v16, 5  ;;  %3651 = vpow2.f32 %v3369_v43 }
 0x6ec   : > { %v2125_v5 = vand.u32 31, %v2123_v16  ;;  %3653 = vpow2.f32 %v3370_v27 }
 0x6ed   : > { %v2022_v59 = vsub.s32 32, %v2021_v17  ;;  %v2024_v4 = vshll.u32 %v3757_v3, %v2021_v17  ;;  %v2027_v18 = vshll.u32 %v3758_v7, %v2021_v17  ;;  %v2030_v0 = vshll.u32 %v3759_v10, %v2021_v17 }
 0x6ee   : > { %v2033_v8 = vshll.u32 %v3760_v12, %v2021_v17  ;;  %v2036_v31 = vshll.u32 %v3761_v14, %v2021_v17  ;;  %vm2039_vm5 = vcmp.lt.s32.totalorder %v2020_v13, 1  ;;  %vm2040_vm13 = vcmp.lt.s32.totalorder %v2020_v13, 2 }
 0x6ef   : > { %v2025_v42 = vshrl.u32 %v3758_v7, %v2022_v59  ;;  %v2028_v21 = vshrl.u32 %v3759_v10, %v2022_v59  ;;  %v2031_v35 = vshrl.u32 %v3760_v12, %v2022_v59  ;;  %v2023_v25 = vshrl.u32 %v3757_v3, %v2022_v59 }
 0x6f0   : > { %v2034_v61 = vshrl.u32 %v3761_v14, %v2022_v59  ;;  %v2037_v32 = vshrl.u32 %v3762_v23, %v2022_v59  ;;  %v2126_v48 = vsub.s32 32, %v2125_v5  ;;  %vm2041_vm14 = vcmp.lt.s32.totalorder %v2020_v13, 3 }
 0x6f1   : > { %v2026_v39 = vor.u32 %v2025_v42, %v2024_v4  ;;  %v2029_v11 = vor.u32 %v2028_v21, %v2027_v18  ;;  %v2032_v55 = vor.u32 %v2031_v35, %v2030_v0  ;;  %vm2042_vm15 = vcmp.lt.s32.totalorder %v2020_v13, 4 }
 0x6f2   : > { %v2035_v58 = vor.u32 %v2034_v61, %v2033_v8  ;;  %v2038_v45 = vor.u32 %v2037_v32, %v2036_v31  ;;  %v2128_v62 = vshll.u32 %v3757_v3, %v2125_v5  ;;  %v2129_v43 = vshrl.u32 %v3758_v7, %v2126_v48 }
 0x6f3   : > { %v2043_v30 = vsel %vm2039_vm5, %v2023_v25, %v2026_v39  ;;  %v2044_v40 = vsel %vm2042_vm15, %v2032_v55, 2102212464  ;;  %v2047_v41 = vsel %vm2039_vm5, %v2026_v39, %v2029_v11  ;;  %v2051_v6 = vsel %vm2039_vm5, %v2029_v11, %v2032_v55 }
 0x6f4   : > { %v2045_v57 = vsel %vm2041_vm14, %v2029_v11, %v2044_v40  ;;  %v2048_v60 = vsel %vm2042_vm15, %v2035_v58, 920167782  ;;  %v2052_v9 = vsel %vm2042_vm15, %v2038_v45, 1326507024  ;;  %v2131_v56 = vshll.u32 %v3758_v7, %v2125_v5 }
 0x6f5   : > { %v2049_v37 = vsel %vm2041_vm14, %v2032_v55, %v2048_v60  ;;  %v2053_v15 = vsel %vm2041_vm14, %v2035_v58, %v2052_v9  ;;  %v3652_v27 = vpop.eup %3651  ;;  %v2046_v17 = vsel %vm2040_vm13, %v2043_v30, %v2045_v57  ;;  %v2132_v4 = vshrl.u32 %v3759_v10, %v2126_v48 }
 0x6f6   : > { %v2050_v16 = vsel %vm2040_vm13, %v2047_v41, %v2049_v37  ;;  %v2054_v59 = vsel %vm2040_vm13, %v2051_v6, %v2053_v15  ;;  %v3654_v18 = vpop.eup %3653  ;;  %v2130_v21 = vor.u32 %v2129_v43, %v2128_v62  ;;  %v2134_v25 = vshll.u32 %v3759_v10, %v2125_v5 }
 0x6f7   : > { %v4478_v0 = vmul.u32.u64.low %v4450_v2, %v2054_v59  ;;  %v4479_v8 = vmul.u32.u64.high %v4450_v2, %v2054_v59, %v4478_v0  ;;  %v4482_v31 = vmul.u32.u64.low %v4450_v2, %v2050_v16  ;;  %v4483_v42 = vmul.u32.u64.high %v4450_v2, %v2050_v16, %v4482_v31 }
 0x6f8   : > { %v2133_v35 = vor.u32 %v2132_v4, %v2131_v56  ;;  %v2135_v61 = vshrl.u32 %v3760_v12, %v2126_v48  ;;  %v2127_v13 = vshrl.u32 %v3757_v3, %v2126_v48  ;;  %v2137_v32 = vshll.u32 %v3760_v12, %v2125_v5 }
 0x6f9   : > { %v2138_v39 = vshrl.u32 %v3761_v14, %v2126_v48  ;;  %v2141_v11 = vshrl.u32 %v3762_v23, %v2126_v48  ;;  %v2062_v55 = vmul.u32 %v4450_v2, %v2046_v17  ;;  %v2140_v45 = vshll.u32 %v3761_v14, %v2125_v5 }
 0x6fa   : > { %v2136_v58 = vor.u32 %v2135_v61, %v2134_v25  ;;  %vm2143_vm1 = vcmp.lt.s32.totalorder %v4452_v46, 1  ;;  %vm2064_vm2 = vc.u32 %v4479_v8, %v4482_v31  ;;  %v2065_v30 = vadd.s32 1, %v4483_v42 }
 0x6fb   : > { %v2139_v40 = vor.u32 %v2138_v39, %v2137_v32  ;;  %vm2144_vm3 = vcmp.lt.s32.totalorder %v4452_v46, 2  ;;  %v2142_v41 = vor.u32 %v2141_v11, %v2140_v45  ;;  %vm2145_vm7 = vcmp.lt.s32.totalorder %v4452_v46, 3 }
 0x6fc   : > { %vm2146_vm8 = vcmp.lt.s32.totalorder %v4452_v46, 4  ;;  %v2151_v48 = vsel %vm2143_vm1, %v2130_v21, %v2133_v35  ;;  %v2066_v2 = vsel %vm2064_vm2, %v2065_v30, %v4483_v42  ;;  %v2155_v57 = vsel %vm2143_vm1, %v2133_v35, %v2136_v58 }
 0x6fd   : > { %v2148_v6 = vsel %vm2146_vm8, %v2136_v58, 2102212464  ;;  %v2152_v5 = vsel %vm2146_vm8, %v2139_v40, 920167782  ;;  %v2067_v60 = vadd.s32 %v2066_v2, %v2062_v55  ;;  %v2147_v9 = vsel %vm2143_vm1, %v2127_v13, %v2130_v21 }
 0x6fe   : > { %v2153_v62 = vsel %vm2145_vm7, %v2136_v58, %v2152_v5  ;;  %v2156_v37 = vsel %vm2146_vm8, %v2142_v41, 1326507024  ;;  %v2149_v15 = vsel %vm2145_vm7, %v2133_v35, %v2148_v6  ;;  %v1887_v17 = vadd.f32 1.0, %v3652_v27 }
 0x6ff   : > { %v2154_v43 = vsel %vm2144_vm3, %v2151_v48, %v2153_v62  ;;  %v2157_v56 = vsel %vm2145_vm7, %v2139_v40, %v2156_v37  ;;  %v2068_v16 = vadd.s32 536870912, %v2067_v60  ;;  %v1888_v25 = vadd.f32 1.0, %v3654_v18 }
 0x700   : > { %v2158_v59 = vsel %vm2144_vm3, %v2155_v57, %v2157_v56  ;;  %v4507_v4 = vmul.u32.u64.low %v4454_v49, %v2154_v43  ;;  %v4508_v0 = vmul.u32.u64.high %v4454_v49, %v2154_v43, %v4507_v4  ;;  %v2150_v61 = vsel %vm2144_vm3, %v2147_v9, %v2149_v15 }
 0x701   : > { %v4511_v42 = vmul.u32.u64.low %v4454_v49, %v2158_v59  ;;  %v4512_v21 = vmul.u32.u64.high %v4454_v49, %v2158_v59, %v4511_v42  ;;  %v4514_v35 = vshrl.u32 %v2068_v16, 30  ;;  %3655 = vrcp.f32 %v1887_v17 }
 0x702   : > { %3657 = vrcp.f32 %v1888_v25  ;;  %v2169_v13 = vadd.s32 1, %v4508_v0  ;;  %v2166_v32 = vmul.u32 %v4454_v49, %v2150_v61  ;;  %vm2112_vm5 = vcmp.le.f32.partialorder %v2111_v54, 0.7853982  ;;  %v1987_v54 = vpop.permute.xlu1 %1986 }
 0x703   : > { %v2070_v27 = vshll.u32 %v4514_v35, 30  ;;  %vm2168_vm9 = vc.u32 %v4512_v21, %v4507_v4  ;;  %vm2099_vm1 = vweird.f32 %v4431_v29  ;;  %vm2203_vm8 = vweird.f32 %v4434_v44 }
 0x704   : > { %v2170_v11 = vsel %vm2168_vm9, %v2169_v13, %v4508_v0  ;;  %v2167_v13 = vadd.s32 %v4507_v4, %v4512_v21 }
 0x705   : > { %v2071_v39 = vsub.s32 %v2067_v60, %v2070_v27  ;;  %v2171_v55 = vadd.s32 %v2170_v11, %v2166_v32  ;;  %v2063_v60 = vadd.s32 %v4482_v31, %v4479_v8 }
 0x707   : > { %v2073_v18 = vsub.s32 0, %v2071_v39  ;;  %v2172_v58 = vadd.s32 536870912, %v2171_v55 }
 0x709   : > { %v3378_v45 = vmin.u32 %v2073_v18, %v2071_v39  ;;  %v2173_v46 = vshrl.u32 %v2172_v58, 30 }
 0x70b   : > { %v3656_v30 = vpop.eup %3655  ;;  %v2075_v40 = vclz %v3378_v45  ;;  %v2174_v49 = vshll.u32 %v2173_v46, 30 }
 0x70c   : > { %v3658_v41 = vpop.eup %3657 }
 0x70d   : > { %v3379_v48 = vadd.s32 4294967294, %v2075_v40  ;;  %v1895_v2 = vcombine.low %v3656_v30, %v3658_v41  ;;  %v2175_v6 = vsub.s32 %v2171_v55, %v2174_v49  ;;  %v2093_v30 = vsub.s32 4, %v4514_v35 }
 0x70f   : > { %vm3380_vm10 = vcmp.lt.s32.totalorder %v3379_v48, 0  ;;  %1897 = vst [vmem:[%s4527_s13] sm:$0x77] %v1895_v2  ;;  %v2177_v57 = vsub.s32 0, %v2175_v6 }
 0x710   : > { %v2078_v5 = vsel %vm3380_vm10, 0, %v3379_v48  ;;  %v2094_v48 = vsel %vm2009_vm12, %v2093_v30, %v4514_v35  ;;  %v3718_v30 = vld [vmem:[%s4913_s5] sm:$0xff] }
 0x711   : > { %v2079_v9 = vsub.s32 32, %v2078_v5  ;;  %v2083_v62 = vsub.s32 4294967266, %v2078_v5  ;;  %v3382_v37 = vmin.u32 %v2177_v57, %v2175_v6  ;;  %v2080_v15 = vshll.u32 %v2071_v39, %v2078_v5 }
 0x712   : > { %v2096_v5 = vsel %vm2008_vm0, 0, %v2094_v48 }
 0x713   : > { %v2081_v43 = vshrl.u32 %v2063_v60, %v2079_v9  ;;  %v2084_v56 = vadd.s32 127, %v2083_v62  ;;  %v2179_v17 = vclz %v3382_v37  ;;  %v2100_v9 = vadd.s32 3, %v2096_v5 }
 0x715   : > { %v2082_v16 = vor.u32 %v2081_v43, %v2080_v15  ;;  %v2085_v59 = vshll.u32 %v2084_v56, 23  ;;  %v3383_v0 = vadd.s32 4294967294, %v2179_v17  ;;  %v2101_v43 = vand.u32 3, %v2100_v9 }
 0x717   : > { %v2086_v42 = vor.u32 4788187, %v2085_v59  ;;  %vm3384_vm11 = vcmp.lt.s32.totalorder %v3383_v0, 0  ;;  %v2089_v61 = vcvt.s32.f32 %v2082_v16  ;;  %vm2103_vm13 = vcmp.eq.s32.totalorder %v2101_v43, 0 }
 0x718   : > { %v2182_v27 = vsel %vm3384_vm11, 0, %v3383_v0  ;;  %vm2106_vm14 = vcmp.eq.s32.totalorder %v2101_v43, 2  ;;  %v2004_v59 = vadd.f32 %v4440_v53, %v4022_v19  ;;  %vm2102_vm15 = vcmp.lt.s32.totalorder %v2101_v43, 2 }
 0x719   : > { %v2087_v25 = vand.u32 2147483647, %v2086_v42  ;;  %v2183_v32 = vsub.s32 32, %v2182_v27  ;;  %v2187_v11 = vsub.s32 4294967266, %v2182_v27  ;;  %v2184_v31 = vshll.u32 %v2175_v6, %v2182_v27 }
 0x71a   : > { %v2197_v6 = vsub.s32 4, %v2173_v46 }
 0x71b   : > { %v2090_v8 = vmul.f32 %v2089_v61, %v2087_v25  ;;  %v2185_v55 = vshrl.u32 %v2167_v13, %v2183_v32  ;;  %v2188_v18 = vadd.s32 127, %v2187_v11  ;;  %v2003_v25 = vadd.f32 %v4440_v53, %v4025_v50 }
 0x71c   : > { %v2198_v36 = vsel %vm2113_vm4, %v2197_v6, %v2173_v46  ;;  %v1999_v13 = vadd.f32 %v1987_v54, %v4029_v26 }
 0x71d   : > { %v2091_v39 = vxor.u32 2147483648, %v2090_v8  ;;  %v2186_v58 = vor.u32 %v2185_v55, %v2184_v31  ;;  %v2189_v45 = vshll.u32 %v2188_v18, 23  ;;  %v2200_v15 = vsel %vm2112_vm5, 0, %v2198_v36 }
 0x71e   : > { %v2204_v16 = vadd.s32 3, %v2200_v15  ;;  %v2005_v50 = vmax.f32 %v1999_v13, 0.0 }
 0x71f   : > { %v2092_v40 = vsel %vm2009_vm12, %v2091_v39, %v2090_v8  ;;  %v2190_v41 = vor.u32 4788187, %v2189_v45  ;;  %v2193_v49 = vcvt.s32.f32 %v2186_v58  ;;  %v2000_v8 = vadd.f32 %v1987_v54, %v4032_v38 }
 0x720   : > { %v2095_v4 = vsel %vm2008_vm0, %v4431_v29, %v2092_v40  ;;  %v2205_v46 = vand.u32 3, %v2204_v16  ;;  %v3720_v40 = vld [vmem:[%s4913_s5 + $0x10] sm:$0xff] }
 0x721   : > { %3659 = vcosq.f32 %v2095_v4  ;;  %v2191_v21 = vand.u32 2147483647, %v2190_v41  ;;  %v2006_v26 = vmax.f32 %v2000_v8, 0.0 }
 0x722   : > { %3661 = vsinq.f32 %v2095_v4  ;;  %vm2210_vm2 = vcmp.eq.s32.totalorder %v2205_v46, 2  ;;  %vm2207_vm3 = vcmp.eq.s32.totalorder %v2205_v46, 0  ;;  %vm2206_vm7 = vcmp.lt.s32.totalorder %v2205_v46, 2 }
 0x723   : > { %v2194_v2 = vmul.f32 %v2193_v49, %v2191_v21 }
 0x725   : > { %v2195_v57 = vxor.u32 2147483648, %v2194_v2 }
 0x727   : > { %v2196_v60 = vsel %vm2113_vm4, %v2195_v57, %v2194_v2 }
 0x728   : > { %v2199_v62 = vsel %vm2112_vm5, %v4434_v44, %v2196_v60  ;;  %v3719_v44 = vld [vmem:[%s4913_s5 + $0x8] sm:$0xff] }
 0x729   : > { %3663 = vcosq.f32 %v2199_v62 }
 0x72a   : > { %3665 = vsinq.f32 %v2199_v62 }
 0x72b   : > { %v3660_v37 = vpop.eup %3659  ;;  %3667 = vtanh.f32 %v2004_v59 }
 0x72c   : > { %v3662_v35 = vpop.eup %3661  ;;  %v2107_v17 = vxor.u32 2147483648, %v3660_v37  ;;  %3669 = vtanh.f32 %v2003_v25 }
 0x72d   : > { %v2104_v56 = vxor.u32 2147483648, %v3662_v35 }
 0x72e   : > { %v2108_v42 = vsel %vm2106_vm14, %v2107_v17, %v3662_v35 }
 0x72f   : > { %v2105_v0 = vsel %vm2103_vm13, %v3660_v37, %v2104_v56 }
 0x730   : > { %v2109_v27 = vsel %vm2102_vm15, %v2105_v0, %v2108_v42 }
 0x731   : > { %v2110_v31 = vsel %vm2099_vm1, nan, %v2109_v27 }
 0x732   : > { %v3488_v58 = vpack.c.bf16 %v2110_v31, %v2005_v50 }
 0x733   : > { %v3664_v61 = vpop.eup %3663 }
 0x734   : > { %v3666_v32 = vpop.eup %3665  ;;  %v2211_v11 = vxor.u32 2147483648, %v3664_v61 }
 0x735   : > { %v2208_v19 = vxor.u32 2147483648, %v3666_v32  ;;  %v3668_v38 = vpop.eup %3667 }
 0x736   : > { %v2212_v55 = vsel %vm2210_vm2, %v2211_v11, %v3666_v32  ;;  %v3670_v29 = vpop.eup %3669 }
 0x737   : > { %v2209_v18 = vsel %vm2207_vm3, %v3664_v61, %v2208_v19 }
 0x738   : > { %v2213_v53 = vsel %vm2206_vm7, %v2209_v18, %v2212_v55 }
 0x739   : > { %v2214_v39 = vsel %vm2203_vm8, nan, %v2213_v53 }
 0x73a   : > { %v3486_v45 = vpack.c.bf16 %v2214_v39, %v2006_v26 }
 0x73c   : > { %3487 = vmatprep.subr.bf16.mxu0 %v3486_v45 }
 0x73d   : > { %3489 = vmatpush1.bf16.msra.mxu0 %v3488_v58 }
 0x73e   : > { %2221 = vmatprep.subr.mxu0 %v3668_v38 }
 0x741   : > { %2222 = vmatpush1.msra.mxu0 %v3670_v29 }
 0x742   : > { %3385 = vmatmul.mubr.msk.f32.vlgmr.msra.gmra.mrb[18].mxu0 %vm894_vm6, %v3718_v30 }
 0x743   : > { %2287 = vmatprep.mubr.f32.mxu0 %v3753_v1 }
 0x746   : > { %3386 = vmatmul.mubr.msk.f32.gmra.mrb[20].mxu0 %vm894_vm6, %v3719_v44 }
 0x747   : > { %2293 = vmatprep.mubr.f32.mxu0 %v3753_v1 }
 0x74a   : > { %3387 = vmatmul.mubr.msk.f32.gmra.mrb[22].mxu0 %vm894_vm6, %v3720_v40 }
 0x74b   : > { %2871 = vmatprep.mubr.f32.mxu0 %v3753_v1 }
 0x815   : > { %v4566_v41 = vpop.f32.mrb[18].mxu0 }
 0x816   : > { %v4568_v4 = vpop.f32.mrb[19].mxu0 }
 0x819   : > { %v2289_v21 = vpop.f32.mrb[20].mxu0 }
 0x81a   : > { %v4571_v49 = vadd.f32 %v2289_v21, %v4058_v52  ;;  %v2291_v48 = vpop.f32.mrb[21].mxu0 }
 0x81b   : > { %v4574_v2 = vadd.f32 %v2291_v48, %v4058_v52 }
 0x81c   : > { %v2302_v6 = vand.u32 2147483647, %v4571_v49  ;;  %v2305_v5 = vand.u32 2139095040, %v4571_v49  ;;  %vm2304_vm8 = vcmp.lt.s32.totalorder %v4571_v49, 0 }
 0x81d   : > { %v2409_v57 = vand.u32 2139095040, %v4574_v2  ;;  %v4579_v60 = vpop.f32.mrb[22].mxu0  ;;  %v2406_v37 = vand.u32 2147483647, %v4574_v2 }
 0x81e   : > { %v2306_v9 = vshrl.u32 %v2305_v5, 23  ;;  %v4581_v36 = vpop.f32.mrb[23].mxu0  ;;  %v2309_v62 = vand.u32 8388607, %v2302_v6 }
 0x81f   : > { %v2410_v15 = vshrl.u32 %v2409_v57, 23  ;;  %v2413_v17 = vand.u32 8388607, %v2406_v37 }
 0x820   : > { %v3388_v35 = vadd.s32 4294967169, %v2306_v9  ;;  %v2310_v56 = vor.u32 8388608, %v2309_v62 }
 0x821   : > { %v3392_v52 = vadd.s32 4294967169, %v2410_v15  ;;  %v2414_v25 = vor.u32 8388608, %v2413_v17 }
 0x822   : > { %v2312_v43 = vadd.s32 1, %v3388_v35  ;;  %v4588_v46 = vshll.u32 %v2310_v56, 8 }
 0x823   : > { %v2416_v16 = vadd.s32 1, %v3392_v52 }
 0x824   : > { %vm2313_vm9 = vcmp.gt.s32.totalorder %v2312_v43, 0 }
 0x825   : > { %v2314_v59 = vsel %vm2313_vm9, %v2312_v43, 0  ;;  %vm2417_vm10 = vcmp.gt.s32.totalorder %v2416_v16, 0  ;;  %vm2303_vm9 = vcmp.le.f32.partialorder %v2302_v6, 0.7853982 }
 0x826   : > { %v2315_v0 = vshrl.u32 %v2314_v59, 5  ;;  %v2316_v42 = vand.u32 31, %v2314_v59  ;;  %v2418_v54 = vsel %vm2417_vm10, %v2416_v16, 0  ;;  %vm2408_vm10 = vcmp.lt.s32.totalorder %v4574_v2, 0 }
 0x827   : > { %v4591_v13 = vshrl.u32 %v2418_v54, 5  ;;  %v2420_v32 = vand.u32 31, %v2418_v54 }
 0x828   : > { %v2317_v61 = vsub.s32 32, %v2316_v42  ;;  %v2319_v27 = vshll.u32 %v3757_v3, %v2316_v42  ;;  %v2322_v11 = vshll.u32 %v3758_v7, %v2316_v42  ;;  %v2325_v8 = vshll.u32 %v3759_v10, %v2316_v42 }
 0x829   : > { %v2328_v19 = vshll.u32 %v3760_v12, %v2316_v42  ;;  %v2331_v31 = vshll.u32 %v3761_v14, %v2316_v42  ;;  %vm2334_vm11 = vcmp.lt.s32.totalorder %v2315_v0, 1  ;;  %vm2335_vm12 = vcmp.lt.s32.totalorder %v2315_v0, 2 }
 0x82a   : > { %v2320_v55 = vshrl.u32 %v3758_v7, %v2317_v61  ;;  %v2323_v18 = vshrl.u32 %v3759_v10, %v2317_v61  ;;  %v2326_v50 = vshrl.u32 %v3760_v12, %v2317_v61  ;;  %v2318_v53 = vshrl.u32 %v3757_v3, %v2317_v61 }
 0x82b   : > { %v2329_v26 = vshrl.u32 %v3761_v14, %v2317_v61  ;;  %v2332_v39 = vshrl.u32 %v3762_v23, %v2317_v61  ;;  %v2421_v29 = vsub.s32 32, %v2420_v32  ;;  %vm2336_vm0 = vcmp.lt.s32.totalorder %v2315_v0, 3 }
 0x82c   : > { %v2321_v58 = vor.u32 %v2320_v55, %v2319_v27  ;;  %v2324_v45 = vor.u32 %v2323_v18, %v2322_v11  ;;  %v2327_v38 = vor.u32 %v2326_v50, %v2325_v8  ;;  %vm2337_vm4 = vcmp.lt.s32.totalorder %v2315_v0, 4 }
 0x82d   : > { %v2330_v30 = vor.u32 %v2329_v26, %v2328_v19  ;;  %v2333_v44 = vor.u32 %v2332_v39, %v2331_v31  ;;  %v2423_v15 = vshll.u32 %v3757_v3, %v2420_v32  ;;  %v2424_v43 = vshrl.u32 %v3758_v7, %v2421_v29 }
 0x82e   : > { %v2338_v40 = vsel %vm2334_vm11, %v2318_v53, %v2321_v58  ;;  %v2339_v21 = vsel %vm2337_vm4, %v2327_v38, 2102212464  ;;  %v2342_v48 = vsel %vm2334_vm11, %v2321_v58, %v2324_v45  ;;  %v2346_v5 = vsel %vm2334_vm11, %v2324_v45, %v2327_v38 }
 0x82f   : > { %v2340_v57 = vsel %vm2336_vm0, %v2324_v45, %v2339_v21  ;;  %v2343_v9 = vsel %vm2337_vm4, %v2330_v30, 920167782  ;;  %v2347_v62 = vsel %vm2337_vm4, %v2333_v44, 1326507024  ;;  %v2426_v56 = vshll.u32 %v3758_v7, %v2420_v32 }
 0x830   : > { %v2344_v35 = vsel %vm2336_vm0, %v2327_v38, %v2343_v9  ;;  %v2348_v52 = vsel %vm2336_vm0, %v2330_v30, %v2347_v62  ;;  %v2341_v17 = vsel %vm2335_vm12, %v2338_v40, %v2340_v57  ;;  %v2427_v42 = vshrl.u32 %v3759_v10, %v2421_v29 }
 0x831   : > { %v2345_v16 = vsel %vm2335_vm12, %v2342_v48, %v2344_v35  ;;  %v2349_v59 = vsel %vm2335_vm12, %v2346_v5, %v2348_v52  ;;  %v2425_v8 = vor.u32 %v2424_v43, %v2423_v15  ;;  %v2429_v31 = vshll.u32 %v3759_v10, %v2420_v32 }
 0x832   : > { %v4614_v54 = vmul.u32.u64.low %v4588_v46, %v2349_v59  ;;  %v4615_v61 = vmul.u32.u64.high %v4588_v46, %v2349_v59, %v4614_v54  ;;  %v4618_v27 = vmul.u32.u64.low %v4588_v46, %v2345_v16  ;;  %v4619_v11 = vmul.u32.u64.high %v4588_v46, %v2345_v16, %v4618_v27 }
 0x833   : > { %v2428_v19 = vor.u32 %v2427_v42, %v2426_v56  ;;  %v2430_v55 = vshrl.u32 %v3760_v12, %v2421_v29  ;;  %v2432_v18 = vshll.u32 %v3760_v12, %v2420_v32  ;;  %v2433_v0 = vshrl.u32 %v3761_v14, %v2421_v29 }
 0x834   : > { %v2436_v50 = vshrl.u32 %v3762_v23, %v2421_v29  ;;  %v2454_v53 = vshll.u32 %v2414_v25, 8  ;;  %v2357_v26 = vmul.u32 %v4588_v46, %v2341_v17  ;;  %v2422_v39 = vshrl.u32 %v3757_v3, %v2421_v29 }
 0x835   : > { %v2431_v58 = vor.u32 %v2430_v55, %v2429_v31  ;;  %v2435_v45 = vshll.u32 %v3761_v14, %v2420_v32  ;;  %vm2359_vm5 = vc.u32 %v4615_v61, %v4618_v27  ;;  %v2360_v38 = vadd.s32 1, %v4619_v11 }
 0x836   : > { %v2434_v30 = vor.u32 %v2433_v0, %v2432_v18  ;;  %vm2438_vm13 = vcmp.lt.s32.totalorder %v4591_v13, 1  ;;  %vm2440_vm14 = vcmp.lt.s32.totalorder %v4591_v13, 3  ;;  %vm2441_vm15 = vcmp.lt.s32.totalorder %v4591_v13, 4 }
 0x837   : > { %v2437_v44 = vor.u32 %v2436_v50, %v2435_v45  ;;  %v2446_v25 = vsel %vm2438_vm13, %v2425_v8, %v2428_v19  ;;  %v2361_v46 = vsel %vm2359_vm5, %v2360_v38, %v4619_v11  ;;  %v2443_v40 = vsel %vm2441_vm15, %v2431_v58, 2102212464 }
 0x838   : > { %v2447_v29 = vsel %vm2441_vm15, %v2434_v30, 920167782  ;;  %v2450_v21 = vsel %vm2438_vm13, %v2428_v19, %v2431_v58  ;;  %v2362_v48 = vadd.s32 %v2361_v46, %v2357_v26  ;;  %vm2439_vm1 = vcmp.lt.s32.totalorder %v4591_v13, 2 }
 0x839   : > { %v2448_v32 = vsel %vm2440_vm14, %v2431_v58, %v2447_v29  ;;  %v2451_v5 = vsel %vm2441_vm15, %v2437_v44, 1326507024  ;;  %v2442_v57 = vsel %vm2438_vm13, %v2422_v39, %v2425_v8  ;;  %v2444_v9 = vsel %vm2440_vm14, %v2428_v19, %v2443_v40 }
 0x83a   : > { %v2449_v62 = vsel %vm2439_vm1, %v2446_v25, %v2448_v32  ;;  %v2452_v15 = vsel %vm2440_vm14, %v2434_v30, %v2451_v5  ;;  %v2363_v35 = vadd.s32 536870912, %v2362_v48  ;;  %v2445_v42 = vsel %vm2439_vm1, %v2442_v57, %v2444_v9 }
 0x83b   : > { %v2453_v52 = vsel %vm2439_vm1, %v2450_v21, %v2452_v15  ;;  %v4636_v43 = vmul.u32.u64.low %v2454_v53, %v2449_v62  ;;  %v4637_v56 = vmul.u32.u64.high %v2454_v53, %v2449_v62, %v4636_v43  ;;  %v2461_v13 = vmul.u32 %v2454_v53, %v2445_v42 }
 0x83c   : > { %v4639_v17 = vmul.u32.u64.low %v2454_v53, %v2453_v52  ;;  %v4640_v16 = vmul.u32.u64.high %v2454_v53, %v2453_v52, %v4639_v17  ;;  %v2364_v59 = vshrl.u32 %v2363_v35, 30  ;;  %v2358_v44 = vadd.s32 %v4618_v27, %v4615_v61 }
 0x83d   : > { %v2464_v11 = vadd.s32 1, %v4637_v56  ;;  %vm2407_vm11 = vcmp.le.f32.partialorder %v2406_v37, 0.7853982  ;;  %vm2394_vm5 = vweird.f32 %v4571_v49  ;;  %vm2498_vm1 = vweird.f32 %v4574_v2 }
 0x83e   : > { %v2365_v54 = vshll.u32 %v2364_v59, 30  ;;  %vm2463_vm2 = vc.u32 %v4640_v16, %v4636_v43  ;;  %v2462_v52 = vadd.s32 %v4636_v43, %v4640_v16  ;;  %v2388_v27 = vsub.s32 4, %v2364_v59 }
 0x83f   : > { %v2465_v19 = vsel %vm2463_vm2, %v2464_v11, %v4637_v56 }
 0x840   : > { %v2366_v8 = vsub.s32 %v2362_v48, %v2365_v54  ;;  %v2466_v31 = vadd.s32 %v2465_v19, %v2461_v13 }
 0x842   : > { %v2368_v55 = vsub.s32 0, %v2366_v8  ;;  %v2467_v18 = vadd.s32 536870912, %v2466_v31 }
 0x844   : > { %v3389_v0 = vmin.u32 %v2368_v55, %v2366_v8  ;;  %v2468_v50 = vshrl.u32 %v2467_v18, 30  ;;  %v2389_v55 = vsel %vm2304_vm8, %v2388_v27, %v2364_v59 }
 0x845   : > { %v2391_v16 = vsel %vm2303_vm9, 0, %v2389_v55 }
 0x846   : > { %v2370_v26 = vclz %v3389_v0  ;;  %v2469_v39 = vshll.u32 %v2468_v50, 30 }
 0x848   : > { %v3390_v58 = vadd.s32 4294967294, %v2370_v26  ;;  %v2470_v45 = vsub.s32 %v2466_v31, %v2469_v39 }
 0x84a   : > { %vm3391_vm3 = vcmp.lt.s32.totalorder %v3390_v58, 0  ;;  %v2472_v30 = vsub.s32 0, %v2470_v45 }
 0x84b   : > { %v2373_v38 = vsel %vm3391_vm3, 0, %v3390_v58  ;;  %v2492_v58 = vsub.s32 4, %v2468_v50 }
 0x84c   : > { %v2374_v53 = vsub.s32 32, %v2373_v38  ;;  %v2378_v25 = vsub.s32 4294967266, %v2373_v38  ;;  %v3393_v46 = vmin.u32 %v2472_v30, %v2470_v45  ;;  %v2375_v40 = vshll.u32 %v2366_v8, %v2373_v38 }
 0x84d   : > { %v2493_v30 = vsel %vm2408_vm10, %v2492_v58, %v2468_v50 }
 0x84e   : > { %v2376_v29 = vshrl.u32 %v2358_v44, %v2374_v53  ;;  %v2379_v21 = vadd.s32 127, %v2378_v25  ;;  %v2474_v48 = vclz %v3393_v46  ;;  %v2495_v25 = vsel %vm2407_vm11, 0, %v2493_v30 }
 0x850   : > { %v2377_v32 = vor.u32 %v2376_v29, %v2375_v40  ;;  %v2380_v5 = vshll.u32 %v2379_v21, 23  ;;  %v3394_v57 = vadd.s32 4294967294, %v2474_v48  ;;  %v2284_v40 = vadd.f32 %v4566_v41, %v4145_v28 }
 0x851   : > { %v2499_v48 = vadd.s32 3, %v2495_v25  ;;  %v2296_v41 = vadd.f32 %v4579_v60, %v4149_v33 }
 0x852   : > { %v2381_v9 = vor.u32 4788187, %v2380_v5  ;;  %vm3395_vm7 = vcmp.lt.s32.totalorder %v3394_v57, 0  ;;  %v2384_v15 = vcvt.s32.f32 %v2377_v32  ;;  %v2300_v50 = vmax.f32 %v2284_v40, 0.0 }
 0x853   : > { %v2477_v35 = vsel %vm3395_vm7, 0, %v3394_v57  ;;  %v2298_v5 = vadd.f32 %v4581_v36, %v4149_v33 }
 0x854   : > { %v2382_v62 = vand.u32 2147483647, %v2381_v9  ;;  %v2478_v56 = vsub.s32 32, %v2477_v35  ;;  %v2482_v17 = vsub.s32 4294967266, %v2477_v35  ;;  %v2479_v42 = vshll.u32 %v2470_v45, %v2477_v35 }
 0x855   : > { %v2395_v45 = vadd.s32 3, %v2391_v16 }
 0x856   : > { %v2385_v61 = vmul.f32 %v2384_v15, %v2382_v62  ;;  %v2480_v54 = vshrl.u32 %v2462_v52, %v2478_v56  ;;  %v2483_v11 = vadd.s32 127, %v2482_v17  ;;  %v2500_v62 = vand.u32 3, %v2499_v48 }
 0x857   : > { %v2396_v44 = vand.u32 3, %v2395_v45  ;;  %v2286_v56 = vadd.f32 %v4568_v4, %v4145_v28  ;;  %v3721_v28 = vld [vmem:[%s4913_s5 + $0x18] sm:$0xff]  ;;  %v3722_v4 = vld [vmem:[%s4913_s5 + $0x20] sm:$0xff] }
 0x858   : > { %v2386_v13 = vxor.u32 2147483648, %v2385_v61  ;;  %v2481_v8 = vor.u32 %v2480_v54, %v2479_v42  ;;  %v2484_v19 = vshll.u32 %v2483_v11, 23  ;;  %vm2505_vm13 = vcmp.eq.s32.totalorder %v2500_v62, 2 }
 0x859   : > { %vm2401_vm12 = vcmp.eq.s32.totalorder %v2396_v44, 2  ;;  %vm2398_vm0 = vcmp.eq.s32.totalorder %v2396_v44, 0  ;;  %vm2397_vm4 = vcmp.lt.s32.totalorder %v2396_v44, 2  ;;  %vm2502_vm14 = vcmp.eq.s32.totalorder %v2500_v62, 0 }
 0x85a   : > { %v2387_v31 = vsel %vm2304_vm8, %v2386_v13, %v2385_v61  ;;  %v2485_v43 = vor.u32 4788187, %v2484_v19  ;;  %v2488_v26 = vcvt.s32.f32 %v2481_v8  ;;  %vm2501_vm15 = vcmp.lt.s32.totalorder %v2500_v62, 2 }
 0x85b   : > { %v2390_v18 = vsel %vm2303_vm9, %v4571_v49, %v2387_v31  ;;  %v2301_v27 = vmax.f32 %v2286_v56, 0.0 }
 0x85c   : > { %3671 = vcosq.f32 %v2390_v18  ;;  %v2486_v0 = vand.u32 2147483647, %v2485_v43 }
 0x85d   : > { %3673 = vsinq.f32 %v2390_v18 }
 0x85e   : > { %v2489_v39 = vmul.f32 %v2488_v26, %v2486_v0 }
 0x860   : > { %v2490_v38 = vxor.u32 2147483648, %v2489_v39 }
 0x862   : > { %v2491_v6 = vsel %vm2408_vm10, %v2490_v38, %v2489_v39 }
 0x863   : > { %v2494_v59 = vsel %vm2407_vm11, %v4574_v2, %v2491_v6  ;;  %v3723_v2 = vld [vmem:[%s4913_s5 + $0x28] sm:$0xff] }
 0x864   : > { %3675 = vcosq.f32 %v2494_v59 }
 0x865   : > { %3677 = vsinq.f32 %v2494_v59 }
 0x866   : > { %v3672_v53 = vpop.eup %3671  ;;  %3679 = vtanh.f32 %v2298_v5 }
 0x867   : > { %v3674_v46 = vpop.eup %3673  ;;  %v2402_v29 = vxor.u32 2147483648, %v3672_v53  ;;  %3681 = vtanh.f32 %v2296_v41 }
 0x868   : > { %v2399_v21 = vxor.u32 2147483648, %v3674_v46 }
 0x869   : > { %v2403_v32 = vsel %vm2401_vm12, %v2402_v29, %v3674_v46 }
 0x86a   : > { %v2400_v37 = vsel %vm2398_vm0, %v3672_v53, %v2399_v21 }
 0x86b   : > { %v2404_v57 = vsel %vm2397_vm4, %v2400_v37, %v2403_v32 }
 0x86c   : > { %v2405_v9 = vsel %vm2394_vm5, nan, %v2404_v57 }
 0x86d   : > { %v3492_v15 = vpack.c.bf16 %v2405_v9, %v2300_v50 }
 0x86e   : > { %v3676_v35 = vpop.eup %3675 }
 0x86f   : > { %v3678_v52 = vpop.eup %3677  ;;  %v2506_v17 = vxor.u32 2147483648, %v3676_v35 }
 0x870   : > { %v2503_v61 = vxor.u32 2147483648, %v3678_v52  ;;  %v3680_v60 = vpop.eup %3679 }
 0x871   : > { %v2507_v36 = vsel %vm2505_vm13, %v2506_v17, %v3678_v52  ;;  %v3682_v11 = vpop.eup %3681 }
 0x872   : > { %v2504_v49 = vsel %vm2502_vm14, %v3676_v35, %v2503_v61 }
 0x873   : > { %v2508_v42 = vsel %vm2501_vm15, %v2504_v49, %v2507_v36 }
 0x874   : > { %v2509_v54 = vsel %vm2498_vm1, nan, %v2508_v42 }
 0x875   : > { %v3490_v33 = vpack.c.bf16 %v2509_v54, %v2301_v27 }
 0x877   : > { %3491 = vmatprep.subr.bf16.mxu1 %v3490_v33 }
 0x878   : > { %3493 = vmatpush1.bf16.msra.mxu1 %v3492_v15 }
 0x879   : > { %2516 = vmatprep.subr.mxu1 %v3680_v60 }
 0x87c   : > { %2517 = vmatpush1.msra.mxu1 %v3682_v11 }
 0x87d   : > { %3396 = vmatmul.mubr.msk.f32.vlgmr.msra.gmra.mrb[20].mxu1 %vm894_vm6, %v3721_v28 }
 0x87e   : > { %2582 = vmatprep.mubr.f32.mxu1 %v3753_v1 }
 0x881   : > { %3397 = vmatmul.mubr.msk.f32.gmra.mrb[22].mxu1 %vm894_vm6, %v3722_v4 }
 0x882   : > { %2588 = vmatprep.mubr.f32.mxu1 %v3753_v1 }
 0x885   : > { %3398 = vmatmul.mubr.msk.f32.gmra.mrb[24].mxu1 %vm894_vm6, %v3723_v2 }
 0x886   : > { %3166 = vmatprep.mubr.f32.mxu1 %v3753_v1 }
 0x950   : > { %v4680_v13 = vpop.f32.mrb[20].mxu1 }
 0x951   : > { %v4682_v8 = vpop.f32.mrb[21].mxu1 }
 0x954   : > { %v2584_v19 = vpop.f32.mrb[22].mxu1 }
 0x955   : > { %v4685_v31 = vadd.f32 %v2584_v19, %v4178_v20  ;;  %v2586_v55 = vpop.f32.mrb[23].mxu1 }
 0x956   : > { %v4688_v18 = vadd.f32 %v2586_v55, %v4178_v20 }
 0x957   : > { %v2597_v43 = vand.u32 2147483647, %v4685_v31  ;;  %v2600_v16 = vand.u32 2139095040, %v4685_v31  ;;  %vm2599_vm1 = vcmp.lt.s32.totalorder %v4685_v31, 0 }
 0x958   : > { %v2704_v0 = vand.u32 2139095040, %v4688_v18  ;;  %v4693_v26 = vpop.f32.mrb[24].mxu1  ;;  %v2701_v38 = vand.u32 2147483647, %v4688_v18 }
 0x959   : > { %v2601_v39 = vshrl.u32 %v2600_v16, 23  ;;  %v4695_v58 = vpop.f32.mrb[25].mxu1  ;;  %v2604_v45 = vand.u32 8388607, %v2597_v43 }
 0x95a   : > { %v2705_v6 = vshrl.u32 %v2704_v0, 23  ;;  %v2708_v53 = vand.u32 8388607, %v2701_v38 }
 0x95b   : > { %v3399_v30 = vadd.s32 4294967169, %v2601_v39  ;;  %v2605_v44 = vor.u32 8388608, %v2604_v45 }
 0x95c   : > { %v3403_v20 = vadd.s32 4294967169, %v2705_v6  ;;  %v2709_v32 = vor.u32 8388608, %v2708_v53 }
 0x95d   : > { %v2607_v59 = vadd.s32 1, %v3399_v30  ;;  %v4702_v48 = vshll.u32 %v2605_v44, 8 }
 0x95e   : > { %v2711_v25 = vadd.s32 1, %v3403_v20 }
 0x95f   : > { %vm2608_vm2 = vcmp.gt.s32.totalorder %v2607_v59, 0 }
 0x960   : > { %v2609_v46 = vsel %vm2608_vm2, %v2607_v59, 0  ;;  %vm2712_vm3 = vcmp.gt.s32.totalorder %v2711_v25, 0  ;;  %vm2598_vm2 = vcmp.le.f32.partialorder %v2597_v43, 0.7853982 }
 0x961   : > { %v2610_v40 = vshrl.u32 %v2609_v46, 5  ;;  %v2611_v29 = vand.u32 31, %v2609_v46  ;;  %v2713_v21 = vsel %vm2712_vm3, %v2711_v25, 0  ;;  %vm2703_vm3 = vcmp.lt.s32.totalorder %v4688_v18, 0 }
 0x962   : > { %v4705_v5 = vshrl.u32 %v2713_v21, 5  ;;  %v2715_v57 = vand.u32 31, %v2713_v21 }
 0x963   : > { %v2612_v37 = vsub.s32 32, %v2611_v29  ;;  %v2614_v50 = vshll.u32 %v3757_v3, %v2611_v29  ;;  %v2617_v9 = vshll.u32 %v3758_v7, %v2611_v29  ;;  %v2620_v62 = vshll.u32 %v3759_v10, %v2611_v29 }
 0x964   : > { %v2623_v15 = vshll.u32 %v3760_v12, %v2611_v29  ;;  %v2626_v41 = vshll.u32 %v3761_v14, %v2611_v29  ;;  %vm2629_vm7 = vcmp.lt.s32.totalorder %v2610_v40, 1  ;;  %vm2630_vm8 = vcmp.lt.s32.totalorder %v2610_v40, 2 }
 0x965   : > { %v2615_v35 = vshrl.u32 %v3758_v7, %v2612_v37  ;;  %v2618_v52 = vshrl.u32 %v3759_v10, %v2612_v37  ;;  %v2621_v56 = vshrl.u32 %v3760_v12, %v2612_v37  ;;  %v2613_v17 = vshrl.u32 %v3757_v3, %v2612_v37 }
 0x966   : > { %v2624_v61 = vshrl.u32 %v3761_v14, %v2612_v37  ;;  %v2627_v36 = vshrl.u32 %v3762_v23, %v2612_v37  ;;  %v2716_v54 = vsub.s32 32, %v2715_v57  ;;  %vm2631_vm9 = vcmp.lt.s32.totalorder %v2610_v40, 3 }
 0x967   : > { %v2616_v49 = vor.u32 %v2615_v35, %v2614_v50  ;;  %v2619_v27 = vor.u32 %v2618_v52, %v2617_v9  ;;  %v2622_v42 = vor.u32 %v2621_v56, %v2620_v62  ;;  %vm2632_vm10 = vcmp.lt.s32.totalorder %v2610_v40, 4 }
 0x968   : > { %v2625_v33 = vor.u32 %v2624_v61, %v2623_v15  ;;  %v2628_v60 = vor.u32 %v2627_v36, %v2626_v41  ;;  %v2718_v0 = vshll.u32 %v3757_v3, %v2715_v57  ;;  %v2719_v6 = vshrl.u32 %v3758_v7, %v2716_v54 }
 0x969   : > { %v2633_v11 = vsel %vm2629_vm7, %v2613_v17, %v2616_v49  ;;  %v2634_v28 = vsel %vm2632_vm10, %v2622_v42, 2102212464  ;;  %v2637_v4 = vsel %vm2629_vm7, %v2616_v49, %v2619_v27  ;;  %v2641_v2 = vsel %vm2629_vm7, %v2619_v27, %v2622_v42 }
 0x96a   : > { %v2635_v19 = vsel %vm2631_vm9, %v2619_v27, %v2634_v28  ;;  %v2638_v55 = vsel %vm2632_vm10, %v2625_v33, 920167782  ;;  %v2642_v16 = vsel %vm2632_vm10, %v2628_v60, 1326507024  ;;  %v2721_v30 = vshll.u32 %v3758_v7, %v2715_v57 }
 0x96b   : > { %v2639_v39 = vsel %vm2631_vm9, %v2622_v42, %v2638_v55  ;;  %v2643_v45 = vsel %vm2631_vm9, %v2625_v33, %v2642_v16  ;;  %v2636_v20 = vsel %vm2630_vm8, %v2633_v11, %v2635_v19  ;;  %v2722_v53 = vshrl.u32 %v3759_v10, %v2716_v54 }
 0x96c   : > { %v2640_v59 = vsel %vm2630_vm8, %v2637_v4, %v2639_v39  ;;  %v2644_v44 = vsel %vm2630_vm8, %v2641_v2, %v2643_v45  ;;  %v2720_v37 = vor.u32 %v2719_v6, %v2718_v0  ;;  %v2724_v9 = vshll.u32 %v3759_v10, %v2715_v57 }
 0x96d   : > { %v4728_v25 = vmul.u32.u64.low %v4702_v48, %v2644_v44  ;;  %v4729_v46 = vmul.u32.u64.high %v4702_v48, %v2644_v44, %v4728_v25  ;;  %v4732_v29 = vmul.u32.u64.low %v4702_v48, %v2640_v59  ;;  %v4733_v21 = vmul.u32.u64.high %v4702_v48, %v2640_v59, %v4732_v29 }
 0x96e   : > { %v2723_v50 = vor.u32 %v2722_v53, %v2721_v30  ;;  %v2725_v62 = vshrl.u32 %v3760_v12, %v2716_v54  ;;  %v2727_v15 = vshll.u32 %v3760_v12, %v2715_v57  ;;  %v2728_v40 = vshrl.u32 %v3761_v14, %v2716_v54 }
 0x96f   : > { %v2731_v41 = vshrl.u32 %v3762_v23, %v2716_v54  ;;  %v2749_v35 = vshll.u32 %v2709_v32, 8  ;;  %v2652_v52 = vmul.u32 %v4702_v48, %v2636_v20  ;;  %v2717_v56 = vshrl.u32 %v3757_v3, %v2716_v54 }
 0x970   : > { %v2726_v17 = vor.u32 %v2725_v62, %v2724_v9  ;;  %v2730_v61 = vshll.u32 %v3761_v14, %v2715_v57  ;;  %vm2654_vm11 = vc.u32 %v4729_v46, %v4732_v29  ;;  %v2655_v36 = vadd.s32 1, %v4733_v21 }
 0x971   : > { %v2729_v49 = vor.u32 %v2728_v40, %v2727_v15  ;;  %vm2733_vm12 = vcmp.lt.s32.totalorder %v4705_v5, 1  ;;  %vm2735_vm0 = vcmp.lt.s32.totalorder %v4705_v5, 3  ;;  %vm2736_vm4 = vcmp.lt.s32.totalorder %v4705_v5, 4 }
 0x972   : > { %v2732_v27 = vor.u32 %v2731_v41, %v2730_v61  ;;  %v2741_v32 = vsel %vm2733_vm12, %v2720_v37, %v2723_v50  ;;  %v2656_v48 = vsel %vm2654_vm11, %v2655_v36, %v4733_v21  ;;  %v2738_v42 = vsel %vm2736_vm4, %v2726_v17, 2102212464 }
 0x973   : > { %v2742_v54 = vsel %vm2736_vm4, %v2729_v49, 920167782  ;;  %v2745_v33 = vsel %vm2733_vm12, %v2723_v50, %v2726_v17  ;;  %v2657_v60 = vadd.s32 %v2656_v48, %v2652_v52  ;;  %vm2734_vm5 = vcmp.lt.s32.totalorder %v4705_v5, 2 }
 0x974   : > { %v2743_v57 = vsel %vm2735_vm0, %v2726_v17, %v2742_v54  ;;  %v2746_v11 = vsel %vm2736_vm4, %v2732_v27, 1326507024  ;;  %v2737_v28 = vsel %vm2733_vm12, %v2717_v56, %v2720_v37  ;;  %v2739_v4 = vsel %vm2735_vm0, %v2723_v50, %v2738_v42 }
 0x975   : > { %v2744_v2 = vsel %vm2734_vm5, %v2741_v32, %v2743_v57  ;;  %v2747_v19 = vsel %vm2735_vm0, %v2729_v49, %v2746_v11  ;;  %v2658_v55 = vadd.s32 536870912, %v2657_v60  ;;  %v2740_v20 = vsel %vm2734_vm5, %v2737_v28, %v2739_v4 }
 0x976   : > { %v2748_v16 = vsel %vm2734_vm5, %v2745_v33, %v2747_v19  ;;  %v4750_v0 = vmul.u32.u64.low %v2749_v35, %v2744_v2  ;;  %v4751_v39 = vmul.u32.u64.high %v2749_v35, %v2744_v2, %v4750_v0  ;;  %v2756_v5 = vmul.u32 %v2749_v35, %v2740_v20 }
 0x977   : > { %v4753_v45 = vmul.u32.u64.low %v2749_v35, %v2748_v16  ;;  %v4754_v6 = vmul.u32.u64.high %v2749_v35, %v2748_v16, %v4753_v45  ;;  %v2659_v30 = vshrl.u32 %v2658_v55, 30  ;;  %v2653_v61 = vadd.s32 %v4732_v29, %v4729_v46 }
 0x978   : > { %v2759_v44 = vadd.s32 1, %v4751_v39  ;;  %vm2702_vm7 = vcmp.le.f32.partialorder %v2701_v38, 0.7853982  ;;  %vm2689_vm11 = vweird.f32 %v4685_v31  ;;  %vm2793_vm5 = vweird.f32 %v4688_v18 }
 0x979   : > { %v2660_v59 = vshll.u32 %v2659_v30, 30  ;;  %vm2758_vm13 = vc.u32 %v4754_v6, %v4750_v0  ;;  %v2757_v2 = vadd.s32 %v4750_v0, %v4754_v6  ;;  %v2683_v29 = vsub.s32 4, %v2659_v30 }
 0x97a   : > { %v2760_v25 = vsel %vm2758_vm13, %v2759_v44, %v4751_v39 }
 0x97b   : > { %v2661_v53 = vsub.s32 %v2657_v60, %v2660_v59  ;;  %v2761_v21 = vadd.s32 %v2760_v25, %v2756_v5 }
 0x97d   : > { %v2663_v37 = vsub.s32 0, %v2661_v53  ;;  %v2762_v50 = vadd.s32 536870912, %v2761_v21 }
 0x97f   : > { %v3400_v9 = vmin.u32 %v2663_v37, %v2661_v53  ;;  %v2763_v62 = vshrl.u32 %v2762_v50, 30 }
 0x981   : > { %v2665_v15 = vclz %v3400_v9  ;;  %v2764_v40 = vshll.u32 %v2763_v62, 30  ;;  %v2787_v9 = vsub.s32 4, %v2763_v62 }
 0x983   : > { %v3401_v41 = vadd.s32 4294967294, %v2665_v15  ;;  %v2765_v52 = vsub.s32 %v2761_v21, %v2764_v40 }
 0x985   : > { %vm3402_vm14 = vcmp.lt.s32.totalorder %v3401_v41, 0  ;;  %v2767_v17 = vsub.s32 0, %v2765_v52 }
 0x986   : > { %v2668_v56 = vsel %vm3402_vm14, 0, %v3401_v41  ;;  %v2788_v41 = vsel %vm2703_vm3, %v2787_v9, %v2763_v62 }
 0x987   : > { %v2669_v35 = vsub.s32 32, %v2668_v56  ;;  %v2673_v36 = vsub.s32 4294967266, %v2668_v56  ;;  %v3404_v49 = vmin.u32 %v2767_v17, %v2765_v52  ;;  %v2670_v27 = vshll.u32 %v2661_v53, %v2668_v56 }
 0x988   : > { %v2684_v53 = vsel %vm2599_vm1, %v2683_v29, %v2659_v30  ;;  %v2790_v17 = vsel %vm2702_vm7, 0, %v2788_v41 }
 0x989   : > { %v2671_v32 = vshrl.u32 %v2653_v61, %v2669_v35  ;;  %v2674_v48 = vadd.s32 127, %v2673_v36  ;;  %v2769_v42 = vclz %v3404_v49  ;;  %v2686_v6 = vsel %vm2598_vm2, 0, %v2684_v53 }
 0x98a   : > { %v2690_v15 = vadd.s32 3, %v2686_v6  ;;  %v2579_v35 = vadd.f32 %v4680_v13, %v4265_v22  ;;  %v2591_v13 = vadd.f32 %v4693_v26, %v4269_v24 }
 0x98b   : > { %v2672_v54 = vor.u32 %v2671_v32, %v2670_v27  ;;  %v2675_v33 = vshll.u32 %v2674_v48, 23  ;;  %v3405_v60 = vadd.s32 4294967294, %v2769_v42  ;;  %v2794_v27 = vadd.s32 3, %v2790_v17 }
 0x98c   : > { %v2595_v62 = vmax.f32 %v2579_v35, 0.0  ;;  %v2593_v48 = vadd.f32 %v4695_v58, %v4269_v24 }
 0x98d   : > { %v2676_v57 = vor.u32 4788187, %v2675_v33  ;;  %vm3406_vm15 = vcmp.lt.s32.totalorder %v3405_v60, 0  ;;  %v2679_v28 = vcvt.s32.f32 %v2672_v54  ;;  %v2795_v33 = vand.u32 3, %v2794_v27 }
 0x98e   : > { %v2772_v4 = vsel %vm3406_vm15, 0, %v3405_v60 }
 0x98f   : > { %v2677_v11 = vand.u32 2147483647, %v2676_v57  ;;  %v2773_v19 = vsub.s32 32, %v2772_v4  ;;  %v2777_v55 = vsub.s32 4294967266, %v2772_v4  ;;  %v2774_v16 = vshll.u32 %v2765_v52, %v2772_v4 }
 0x990   : > { %v2691_v52 = vand.u32 3, %v2690_v15  ;;  %vm2800_vm12 = vcmp.eq.s32.totalorder %v2795_v33, 2  ;;  %vm2797_vm0 = vcmp.eq.s32.totalorder %v2795_v33, 0  ;;  %vm2796_vm4 = vcmp.lt.s32.totalorder %v2795_v33, 2 }
 0x991   : > { %v2680_v46 = vmul.f32 %v2679_v28, %v2677_v11  ;;  %v2775_v39 = vshrl.u32 %v2757_v2, %v2773_v19  ;;  %v2778_v45 = vadd.s32 127, %v2777_v55  ;;  %v2581_v28 = vadd.f32 %v4682_v8, %v4265_v22  ;;  %v3724_v22 = vld [vmem:[%s4913_s5 + $0x30] sm:$0xff]  ;;  %v3725_v8 = vld [vmem:[%s4913_s5 + $0x38] sm:$0xff] }
 0x992   : > { %vm2696_vm8 = vcmp.eq.s32.totalorder %v2691_v52, 2  ;;  %vm2693_vm9 = vcmp.eq.s32.totalorder %v2691_v52, 0  ;;  %vm2692_vm10 = vcmp.lt.s32.totalorder %v2691_v52, 2 }
 0x993   : > { %v2681_v20 = vxor.u32 2147483648, %v2680_v46  ;;  %v2776_v59 = vor.u32 %v2775_v39, %v2774_v16  ;;  %v2779_v44 = vshll.u32 %v2778_v45, 23  ;;  %v2596_v19 = vmax.f32 %v2581_v28, 0.0 }
 0x995   : > { %v2682_v5 = vsel %vm2599_vm1, %v2681_v20, %v2680_v46  ;;  %v2780_v0 = vor.u32 4788187, %v2779_v44  ;;  %v2783_v37 = vcvt.s32.f32 %v2776_v59 }
 0x996   : > { %v2685_v25 = vsel %vm2598_vm2, %v4685_v31, %v2682_v5 }
 0x997   : > { %3683 = vcosq.f32 %v2685_v25  ;;  %v2781_v21 = vand.u32 2147483647, %v2780_v0 }
 0x998   : > { %3685 = vsinq.f32 %v2685_v25 }
 0x999   : > { %v2784_v50 = vmul.f32 %v2783_v37, %v2781_v21 }
 0x99b   : > { %v2785_v40 = vxor.u32 2147483648, %v2784_v50 }
 0x99d   : > { %v2786_v43 = vsel %vm2703_vm3, %v2785_v40, %v2784_v50 }
 0x99e   : > { %v2789_v30 = vsel %vm2702_vm7, %v4688_v18, %v2786_v43  ;;  %v3726_v18 = vld [vmem:[%s4913_s5 + $0x40] sm:$0xff] }
 0x99f   : > { %3687 = vcosq.f32 %v2789_v30 }
 0x9a0   : > { %3689 = vsinq.f32 %v2789_v30 }
 0x9a1   : > { %v3684_v56 = vpop.eup %3683  ;;  %3691 = vtanh.f32 %v2593_v48 }
 0x9a2   : > { %v3686_v61 = vpop.eup %3685  ;;  %v2697_v36 = vxor.u32 2147483648, %v3684_v56  ;;  %3693 = vtanh.f32 %v2591_v13 }
 0x9a3   : > { %v2694_v49 = vxor.u32 2147483648, %v3686_v61 }
 0x9a4   : > { %v2698_v32 = vsel %vm2696_vm8, %v2697_v36, %v3686_v61 }
 0x9a5   : > { %v2695_v38 = vsel %vm2693_vm9, %v3684_v56, %v2694_v49 }
 0x9a6   : > { %v2699_v42 = vsel %vm2692_vm10, %v2695_v38, %v2698_v32 }
 0x9a7   : > { %v2700_v54 = vsel %vm2689_vm11, nan, %v2699_v42 }
 0x9a8   : > { %v3496_v60 = vpack.c.bf16 %v2700_v54, %v2595_v62 }
 0x9a9   : > { %v3688_v57 = vpop.eup %3687 }
 0x9aa   : > { %v3690_v11 = vpop.eup %3689  ;;  %v2801_v4 = vxor.u32 2147483648, %v3688_v57 }
 0x9ab   : > { %v2798_v2 = vxor.u32 2147483648, %v3690_v11  ;;  %v3692_v26 = vpop.eup %3691 }
 0x9ac   : > { %v2802_v58 = vsel %vm2800_vm12, %v2801_v4, %v3690_v11  ;;  %v3694_v29 = vpop.eup %3693 }
 0x9ad   : > { %v2799_v31 = vsel %vm2797_vm0, %v3688_v57, %v2798_v2 }
 0x9ae   : > { %v2803_v55 = vsel %vm2796_vm4, %v2799_v31, %v2802_v58 }
 0x9af   : > { %v2804_v46 = vsel %vm2793_vm5, nan, %v2803_v55 }
 0x9b0   : > { %v3494_v24 = vpack.c.bf16 %v2804_v46, %v2596_v19 }
 0x9b2   : > { %3495 = vmatprep.subr.bf16.mxu0 %v3494_v24 }
 0x9b3   : > { %3497 = vmatpush1.bf16.msra.mxu0 %v3496_v60 }
 0x9b4   : > { %2811 = vmatprep.subr.mxu0 %v3692_v26 }
 0x9b7   : > { %2812 = vmatpush1.msra.mxu0 %v3694_v29 }
 0x9b8   : > { %3407 = vmatmul.mubr.msk.f32.vlgmr.msra.gmra.mrb[24].mxu0 %vm894_vm6, %v3724_v22 }
 0x9b9   : > { %2877 = vmatprep.mubr.f32.mxu0 %v3753_v1 }
 0x9bc   : > { %3408 = vmatmul.mubr.msk.f32.gmra.mrb[26].mxu0 %vm894_vm6, %v3725_v8 }
 0x9bd   : > { %2883 = vmatprep.mubr.f32.mxu0 %v3753_v1 }
 0x9c0   : > { %3409 = vmatmul.mubr.msk.f32.gmra.mrb[28].mxu0 %vm894_vm6, %v3726_v18 }
 0xa8b   : > { %v4793_v16 = vpop.f32.mrb[24].mxu0 }
 0xa8c   : > { %v4795_v39 = vpop.f32.mrb[25].mxu0 }
 0xa8f   : > { %v2879_v45 = vpop.f32.mrb[26].mxu0 }
 0xa90   : > { %v4798_v20 = vadd.f32 %v2879_v45, %v4298_v51  ;;  %v2881_v59 = vpop.f32.mrb[27].mxu0 }
 0xa91   : > { %v4801_v44 = vadd.f32 %v2881_v59, %v4298_v51 }
 0xa92   : > { %v2892_v1 = vand.u32 2147483647, %v4798_v20  ;;  %v2895_v5 = vand.u32 2139095040, %v4798_v20  ;;  %vm2894_vm5 = vcmp.lt.s32.totalorder %v4798_v20, 0 }
 0xa93   : > { %v2999_v53 = vand.u32 2139095040, %v4801_v44  ;;  %v4806_v25 = vpop.f32.mrb[28].mxu0  ;;  %v2996_v37 = vand.u32 2147483647, %v4801_v44 }
 0xa94   : > { %v2896_v0 = vshrl.u32 %v2895_v5, 23  ;;  %v4808_v6 = vpop.f32.mrb[29].mxu0  ;;  %v2899_v21 = vand.u32 8388607, %v2892_v1 }
 0xa95   : > { %v3000_v50 = vshrl.u32 %v2999_v53, 23  ;;  %v3003_v43 = vand.u32 8388607, %v2996_v37 }
 0xa96   : > { %v3410_v9 = vadd.s32 4294967169, %v2896_v0  ;;  %v2900_v40 = vor.u32 8388608, %v2899_v21 }
 0xa97   : > { %v3414_v51 = vadd.s32 4294967169, %v3000_v50  ;;  %v3004_v35 = vor.u32 8388608, %v3003_v43 }
 0xa98   : > { %v2902_v15 = vadd.s32 1, %v3410_v9  ;;  %v4815_v61 = vshll.u32 %v2900_v40, 8 }
 0xa99   : > { %v3006_v41 = vadd.s32 1, %v3414_v51 }
 0xa9a   : > { %vm2903_vm13 = vcmp.gt.s32.totalorder %v2902_v15, 0 }
 0xa9b   : > { %v2904_v30 = vsel %vm2903_vm13, %v2902_v15, 0  ;;  %vm3007_vm14 = vcmp.gt.s32.totalorder %v3006_v41, 0  ;;  %vm2893_vm13 = vcmp.le.f32.partialorder %v2892_v1, 0.7853982 }
 0xa9c   : > { %v2905_v52 = vshrl.u32 %v2904_v30, 5  ;;  %v2906_v56 = vand.u32 31, %v2904_v30  ;;  %v3008_v17 = vsel %vm3007_vm14, %v3006_v41, 0  ;;  %vm2998_vm14 = vcmp.lt.s32.totalorder %v4801_v44, 0 }
 0xa9d   : > { %v4818_v27 = vshrl.u32 %v3008_v17, 5  ;;  %v3010_v32 = vand.u32 31, %v3008_v17 }
 0xa9e   : > { %v2907_v36 = vsub.s32 32, %v2906_v56  ;;  %v2909_v49 = vshll.u32 %v3757_v3, %v2906_v56  ;;  %v2912_v38 = vshll.u32 %v3758_v7, %v2906_v56  ;;  %v2915_v62 = vshll.u32 %v3759_v10, %v2906_v56 }
 0xa9f   : > { %v2918_v48 = vshll.u32 %v3760_v12, %v2906_v56  ;;  %v2921_v42 = vshll.u32 %v3761_v14, %v2906_v56  ;;  %vm2924_vm15 = vcmp.lt.s32.totalorder %v2905_v52, 1  ;;  %vm2925_vm1 = vcmp.lt.s32.totalorder %v2905_v52, 2 }
 0xaa0   : > { %v2910_v54 = vshrl.u32 %v3758_v7, %v2907_v36  ;;  %v2913_v33 = vshrl.u32 %v3759_v10, %v2907_v36  ;;  %v2916_v60 = vshrl.u32 %v3760_v12, %v2907_v36  ;;  %v2908_v13 = vshrl.u32 %v3757_v3, %v2907_v36 }
 0xaa1   : > { %v2919_v57 = vshrl.u32 %v3761_v14, %v2907_v36  ;;  %v2922_v11 = vshrl.u32 %v3762_v23, %v2907_v36  ;;  %v3011_v58 = vsub.s32 32, %v3010_v32  ;;  %vm2926_vm2 = vcmp.lt.s32.totalorder %v2905_v52, 3 }
 0xaa2   : > { %v2911_v28 = vor.u32 %v2910_v54, %v2909_v49  ;;  %v2914_v4 = vor.u32 %v2913_v33, %v2912_v38  ;;  %v2917_v2 = vor.u32 %v2916_v60, %v2915_v62  ;;  %vm2927_vm3 = vcmp.lt.s32.totalorder %v2905_v52, 4 }
 0xaa3   : > { %v2920_v31 = vor.u32 %v2919_v57, %v2918_v48  ;;  %v2923_v19 = vor.u32 %v2922_v11, %v2921_v42  ;;  %v3013_v18 = vshll.u32 %v3757_v3, %v3010_v32  ;;  %v3014_v5 = vshrl.u32 %v3758_v7, %v3011_v58 }
 0xaa4   : > { %v2928_v55 = vsel %vm2924_vm15, %v2908_v13, %v2911_v28  ;;  %v2929_v46 = vsel %vm2927_vm3, %v2917_v2, 2102212464  ;;  %v2932_v24 = vsel %vm2924_vm15, %v2911_v28, %v2914_v4  ;;  %v2936_v26 = vsel %vm2924_vm15, %v2914_v4, %v2917_v2 }
 0xaa5   : > { %v2930_v29 = vsel %vm2926_vm2, %v2914_v4, %v2929_v46  ;;  %v2933_v22 = vsel %vm2927_vm3, %v2920_v31, 920167782  ;;  %v2937_v8 = vsel %vm2927_vm3, %v2923_v19, 1326507024  ;;  %v3016_v53 = vshll.u32 %v3758_v7, %v3010_v32 }
 0xaa6   : > { %v2934_v45 = vsel %vm2926_vm2, %v2917_v2, %v2933_v22  ;;  %v2938_v59 = vsel %vm2926_vm2, %v2920_v31, %v2937_v8  ;;  %v2931_v0 = vsel %vm2925_vm1, %v2928_v55, %v2930_v29  ;;  %v3017_v9 = vshrl.u32 %v3759_v10, %v3011_v58 }
 0xaa7   : > { %v2935_v21 = vsel %vm2925_vm1, %v2932_v24, %v2934_v45  ;;  %v2939_v50 = vsel %vm2925_vm1, %v2936_v26, %v2938_v59  ;;  %v3015_v41 = vor.u32 %v3014_v5, %v3013_v18  ;;  %v3019_v7 = vshll.u32 %v3759_v10, %v3010_v32 }
 0xaa8   : > { %v4841_v51 = vmul.u32.u64.low %v4815_v61, %v2939_v50  ;;  %v4842_v15 = vmul.u32.u64.high %v4815_v61, %v2939_v50, %v4841_v51  ;;  %v4845_v40 = vmul.u32.u64.low %v4815_v61, %v2935_v21  ;;  %v4846_v43 = vmul.u32.u64.high %v4815_v61, %v2935_v21, %v4845_v40 }
 0xaa9   : > { %v3018_v30 = vor.u32 %v3017_v9, %v3016_v53  ;;  %v3020_v56 = vshrl.u32 %v3760_v12, %v3011_v58  ;;  %v3022_v17 = vshll.u32 %v3760_v12, %v3010_v32  ;;  %v3023_v52 = vshrl.u32 %v3761_v14, %v3011_v58 }
 0xaaa   : > { %v3026_v36 = vshrl.u32 %v3762_v23, %v3011_v58  ;;  %v3044_v49 = vshll.u32 %v3004_v35, 8  ;;  %v2947_v38 = vmul.u32 %v4815_v61, %v2931_v0  ;;  %v3012_v62 = vshrl.u32 %v3757_v3, %v3011_v58 }
 0xaab   : > { %v3021_v48 = vor.u32 %v3020_v56, %v3019_v7  ;;  %v3025_v42 = vshll.u32 %v3761_v14, %v3010_v32  ;;  %vm2949_vm7 = vc.u32 %v4842_v15, %v4845_v40  ;;  %v2950_v10 = vadd.s32 1, %v4846_v43 }
 0xaac   : > { %v3024_v54 = vor.u32 %v3023_v52, %v3022_v17  ;;  %vm3028_vm8 = vcmp.lt.s32.totalorder %v4818_v27, 1  ;;  %vm3030_vm9 = vcmp.lt.s32.totalorder %v4818_v27, 3  ;;  %vm3031_vm10 = vcmp.lt.s32.totalorder %v4818_v27, 4 }
 0xaad   : > { %v3027_v12 = vor.u32 %v3026_v36, %v3025_v42  ;;  %v3036_v23 = vsel %vm3028_vm8, %v3015_v41, %v3018_v30  ;;  %v2951_v61 = vsel %vm2949_vm7, %v2950_v10, %v4846_v43  ;;  %v3033_v35 = vsel %vm3031_vm10, %v3021_v48, 2102212464 }
 0xaae   : > { %v3037_v3 = vsel %vm3031_vm10, %v3024_v54, 920167782  ;;  %v3040_v33 = vsel %vm3028_vm8, %v3018_v30, %v3021_v48  ;;  %v2952_v60 = vadd.s32 %v2951_v61, %v2947_v38  ;;  %vm3029_vm11 = vcmp.lt.s32.totalorder %v4818_v27, 2 }
 0xaaf   : > { %v3038_v14 = vsel %vm3030_vm9, %v3021_v48, %v3037_v3  ;;  %v3041_v32 = vsel %vm3031_vm10, %v3027_v12, 1326507024  ;;  %v3032_v13 = vsel %vm3028_vm8, %v3012_v62, %v3015_v41  ;;  %v3034_v57 = vsel %vm3030_vm9, %v3018_v30, %v3033_v35 }
 0xab0   : > { %v3039_v11 = vsel %vm3029_vm11, %v3036_v23, %v3038_v14  ;;  %v3042_v28 = vsel %vm3030_vm9, %v3024_v54, %v3041_v32  ;;  %v2953_v4 = vadd.s32 536870912, %v2952_v60  ;;  %v3035_v24 = vsel %vm3029_vm11, %v3032_v13, %v3034_v57 }
 0xab1   : > { %v3043_v2 = vsel %vm3029_vm11, %v3040_v33, %v3042_v28  ;;  %v4863_v58 = vmul.u32.u64.low %v3044_v49, %v3039_v11  ;;  %v4864_v31 = vmul.u32.u64.high %v3044_v49, %v3039_v11, %v4863_v58  ;;  %v3051_v27 = vmul.u32 %v3044_v49, %v3035_v24 }
 0xab2   : > { %v4866_v19 = vmul.u32.u64.low %v3044_v49, %v3043_v2  ;;  %v4867_v55 = vmul.u32.u64.high %v3044_v49, %v3043_v2, %v4866_v19  ;;  %v2954_v46 = vshrl.u32 %v2953_v4, 30  ;;  %v2948_v41 = vadd.s32 %v4845_v40, %v4842_v15 }
 0xab3   : > { %v3054_v29 = vadd.s32 1, %v4864_v31  ;;  %vm2997_vm15 = vcmp.le.f32.partialorder %v2996_v37, 0.7853982  ;;  %vm2984_vm7 = vweird.f32 %v4798_v20  ;;  %vm3088_vm11 = vweird.f32 %v4801_v44 }
 0xab4   : > { %v2955_v26 = vshll.u32 %v2954_v46, 30  ;;  %vm3053_vm12 = vc.u32 %v4867_v55, %v4863_v58  ;;  %v3052_v23 = vadd.s32 %v4863_v58, %v4867_v55  ;;  %v2978_v40 = vsub.s32 4, %v2954_v46 }
 0xab5   : > { %v3055_v8 = vsel %vm3053_vm12, %v3054_v29, %v4864_v31 }
 0xab6   : > { %v2956_v22 = vsub.s32 %v2952_v60, %v2955_v26  ;;  %v3056_v18 = vadd.s32 %v3055_v8, %v3051_v27  ;;  %v2979_v11 = vsel %vm2894_vm5, %v2978_v40, %v2954_v46 }
 0xab7   : > { %v2981_v2 = vsel %vm2893_vm13, 0, %v2979_v11 }
 0xab8   : > { %v2958_v45 = vsub.s32 0, %v2956_v22  ;;  %v3057_v59 = vadd.s32 536870912, %v3056_v18  ;;  %v2985_v24 = vadd.s32 3, %v2981_v2 }
 0xaba   : > { %v3411_v5 = vmin.u32 %v2958_v45, %v2956_v22  ;;  %v3058_v53 = vshrl.u32 %v3057_v59, 30  ;;  %v2986_v27 = vand.u32 3, %v2985_v24  ;;  %v2874_v45 = vadd.f32 %v4793_v16, %v4385_v63 }
 0xabb   : > { %v2886_v16 = vadd.f32 %v4806_v25, %v4389_v34 }
 0xabc   : > { %v2960_v0 = vclz %v3411_v5  ;;  %v3059_v21 = vshll.u32 %v3058_v53, 30  ;;  %v3082_v55 = vsub.s32 4, %v3058_v53  ;;  %vm2991_vm1 = vcmp.eq.s32.totalorder %v2986_v27, 2 }
 0xabd   : > { %vm2988_vm2 = vcmp.eq.s32.totalorder %v2986_v27, 0  ;;  %vm2987_vm3 = vcmp.lt.s32.totalorder %v2986_v27, 2 }
 0xabe   : > { %v3412_v50 = vadd.s32 4294967294, %v2960_v0  ;;  %v3060_v9 = vsub.s32 %v3056_v18, %v3059_v21  ;;  %v3083_v29 = vsel %vm2998_vm14, %v3082_v55, %v3058_v53  ;;  %v2890_v53 = vmax.f32 %v2874_v45, 0.0 }
 0xabf   : > { %v3085_v8 = vsel %vm2997_vm15, 0, %v3083_v29 }
 0xac0   : > { %vm3413_vm0 = vcmp.lt.s32.totalorder %v3412_v50, 0  ;;  %v3062_v43 = vsub.s32 0, %v3060_v9  ;;  %v3089_v0 = vadd.s32 3, %v3085_v8 }
 0xac1   : > { %v2963_v51 = vsel %vm3413_vm0, 0, %v3412_v50  ;;  %v2888_v50 = vadd.f32 %v4808_v6, %v4389_v34 }
 0xac2   : > { %v2964_v30 = vsub.s32 32, %v2963_v51  ;;  %v2968_v7 = vsub.s32 4294967266, %v2963_v51  ;;  %v3415_v56 = vmin.u32 %v3062_v43, %v3060_v9  ;;  %v2965_v17 = vshll.u32 %v2956_v22, %v2963_v51 }
 0xac3   : > { %v3090_v43 = vand.u32 3, %v3089_v0 }
 0xac4   : > { %v2966_v52 = vshrl.u32 %v2948_v41, %v2964_v30  ;;  %v2969_v36 = vadd.s32 127, %v2968_v7  ;;  %v3064_v49 = vclz %v3415_v56  ;;  %v2876_v56 = vadd.f32 %v4795_v39, %v4385_v63  ;;  %v3727_v63 = vld [vmem:[%s4914_s6] sm:$0x7] }
 0xac5   : > { %vm3095_vm8 = vcmp.eq.s32.totalorder %v3090_v43, 2  ;;  %vm3092_vm9 = vcmp.eq.s32.totalorder %v3090_v43, 0  ;;  %vm3091_vm10 = vcmp.lt.s32.totalorder %v3090_v43, 2 }
 0xac6   : > { %v2967_v38 = vor.u32 %v2966_v52, %v2965_v17  ;;  %v2970_v62 = vshll.u32 %v2969_v36, 23  ;;  %v3416_v48 = vadd.s32 4294967294, %v3064_v49  ;;  %v2891_v36 = vmax.f32 %v2876_v56, 0.0 }
 0xac8   : > { %v2971_v42 = vor.u32 4788187, %v2970_v62  ;;  %vm3417_vm4 = vcmp.lt.s32.totalorder %v3416_v48, 0  ;;  %v2974_v54 = vcvt.s32.f32 %v2967_v38 }
 0xac9   : > { %v3067_v12 = vsel %vm3417_vm4, 0, %v3416_v48 }
 0xaca   : > { %v2972_v10 = vand.u32 2147483647, %v2971_v42  ;;  %v3068_v61 = vsub.s32 32, %v3067_v12  ;;  %v3072_v35 = vsub.s32 4294967266, %v3067_v12  ;;  %v3069_v3 = vshll.u32 %v3060_v9, %v3067_v12 }
 0xacc   : > { %v2975_v15 = vmul.f32 %v2974_v54, %v2972_v10  ;;  %v3070_v33 = vshrl.u32 %v3052_v23, %v3068_v61  ;;  %v3073_v60 = vadd.s32 127, %v3072_v35 }
 0xace   : > { %v2976_v14 = vxor.u32 2147483648, %v2975_v15  ;;  %v3071_v32 = vor.u32 %v3070_v33, %v3069_v3  ;;  %v3074_v13 = vshll.u32 %v3073_v60, 23 }
 0xad0   : > { %v2977_v57 = vsel %vm2894_vm5, %v2976_v14, %v2975_v15  ;;  %v3075_v4 = vor.u32 4788187, %v3074_v13  ;;  %v3078_v31 = vcvt.s32.f32 %v3071_v32 }
 0xad1   : > { %v2980_v28 = vsel %vm2893_vm13, %v4798_v20, %v2977_v57 }
 0xad2   : > { %3695 = vcosq.f32 %v2980_v28  ;;  %v3076_v58 = vand.u32 2147483647, %v3075_v4 }
 0xad3   : > { %3697 = vsinq.f32 %v2980_v28 }
 0xad4   : > { %v3079_v19 = vmul.f32 %v3078_v31, %v3076_v58 }
 0xad6   : > { %v3080_v26 = vxor.u32 2147483648, %v3079_v19 }
 0xad8   : > { %v3081_v1 = vsel %vm2998_vm14, %v3080_v26, %v3079_v19 }
 0xad9   : > { %v3084_v46 = vsel %vm2997_vm15, %v4801_v44, %v3081_v1 }
 0xada   : > { %3699 = vcosq.f32 %v3084_v46 }
 0xadb   : > { %3701 = vsinq.f32 %v3084_v46 }
 0xadc   : > { %v3696_v22 = vpop.eup %3695  ;;  %3703 = vtanh.f32 %v2888_v50 }
 0xadd   : > { %v3698_v18 = vpop.eup %3697  ;;  %v2992_v59 = vxor.u32 2147483648, %v3696_v22  ;;  %3705 = vtanh.f32 %v2886_v16 }
 0xade   : > { %v2989_v5 = vxor.u32 2147483648, %v3698_v18 }
 0xadf   : > { %v2993_v21 = vsel %vm2991_vm1, %v2992_v59, %v3698_v18 }
 0xae0   : > { %v2990_v37 = vsel %vm2988_vm2, %v3696_v22, %v2989_v5 }
 0xae1   : > { %v2994_v9 = vsel %vm2987_vm3, %v2990_v37, %v2993_v21 }
 0xae2   : > { %v2995_v51 = vsel %vm2984_vm7, nan, %v2994_v9 }
 0xae3   : > { %v3500_v41 = vpack.c.bf16 %v2995_v51, %v2890_v53 }
 0xae4   : > { %v3700_v30 = vpop.eup %3699 }
 0xae5   : > { %v3702_v7 = vpop.eup %3701  ;;  %v3096_v17 = vxor.u32 2147483648, %v3700_v30 }
 0xae6   : > { %v3093_v52 = vxor.u32 2147483648, %v3702_v7  ;;  %v3704_v25 = vpop.eup %3703 }
 0xae7   : > { %v3097_v6 = vsel %vm3095_vm8, %v3096_v17, %v3702_v7  ;;  %v3706_v62 = vpop.eup %3705 }
 0xae8   : > { %v3094_v20 = vsel %vm3092_vm9, %v3700_v30, %v3093_v52 }
 0xae9   : > { %v3098_v49 = vsel %vm3091_vm10, %v3094_v20, %v3097_v6 }
 0xaea   : > { %v3099_v38 = vsel %vm3088_vm11, nan, %v3098_v49 }
 0xaeb   : > { %v3498_v34 = vpack.c.bf16 %v3099_v38, %v2891_v36 }
 0xaed   : > { %3499 = vmatprep.subr.bf16.mxu1 %v3498_v34 }
 0xaee   : > { %3501 = vmatpush1.bf16.msra.mxu1 %v3500_v41 }
 0xaef   : > { %3106 = vmatprep.subr.mxu1 %v3704_v25 }
 0xaf2   : > { %3107 = vmatpush1.msra.mxu1 %v3706_v62 }
 0xaf3   : > { %3418 = vmatmul.mubr.msk.f32.vlgmr.msra.gmra.mrb[26].mxu1 %vm894_vm6, %v3727_v63 }
 0xbc6   : > { %v3168_v39 = vpop.f32.mrb[26].mxu1 }
 0xbc7   : > { %v3169_v48 = vadd.f32 %v3168_v39, %v4446_v47  ;;  %v3170_v44 = vpop.f32.mrb[27].mxu1 }
 0xbc8   : > { %v3171_v42 = vadd.f32 %v3170_v44, %v4446_v47 }
 0xbc9   : > { %v3419_v10 = vmul.f32 -1.442695, %v3169_v48 }
 0xbca   : > { %v3420_v54 = vmul.f32 -1.442695, %v3171_v42 }
 0xbcb   : > { %3707 = vpow2.f32 %v3419_v10 }
 0xbcc   : > { %3709 = vpow2.f32 %v3420_v54 }
 0xbd5   : > { %v3708_v12 = vpop.eup %3707 }
 0xbd6   : > { %v3710_v23 = vpop.eup %3709  ;;  %v3179_v61 = vadd.f32 1.0, %v3708_v12 }
 0xbd7   : > { %v3180_v35 = vadd.f32 1.0, %v3710_v23 }
 0xbd8   : > { %3711 = vrcp.f32 %v3179_v61 }
 0xbd9   : > { %3713 = vrcp.f32 %v3180_v35 }
 0xbe2   : > { %v3712_v15 = vpop.eup %3711 }
 0xbe3   : > { %v3714_v40 = vpop.eup %3713 }
 0xbe4   : > { %v3187_v3 = vcombine.low %v3712_v15, %v3714_v40 }
 0xbe6   : > { %3421 = vst [vmem:[%s4527_s13 + $0x8] sm:$0x77] %v3187_v3 }
 0xbe7 PF: > { %s18_s29 = sadd.s32 1, %s3750_s29   ;;  %s4921_s27 = smov %s3746_s28 }
 0xbe8   : > { %p15_p5 = scmp.ge.s32.totalorder %s18_s29, 4   ;;  %s4922_s28 = smov %s4924_s30 }
 0xbea   :  { %17 = sbr.rel (!%p15_p5) target bundleno = 2 (0x2), region = 92 }

</bundles_post_ra>
